<compile_context>
chip_gen: v5e
topology: v5e:2x2
jax: 0.10.0
libtpu: 0.0.40
codegen_flags: <defaults>
</compile_context>

<pallas_src>
import math
import jax
import jax.numpy as jnp
from jax import lax
from jax.experimental import pallas as pl
from jax.experimental.pallas import tpu as pltpu


def _round_up(x, m):
    return ((x + m - 1) // m) * m


def _largest_divisor_le(n, cap):
    tb = min(n, cap)
    while n % tb != 0:
        tb -= 1
    return tb


def lstm_kernel(x_ref, wx_ref, b_ref, wh_ref, wfc_ref, bfc_ref,
                out_ref, h_scr, c_scr, gx_scr):
    """Grid: (batch_tiles [parallel], time_blocks [arbitrary]).

    x_ref   : (TB, Bt, D)      input slab: TB time steps for this batch tile
    wx_ref  : (D,  4*Hp)       x->gates weight (transposed, gate-padded)
    b_ref   : (1,  4*Hp)       fused bias bx + bh (gate-padded)
    wh_ref  : (Hp, 4*Hp)       h->gates weight (transposed, gate-padded)
    wfc_ref : (Hp, Op)         fc weight (transposed, padded)
    bfc_ref : (1,  Op)         fc bias (padded)
    out_ref : (Bt, Op)         final output (written on last time block)
    h_scr   : (Bt, Hp)         hidden state, carried across time blocks
    c_scr   : (Bt, Hp)         cell state, carried across time blocks
    gx_scr  : (TB, Bt, 4*Hp)   hoisted input projection for this block
    """
    t_blk = pl.program_id(1)
    TB, Bt, D = x_ref.shape
    Hp = wh_ref.shape[0]

    # h0 = c0 = zeros at the start of each batch tile's time sweep.
    @pl.when(t_blk == 0)
    def _():
        h_scr[...] = jnp.zeros_like(h_scr)
        c_scr[...] = jnp.zeros_like(c_scr)

    # Hoisted input projection: ONE MXU matmul (M = TB*Bt) covering the whole
    # time block, with the fused bias folded in. Removes x@wx and both bias
    # adds from the serial recurrence below.
    gx = jnp.dot(x_ref[...].reshape(TB * Bt, D), wx_ref[...],
                 preferred_element_type=jnp.float32) + b_ref[...]
    gx_scr[...] = gx.reshape(TB, Bt, 4 * Hp)

    def step(t, carry):
        h = h_scr[...]
        c = c_scr[...]
        gates = gx_scr[t] + jnp.dot(h, wh_ref[...],
                                    preferred_element_type=jnp.float32)
        # Hp is a multiple of 128, so every gate slice is lane-aligned.
        ingate     = jax.nn.sigmoid(gates[:, 0 * Hp:1 * Hp])
        forgetgate = jax.nn.sigmoid(gates[:, 1 * Hp:2 * Hp])
        cellgate   = jnp.tanh(gates[:, 2 * Hp:3 * Hp])
        outgate    = jax.nn.sigmoid(gates[:, 3 * Hp:4 * Hp])
        cy = c * forgetgate + ingate * cellgate
        hy = outgate * jnp.tanh(cy)
        c_scr[...] = cy
        h_scr[...] = hy
        return carry

    lax.fori_loop(0, TB, step, 0, unroll=True)

    # out = fc(last hidden state); (Bt, Op) is a full lane-dense tile.
    @pl.when(t_blk == pl.num_programs(1) - 1)
    def _():
        out_ref[...] = (
            jnp.dot(h_scr[...], wfc_ref[...], preferred_element_type=jnp.float32)
            + bfc_ref[...]
        ).astype(out_ref.dtype)


def lstm_forward(x, params, *, max_time_block=32):
    """x: (B, T, D) float32  ->  (B, O) float32."""
    B, T, D = x.shape
    wx, bx, wh, bh, wfc, bfc = (params["wx"], params["bx"], params["wh"],
                                params["bh"], params["wfc"], params["bfc"])
    H = wh.shape[0]
    O = wfc.shape[1]

    f32 = jnp.float32
    # Hardware-friendly padded sizes.
    Hp = _round_up(H, 128)
    Op = _round_up(O, 128)
    if B <= 128:
        Bp = _round_up(B, 8)
        Bt = Bp
    else:
        Bp = _round_up(B, 128)
        Bt = 128
    TB = _largest_divisor_le(T, max_time_block)
    n_bt = Bp // Bt
    n_tb = T // TB

    # Gate-aligned padded weights: each of the 4 gates gets its own Hp-wide
    # lane-aligned column block; all padding is zero, which keeps the padded
    # hidden lanes exactly 0 through the whole recurrence.
    wx_p = jnp.zeros((D, 4 * Hp), f32)
    wh_p = jnp.zeros((Hp, 4 * Hp), f32)
    b_p = jnp.zeros((1, 4 * Hp), f32)
    b_fused = (bx + bh).astype(f32)                 # fold both biases into one
    for k in range(4):
        wx_p = wx_p.at[:, k * Hp:k * Hp + H].set(wx[:, k * H:(k + 1) * H])
        wh_p = wh_p.at[:H, k * Hp:k * Hp + H].set(wh[:, k * H:(k + 1) * H])
        b_p = b_p.at[0, k * Hp:k * Hp + H].set(b_fused[k * H:(k + 1) * H])
    wfc_p = jnp.zeros((Hp, Op), f32).at[:H, :O].set(wfc)
    bfc_p = jnp.zeros((1, Op), f32).at[0, :O].set(bfc)

    # (B, T, D) -> (T, Bp, D): time-major so each grid step gets a contiguous
    # (TB, Bt, D) slab; batch padded to a sublane multiple.
    xt = jnp.transpose(x, (1, 0, 2))
    if Bp != B:
        xt = jnp.pad(xt, ((0, 0), (0, Bp - B), (0, 0)))

    out_p = pl.pallas_call(
        lstm_kernel,
        out_shape=jax.ShapeDtypeStruct((Bp, Op), f32),
        grid_spec=pltpu.PrefetchScalarGridSpec(
            num_scalar_prefetch=0,
            grid=(n_bt, n_tb),
            in_specs=[
                pl.BlockSpec((TB, Bt, D), lambda b, t: (t, b, 0)),    # x slab
                pl.BlockSpec((D, 4 * Hp), lambda b, t: (0, 0)),       # wx
                pl.BlockSpec((1, 4 * Hp), lambda b, t: (0, 0)),       # fused bias
                pl.BlockSpec((Hp, 4 * Hp), lambda b, t: (0, 0)),      # wh
                pl.BlockSpec((Hp, Op), lambda b, t: (0, 0)),          # wfc
                pl.BlockSpec((1, Op), lambda b, t: (0, 0)),           # bfc
            ],
            out_specs=pl.BlockSpec((Bt, Op), lambda b, t: (b, 0)),
            scratch_shapes=[
                pltpu.VMEM((Bt, Hp), f32),           # h state
                pltpu.VMEM((Bt, Hp), f32),           # c state
                pltpu.VMEM((TB, Bt, 4 * Hp), f32),   # hoisted input projection
            ],
        ),
        compiler_params=pltpu.CompilerParams(
            # batch tiles are independent (v7x second TensorCore can take
            # them); time blocks carry the serial recurrence.
            dimension_semantics=("parallel", "arbitrary"),
        ),
    )(xt, wx_p, b_p, wh_p, wfc_p, bfc_p)

    return out_p[:B, :O]


def reference_forward(x, params):
    """Pure-JAX reference with identical semantics (for correctness check)."""
    B, T, D = x.shape
    H = params["wh"].shape[0]
    h = jnp.zeros((B, H), jnp.float32)
    c = jnp.zeros((B, H), jnp.float32)
    for t in range(T):
        gates = (x[:, t, :] @ params["wx"] + params["bx"]
                 + h @ params["wh"] + params["bh"])
        i = jax.nn.sigmoid(gates[:, 0 * H:1 * H])
        f = jax.nn.sigmoid(gates[:, 1 * H:2 * H])
        g = jnp.tanh(gates[:, 2 * H:3 * H])
        o = jax.nn.sigmoid(gates[:, 3 * H:4 * H])
        c = c * f + i * g
        h = o * jnp.tanh(c)
    return h @ params["wfc"] + params["bfc"]


def init_params(key, input_dim, hidden_dim, output_dim):
    """Deterministic init mirroring the PyTorch module's shapes.

    LSTM_cell weights ~ U(-1/sqrt(H), 1/sqrt(H)); fc default Linear init also
    uses 1/sqrt(fan_in) = 1/sqrt(H). Weights stored transposed:
    (in_features, out_features).
    """
    std = 1.0 / math.sqrt(hidden_dim)
    ks = jax.random.split(key, 6)
    u = lambda k, shape: jax.random.uniform(k, shape, jnp.float32, -std, std)
    return {
        "wx": u(ks[0], (input_dim, 4 * hidden_dim)),
        "bx": u(ks[1], (4 * hidden_dim,)),
        "wh": u(ks[2], (hidden_dim, 4 * hidden_dim)),
        "bh": u(ks[3], (4 * hidden_dim,)),
        "wfc": u(ks[4], (hidden_dim, output_dim)),
        "bfc": u(ks[5], (output_dim,)),
    }


if __name__ == "__main__":
    # Small shapes consistent with the module: batch=2, seq=8, input_dim=16,
    # hidden_dim=32, layer_dim=1, output_dim=10.
    B, T, D, H, O = 2, 8, 16, 32, 10

    key = jax.random.PRNGKey(0)
    k_x, k_p = jax.random.split(key)
    x = jax.random.normal(k_x, (B, T, D), jnp.float32)
    params = init_params(k_p, D, H, O)

    out = jax.block_until_ready(lstm_forward(x, params))
    ref = reference_forward(x, params)

    assert out.shape == (B, O), out.shape
    assert jnp.allclose(out, ref, atol=1e-4, rtol=1e-4), (out, ref)

    print("KERNEL_OK")
</pallas_src>

<mosaic_0001>
module attributes {stable_mosaic.version = 11 : i64} {
  func.func @lstm_kernel(%arg0: i32, %arg1: i32, %arg2: memref<8x8x16xf32, #tpu.memory_space<vmem>>, %arg3: memref<16x512xf32, #tpu.memory_space<vmem>>, %arg4: memref<1x512xf32, #tpu.memory_space<vmem>>, %arg5: memref<128x512xf32, #tpu.memory_space<vmem>>, %arg6: memref<128x128xf32, #tpu.memory_space<vmem>>, %arg7: memref<1x128xf32, #tpu.memory_space<vmem>>, %arg8: memref<8x128xf32, #tpu.memory_space<vmem>>, %arg9: memref<8x128xf32, #tpu.memory_space<vmem>>, %arg10: memref<8x128xf32, #tpu.memory_space<vmem>>, %arg11: memref<8x8x512xf32, #tpu.memory_space<vmem>>) attributes {dimension_semantics = [#tpu.dimension_semantics<parallel>, #tpu.dimension_semantics<arbitrary>], iteration_bounds = array<i64: 1, 1>, scalar_prefetch = 0 : i64, scratch_operands = 3 : i64, tpu.core_type = #tpu.core_type<tc>, window_params = [{transform_indices = @transform_0, window_bounds = array<i64: 8, 8, 16>}, {pipeline_mode = #tpu.pipeline_mode<synchronous>, transform_indices = @transform_1, window_bounds = array<i64: 16, 512>}, {pipeline_mode = #tpu.pipeline_mode<synchronous>, transform_indices = @transform_2, window_bounds = array<i64: 1, 512>}, {pipeline_mode = #tpu.pipeline_mode<synchronous>, transform_indices = @transform_3, window_bounds = array<i64: 128, 512>}, {pipeline_mode = #tpu.pipeline_mode<synchronous>, transform_indices = @transform_4, window_bounds = array<i64: 128, 128>}, {pipeline_mode = #tpu.pipeline_mode<synchronous>, transform_indices = @transform_5, window_bounds = array<i64: 1, 128>}, {transform_indices = @transform_6, window_bounds = array<i64: 8, 128>}]} {
    %c0_i32 = arith.constant 0 : i32
    %0 = arith.cmpi eq, %arg1, %c0_i32 : i32
    %1 = arith.extui %0 : i1 to i32
    %c0_i32_0 = arith.constant 0 : i32
    %2 = arith.cmpi ne, %1, %c0_i32_0 : i32
    scf.if %2 {
      %cst_141 = arith.constant 0.000000e+00 : f32
      %295 = vector.broadcast %cst_141 : f32 to vector<8x128xf32>
      %c0_142 = arith.constant 0 : index
      %c0_143 = arith.constant 0 : index
      %296 = vector.load %arg9[%c0_142, %c0_143] : memref<8x128xf32, #tpu.memory_space<vmem>>, vector<8x128xf32>
      tpu.vector_store %arg9[%c0_142, %c0_143], %295 {strides = array<i32>} : memref<8x128xf32, #tpu.memory_space<vmem>>, vector<8x128xf32>,
      %cst_144 = arith.constant 0.000000e+00 : f32
      %297 = vector.broadcast %cst_144 : f32 to vector<8x128xf32>
      %c0_145 = arith.constant 0 : index
      %c0_146 = arith.constant 0 : index
      %298 = vector.load %arg10[%c0_145, %c0_146] : memref<8x128xf32, #tpu.memory_space<vmem>>, vector<8x128xf32>
      tpu.vector_store %arg10[%c0_145, %c0_146], %297 {strides = array<i32>} : memref<8x128xf32, #tpu.memory_space<vmem>>, vector<8x128xf32>,
    } else {
    }
    %c0 = arith.constant 0 : index
    %c0_1 = arith.constant 0 : index
    %c0_2 = arith.constant 0 : index
    %3 = vector.load %arg2[%c0, %c0_1, %c0_2] : memref<8x8x16xf32, #tpu.memory_space<vmem>>, vector<8x8x16xf32>
    %4 = vector.shape_cast %3 : vector<8x8x16xf32> to vector<64x16xf32>
    %c0_3 = arith.constant 0 : index
    %c0_4 = arith.constant 0 : index
    %5 = vector.load %arg3[%c0_3, %c0_4] : memref<16x512xf32, #tpu.memory_space<vmem>>, vector<16x512xf32>
    %cst = arith.constant dense<0.000000e+00> : vector<64x512xf32>
    %6 = tpu.matmul %4, %5, %cst {dimension_numbers = #tpu.dot_dimension_numbers<[1], [0], [0], [1], [0, 0, 1, 1], [], []>} : vector<64x16xf32>, vector<16x512xf32>, vector<64x512xf32> -> vector<64x512xf32>
    %c0_5 = arith.constant 0 : index
    %c0_6 = arith.constant 0 : index
    %7 = vector.load %arg4[%c0_5, %c0_6] : memref<1x512xf32, #tpu.memory_space<vmem>>, vector<1x512xf32>
    %8 = vector.broadcast %7 : vector<1x512xf32> to vector<64x512xf32>
    %9 = arith.addf %6, %8 : vector<64x512xf32>
    %10 = vector.shape_cast %9 : vector<64x512xf32> to vector<8x8x512xf32>
    %c0_7 = arith.constant 0 : index
    %c0_8 = arith.constant 0 : index
    %c0_9 = arith.constant 0 : index
    %11 = vector.load %arg11[%c0_7, %c0_8, %c0_9] : memref<8x8x512xf32, #tpu.memory_space<vmem>>, vector<8x8x512xf32>
    tpu.vector_store %arg11[%c0_7, %c0_8, %c0_9], %10 {strides = array<i32>} : memref<8x8x512xf32, #tpu.memory_space<vmem>>, vector<8x8x512xf32>,
    %c0_i32_10 = arith.constant 0 : i32
    %c0_11 = arith.constant 0 : index
    %c0_12 = arith.constant 0 : index
    %12 = vector.load %arg9[%c0_11, %c0_12] : memref<8x128xf32, #tpu.memory_space<vmem>>, vector<8x128xf32>
    %c0_13 = arith.constant 0 : index
    %c0_14 = arith.constant 0 : index
    %13 = vector.load %arg10[%c0_13, %c0_14] : memref<8x128xf32, #tpu.memory_space<vmem>>, vector<8x128xf32>
    %14 = arith.index_cast %c0_i32_10 : i32 to index
    %c0_15 = arith.constant 0 : index
    %c0_16 = arith.constant 0 : index
    %15 = vector.load %arg11[%14, %c0_15, %c0_16] : memref<8x8x512xf32, #tpu.memory_space<vmem>>, vector<1x8x512xf32>
    %16 = vector.shape_cast %15 : vector<1x8x512xf32> to vector<8x512xf32>
    %c0_17 = arith.constant 0 : index
    %c0_18 = arith.constant 0 : index
    %17 = vector.load %arg5[%c0_17, %c0_18] : memref<128x512xf32, #tpu.memory_space<vmem>>, vector<128x512xf32>
    %cst_19 = arith.constant dense<0.000000e+00> : vector<8x512xf32>
    %18 = tpu.matmul %12, %17, %cst_19 {dimension_numbers = #tpu.dot_dimension_numbers<[1], [0], [0], [1], [0, 0, 1, 1], [], []>} : vector<8x128xf32>, vector<128x512xf32>, vector<8x512xf32> -> vector<8x512xf32>
    %19 = arith.addf %16, %18 : vector<8x512xf32>
    %20 = vector.extract_strided_slice %19 {offsets = [0, 0], sizes = [8, 128], strides = [1, 1]} : vector<8x512xf32> to vector<8x128xf32>
    %21 = arith.negf %20 : vector<8x128xf32>
    %22 = math.exp %21 : vector<8x128xf32>
    %cst_20 = arith.constant 1.000000e+00 : f32
    %23 = vector.broadcast %cst_20 : f32 to vector<8x128xf32>
    %24 = arith.addf %23, %22 : vector<8x128xf32>
    %25 = arith.divf %23, %24 : vector<8x128xf32>
    %26 = vector.extract_strided_slice %19 {offsets = [0, 128], sizes = [8, 128], strides = [1, 1]} : vector<8x512xf32> to vector<8x128xf32>
    %27 = arith.negf %26 : vector<8x128xf32>
    %28 = math.exp %27 : vector<8x128xf32>
    %cst_21 = arith.constant 1.000000e+00 : f32
    %29 = vector.broadcast %cst_21 : f32 to vector<8x128xf32>
    %30 = arith.addf %29, %28 : vector<8x128xf32>
    %31 = arith.divf %29, %30 : vector<8x128xf32>
    %32 = vector.extract_strided_slice %19 {offsets = [0, 256], sizes = [8, 128], strides = [1, 1]} : vector<8x512xf32> to vector<8x128xf32>
    %33 = math.tanh %32 : vector<8x128xf32>
    %34 = vector.extract_strided_slice %19 {offsets = [0, 384], sizes = [8, 128], strides = [1, 1]} : vector<8x512xf32> to vector<8x128xf32>
    %35 = arith.negf %34 : vector<8x128xf32>
    %36 = math.exp %35 : vector<8x128xf32>
    %cst_22 = arith.constant 1.000000e+00 : f32
    %37 = vector.broadcast %cst_22 : f32 to vector<8x128xf32>
    %38 = arith.addf %37, %36 : vector<8x128xf32>
    %39 = arith.divf %37, %38 : vector<8x128xf32>
    %40 = arith.mulf %13, %31 : vector<8x128xf32>
    %41 = arith.mulf %25, %33 : vector<8x128xf32>
    %42 = arith.addf %40, %41 : vector<8x128xf32>
    %43 = math.tanh %42 : vector<8x128xf32>
    %44 = arith.mulf %39, %43 : vector<8x128xf32>
    %c0_23 = arith.constant 0 : index
    %c0_24 = arith.constant 0 : index
    %45 = vector.load %arg10[%c0_23, %c0_24] : memref<8x128xf32, #tpu.memory_space<vmem>>, vector<8x128xf32>
    tpu.vector_store %arg10[%c0_23, %c0_24], %42 {strides = array<i32>} : memref<8x128xf32, #tpu.memory_space<vmem>>, vector<8x128xf32>,
    %c0_25 = arith.constant 0 : index
    %c0_26 = arith.constant 0 : index
    %46 = vector.load %arg9[%c0_25, %c0_26] : memref<8x128xf32, #tpu.memory_space<vmem>>, vector<8x128xf32>
    tpu.vector_store %arg9[%c0_25, %c0_26], %44 {strides = array<i32>} : memref<8x128xf32, #tpu.memory_space<vmem>>, vector<8x128xf32>,
    %c1_i32 = arith.constant 1 : i32
    %c0_27 = arith.constant 0 : index
    %c0_28 = arith.constant 0 : index
    %47 = vector.load %arg9[%c0_27, %c0_28] : memref<8x128xf32, #tpu.memory_space<vmem>>, vector<8x128xf32>
    %c0_29 = arith.constant 0 : index
    %c0_30 = arith.constant 0 : index
    %48 = vector.load %arg10[%c0_29, %c0_30] : memref<8x128xf32, #tpu.memory_space<vmem>>, vector<8x128xf32>
    %49 = arith.index_cast %c1_i32 : i32 to index
    %c0_31 = arith.constant 0 : index
    %c0_32 = arith.constant 0 : index
    %50 = vector.load %arg11[%49, %c0_31, %c0_32] : memref<8x8x512xf32, #tpu.memory_space<vmem>>, vector<1x8x512xf32>
    %51 = vector.shape_cast %50 : vector<1x8x512xf32> to vector<8x512xf32>
    %c0_33 = arith.constant 0 : index
    %c0_34 = arith.constant 0 : index
    %52 = vector.load %arg5[%c0_33, %c0_34] : memref<128x512xf32, #tpu.memory_space<vmem>>, vector<128x512xf32>
    %cst_35 = arith.constant dense<0.000000e+00> : vector<8x512xf32>
    %53 = tpu.matmul %47, %52, %cst_35 {dimension_numbers = #tpu.dot_dimension_numbers<[1], [0], [0], [1], [0, 0, 1, 1], [], []>} : vector<8x128xf32>, vector<128x512xf32>, vector<8x512xf32> -> vector<8x512xf32>
    %54 = arith.addf %51, %53 : vector<8x512xf32>
    %55 = vector.extract_strided_slice %54 {offsets = [0, 0], sizes = [8, 128], strides = [1, 1]} : vector<8x512xf32> to vector<8x128xf32>
    %56 = arith.negf %55 : vector<8x128xf32>
    %57 = math.exp %56 : vector<8x128xf32>
    %cst_36 = arith.constant 1.000000e+00 : f32
    %58 = vector.broadcast %cst_36 : f32 to vector<8x128xf32>
    %59 = arith.addf %58, %57 : vector<8x128xf32>
    %60 = arith.divf %58, %59 : vector<8x128xf32>
    %61 = vector.extract_strided_slice %54 {offsets = [0, 128], sizes = [8, 128], strides = [1, 1]} : vector<8x512xf32> to vector<8x128xf32>
    %62 = arith.negf %61 : vector<8x128xf32>
    %63 = math.exp %62 : vector<8x128xf32>
    %cst_37 = arith.constant 1.000000e+00 : f32
    %64 = vector.broadcast %cst_37 : f32 to vector<8x128xf32>
    %65 = arith.addf %64, %63 : vector<8x128xf32>
    %66 = arith.divf %64, %65 : vector<8x128xf32>
    %67 = vector.extract_strided_slice %54 {offsets = [0, 256], sizes = [8, 128], strides = [1, 1]} : vector<8x512xf32> to vector<8x128xf32>
    %68 = math.tanh %67 : vector<8x128xf32>
    %69 = vector.extract_strided_slice %54 {offsets = [0, 384], sizes = [8, 128], strides = [1, 1]} : vector<8x512xf32> to vector<8x128xf32>
    %70 = arith.negf %69 : vector<8x128xf32>
    %71 = math.exp %70 : vector<8x128xf32>
    %cst_38 = arith.constant 1.000000e+00 : f32
    %72 = vector.broadcast %cst_38 : f32 to vector<8x128xf32>
    %73 = arith.addf %72, %71 : vector<8x128xf32>
    %74 = arith.divf %72, %73 : vector<8x128xf32>
    %75 = arith.mulf %48, %66 : vector<8x128xf32>
    %76 = arith.mulf %60, %68 : vector<8x128xf32>
    %77 = arith.addf %75, %76 : vector<8x128xf32>
    %78 = math.tanh %77 : vector<8x128xf32>
    %79 = arith.mulf %74, %78 : vector<8x128xf32>
    %c0_39 = arith.constant 0 : index
    %c0_40 = arith.constant 0 : index
    %80 = vector.load %arg10[%c0_39, %c0_40] : memref<8x128xf32, #tpu.memory_space<vmem>>, vector<8x128xf32>
    tpu.vector_store %arg10[%c0_39, %c0_40], %77 {strides = array<i32>} : memref<8x128xf32, #tpu.memory_space<vmem>>, vector<8x128xf32>,
    %c0_41 = arith.constant 0 : index
    %c0_42 = arith.constant 0 : index
    %81 = vector.load %arg9[%c0_41, %c0_42] : memref<8x128xf32, #tpu.memory_space<vmem>>, vector<8x128xf32>
    tpu.vector_store %arg9[%c0_41, %c0_42], %79 {strides = array<i32>} : memref<8x128xf32, #tpu.memory_space<vmem>>, vector<8x128xf32>,
    %c2_i32 = arith.constant 2 : i32
    %c0_43 = arith.constant 0 : index
    %c0_44 = arith.constant 0 : index
    %82 = vector.load %arg9[%c0_43, %c0_44] : memref<8x128xf32, #tpu.memory_space<vmem>>, vector<8x128xf32>
    %c0_45 = arith.constant 0 : index
    %c0_46 = arith.constant 0 : index
    %83 = vector.load %arg10[%c0_45, %c0_46] : memref<8x128xf32, #tpu.memory_space<vmem>>, vector<8x128xf32>
    %84 = arith.index_cast %c2_i32 : i32 to index
    %c0_47 = arith.constant 0 : index
    %c0_48 = arith.constant 0 : index
    %85 = vector.load %arg11[%84, %c0_47, %c0_48] : memref<8x8x512xf32, #tpu.memory_space<vmem>>, vector<1x8x512xf32>
    %86 = vector.shape_cast %85 : vector<1x8x512xf32> to vector<8x512xf32>
    %c0_49 = arith.constant 0 : index
    %c0_50 = arith.constant 0 : index
    %87 = vector.load %arg5[%c0_49, %c0_50] : memref<128x512xf32, #tpu.memory_space<vmem>>, vector<128x512xf32>
    %cst_51 = arith.constant dense<0.000000e+00> : vector<8x512xf32>
    %88 = tpu.matmul %82, %87, %cst_51 {dimension_numbers = #tpu.dot_dimension_numbers<[1], [0], [0], [1], [0, 0, 1, 1], [], []>} : vector<8x128xf32>, vector<128x512xf32>, vector<8x512xf32> -> vector<8x512xf32>
    %89 = arith.addf %86, %88 : vector<8x512xf32>
    %90 = vector.extract_strided_slice %89 {offsets = [0, 0], sizes = [8, 128], strides = [1, 1]} : vector<8x512xf32> to vector<8x128xf32>
    %91 = arith.negf %90 : vector<8x128xf32>
    %92 = math.exp %91 : vector<8x128xf32>
    %cst_52 = arith.constant 1.000000e+00 : f32
    %93 = vector.broadcast %cst_52 : f32 to vector<8x128xf32>
    %94 = arith.addf %93, %92 : vector<8x128xf32>
    %95 = arith.divf %93, %94 : vector<8x128xf32>
    %96 = vector.extract_strided_slice %89 {offsets = [0, 128], sizes = [8, 128], strides = [1, 1]} : vector<8x512xf32> to vector<8x128xf32>
    %97 = arith.negf %96 : vector<8x128xf32>
    %98 = math.exp %97 : vector<8x128xf32>
    %cst_53 = arith.constant 1.000000e+00 : f32
    %99 = vector.broadcast %cst_53 : f32 to vector<8x128xf32>
    %100 = arith.addf %99, %98 : vector<8x128xf32>
    %101 = arith.divf %99, %100 : vector<8x128xf32>
    %102 = vector.extract_strided_slice %89 {offsets = [0, 256], sizes = [8, 128], strides = [1, 1]} : vector<8x512xf32> to vector<8x128xf32>
    %103 = math.tanh %102 : vector<8x128xf32>
    %104 = vector.extract_strided_slice %89 {offsets = [0, 384], sizes = [8, 128], strides = [1, 1]} : vector<8x512xf32> to vector<8x128xf32>
    %105 = arith.negf %104 : vector<8x128xf32>
    %106 = math.exp %105 : vector<8x128xf32>
    %cst_54 = arith.constant 1.000000e+00 : f32
    %107 = vector.broadcast %cst_54 : f32 to vector<8x128xf32>
    %108 = arith.addf %107, %106 : vector<8x128xf32>
    %109 = arith.divf %107, %108 : vector<8x128xf32>
    %110 = arith.mulf %83, %101 : vector<8x128xf32>
    %111 = arith.mulf %95, %103 : vector<8x128xf32>
    %112 = arith.addf %110, %111 : vector<8x128xf32>
    %113 = math.tanh %112 : vector<8x128xf32>
    %114 = arith.mulf %109, %113 : vector<8x128xf32>
    %c0_55 = arith.constant 0 : index
    %c0_56 = arith.constant 0 : index
    %115 = vector.load %arg10[%c0_55, %c0_56] : memref<8x128xf32, #tpu.memory_space<vmem>>, vector<8x128xf32>
    tpu.vector_store %arg10[%c0_55, %c0_56], %112 {strides = array<i32>} : memref<8x128xf32, #tpu.memory_space<vmem>>, vector<8x128xf32>,
    %c0_57 = arith.constant 0 : index
    %c0_58 = arith.constant 0 : index
    %116 = vector.load %arg9[%c0_57, %c0_58] : memref<8x128xf32, #tpu.memory_space<vmem>>, vector<8x128xf32>
    tpu.vector_store %arg9[%c0_57, %c0_58], %114 {strides = array<i32>} : memref<8x128xf32, #tpu.memory_space<vmem>>, vector<8x128xf32>,
    %c3_i32 = arith.constant 3 : i32
    %c0_59 = arith.constant 0 : index
    %c0_60 = arith.constant 0 : index
    %117 = vector.load %arg9[%c0_59, %c0_60] : memref<8x128xf32, #tpu.memory_space<vmem>>, vector<8x128xf32>
    %c0_61 = arith.constant 0 : index
    %c0_62 = arith.constant 0 : index
    %118 = vector.load %arg10[%c0_61, %c0_62] : memref<8x128xf32, #tpu.memory_space<vmem>>, vector<8x128xf32>
    %119 = arith.index_cast %c3_i32 : i32 to index
    %c0_63 = arith.constant 0 : index
    %c0_64 = arith.constant 0 : index
    %120 = vector.load %arg11[%119, %c0_63, %c0_64] : memref<8x8x512xf32, #tpu.memory_space<vmem>>, vector<1x8x512xf32>
    %121 = vector.shape_cast %120 : vector<1x8x512xf32> to vector<8x512xf32>
    %c0_65 = arith.constant 0 : index
    %c0_66 = arith.constant 0 : index
    %122 = vector.load %arg5[%c0_65, %c0_66] : memref<128x512xf32, #tpu.memory_space<vmem>>, vector<128x512xf32>
    %cst_67 = arith.constant dense<0.000000e+00> : vector<8x512xf32>
    %123 = tpu.matmul %117, %122, %cst_67 {dimension_numbers = #tpu.dot_dimension_numbers<[1], [0], [0], [1], [0, 0, 1, 1], [], []>} : vector<8x128xf32>, vector<128x512xf32>, vector<8x512xf32> -> vector<8x512xf32>
    %124 = arith.addf %121, %123 : vector<8x512xf32>
    %125 = vector.extract_strided_slice %124 {offsets = [0, 0], sizes = [8, 128], strides = [1, 1]} : vector<8x512xf32> to vector<8x128xf32>
    %126 = arith.negf %125 : vector<8x128xf32>
    %127 = math.exp %126 : vector<8x128xf32>
    %cst_68 = arith.constant 1.000000e+00 : f32
    %128 = vector.broadcast %cst_68 : f32 to vector<8x128xf32>
    %129 = arith.addf %128, %127 : vector<8x128xf32>
    %130 = arith.divf %128, %129 : vector<8x128xf32>
    %131 = vector.extract_strided_slice %124 {offsets = [0, 128], sizes = [8, 128], strides = [1, 1]} : vector<8x512xf32> to vector<8x128xf32>
    %132 = arith.negf %131 : vector<8x128xf32>
    %133 = math.exp %132 : vector<8x128xf32>
    %cst_69 = arith.constant 1.000000e+00 : f32
    %134 = vector.broadcast %cst_69 : f32 to vector<8x128xf32>
    %135 = arith.addf %134, %133 : vector<8x128xf32>
    %136 = arith.divf %134, %135 : vector<8x128xf32>
    %137 = vector.extract_strided_slice %124 {offsets = [0, 256], sizes = [8, 128], strides = [1, 1]} : vector<8x512xf32> to vector<8x128xf32>
    %138 = math.tanh %137 : vector<8x128xf32>
    %139 = vector.extract_strided_slice %124 {offsets = [0, 384], sizes = [8, 128], strides = [1, 1]} : vector<8x512xf32> to vector<8x128xf32>
    %140 = arith.negf %139 : vector<8x128xf32>
    %141 = math.exp %140 : vector<8x128xf32>
    %cst_70 = arith.constant 1.000000e+00 : f32
    %142 = vector.broadcast %cst_70 : f32 to vector<8x128xf32>
    %143 = arith.addf %142, %141 : vector<8x128xf32>
    %144 = arith.divf %142, %143 : vector<8x128xf32>
    %145 = arith.mulf %118, %136 : vector<8x128xf32>
    %146 = arith.mulf %130, %138 : vector<8x128xf32>
    %147 = arith.addf %145, %146 : vector<8x128xf32>
    %148 = math.tanh %147 : vector<8x128xf32>
    %149 = arith.mulf %144, %148 : vector<8x128xf32>
    %c0_71 = arith.constant 0 : index
    %c0_72 = arith.constant 0 : index
    %150 = vector.load %arg10[%c0_71, %c0_72] : memref<8x128xf32, #tpu.memory_space<vmem>>, vector<8x128xf32>
    tpu.vector_store %arg10[%c0_71, %c0_72], %147 {strides = array<i32>} : memref<8x128xf32, #tpu.memory_space<vmem>>, vector<8x128xf32>,
    %c0_73 = arith.constant 0 : index
    %c0_74 = arith.constant 0 : index
    %151 = vector.load %arg9[%c0_73, %c0_74] : memref<8x128xf32, #tpu.memory_space<vmem>>, vector<8x128xf32>
    tpu.vector_store %arg9[%c0_73, %c0_74], %149 {strides = array<i32>} : memref<8x128xf32, #tpu.memory_space<vmem>>, vector<8x128xf32>,
    %c4_i32 = arith.constant 4 : i32
    %c0_75 = arith.constant 0 : index
    %c0_76 = arith.constant 0 : index
    %152 = vector.load %arg9[%c0_75, %c0_76] : memref<8x128xf32, #tpu.memory_space<vmem>>, vector<8x128xf32>
    %c0_77 = arith.constant 0 : index
    %c0_78 = arith.constant 0 : index
    %153 = vector.load %arg10[%c0_77, %c0_78] : memref<8x128xf32, #tpu.memory_space<vmem>>, vector<8x128xf32>
    %154 = arith.index_cast %c4_i32 : i32 to index
    %c0_79 = arith.constant 0 : index
    %c0_80 = arith.constant 0 : index
    %155 = vector.load %arg11[%154, %c0_79, %c0_80] : memref<8x8x512xf32, #tpu.memory_space<vmem>>, vector<1x8x512xf32>
    %156 = vector.shape_cast %155 : vector<1x8x512xf32> to vector<8x512xf32>
    %c0_81 = arith.constant 0 : index
    %c0_82 = arith.constant 0 : index
    %157 = vector.load %arg5[%c0_81, %c0_82] : memref<128x512xf32, #tpu.memory_space<vmem>>, vector<128x512xf32>
    %cst_83 = arith.constant dense<0.000000e+00> : vector<8x512xf32>
    %158 = tpu.matmul %152, %157, %cst_83 {dimension_numbers = #tpu.dot_dimension_numbers<[1], [0], [0], [1], [0, 0, 1, 1], [], []>} : vector<8x128xf32>, vector<128x512xf32>, vector<8x512xf32> -> vector<8x512xf32>
    %159 = arith.addf %156, %158 : vector<8x512xf32>
    %160 = vector.extract_strided_slice %159 {offsets = [0, 0], sizes = [8, 128], strides = [1, 1]} : vector<8x512xf32> to vector<8x128xf32>
    %161 = arith.negf %160 : vector<8x128xf32>
    %162 = math.exp %161 : vector<8x128xf32>
    %cst_84 = arith.constant 1.000000e+00 : f32
    %163 = vector.broadcast %cst_84 : f32 to vector<8x128xf32>
    %164 = arith.addf %163, %162 : vector<8x128xf32>
    %165 = arith.divf %163, %164 : vector<8x128xf32>
    %166 = vector.extract_strided_slice %159 {offsets = [0, 128], sizes = [8, 128], strides = [1, 1]} : vector<8x512xf32> to vector<8x128xf32>
    %167 = arith.negf %166 : vector<8x128xf32>
    %168 = math.exp %167 : vector<8x128xf32>
    %cst_85 = arith.constant 1.000000e+00 : f32
    %169 = vector.broadcast %cst_85 : f32 to vector<8x128xf32>
    %170 = arith.addf %169, %168 : vector<8x128xf32>
    %171 = arith.divf %169, %170 : vector<8x128xf32>
    %172 = vector.extract_strided_slice %159 {offsets = [0, 256], sizes = [8, 128], strides = [1, 1]} : vector<8x512xf32> to vector<8x128xf32>
    %173 = math.tanh %172 : vector<8x128xf32>
    %174 = vector.extract_strided_slice %159 {offsets = [0, 384], sizes = [8, 128], strides = [1, 1]} : vector<8x512xf32> to vector<8x128xf32>
    %175 = arith.negf %174 : vector<8x128xf32>
    %176 = math.exp %175 : vector<8x128xf32>
    %cst_86 = arith.constant 1.000000e+00 : f32
    %177 = vector.broadcast %cst_86 : f32 to vector<8x128xf32>
    %178 = arith.addf %177, %176 : vector<8x128xf32>
    %179 = arith.divf %177, %178 : vector<8x128xf32>
    %180 = arith.mulf %153, %171 : vector<8x128xf32>
    %181 = arith.mulf %165, %173 : vector<8x128xf32>
    %182 = arith.addf %180, %181 : vector<8x128xf32>
    %183 = math.tanh %182 : vector<8x128xf32>
    %184 = arith.mulf %179, %183 : vector<8x128xf32>
    %c0_87 = arith.constant 0 : index
    %c0_88 = arith.constant 0 : index
    %185 = vector.load %arg10[%c0_87, %c0_88] : memref<8x128xf32, #tpu.memory_space<vmem>>, vector<8x128xf32>
    tpu.vector_store %arg10[%c0_87, %c0_88], %182 {strides = array<i32>} : memref<8x128xf32, #tpu.memory_space<vmem>>, vector<8x128xf32>,
    %c0_89 = arith.constant 0 : index
    %c0_90 = arith.constant 0 : index
    %186 = vector.load %arg9[%c0_89, %c0_90] : memref<8x128xf32, #tpu.memory_space<vmem>>, vector<8x128xf32>
    tpu.vector_store %arg9[%c0_89, %c0_90], %184 {strides = array<i32>} : memref<8x128xf32, #tpu.memory_space<vmem>>, vector<8x128xf32>,
    %c5_i32 = arith.constant 5 : i32
    %c0_91 = arith.constant 0 : index
    %c0_92 = arith.constant 0 : index
    %187 = vector.load %arg9[%c0_91, %c0_92] : memref<8x128xf32, #tpu.memory_space<vmem>>, vector<8x128xf32>
    %c0_93 = arith.constant 0 : index
    %c0_94 = arith.constant 0 : index
    %188 = vector.load %arg10[%c0_93, %c0_94] : memref<8x128xf32, #tpu.memory_space<vmem>>, vector<8x128xf32>
    %189 = arith.index_cast %c5_i32 : i32 to index
    %c0_95 = arith.constant 0 : index
    %c0_96 = arith.constant 0 : index
    %190 = vector.load %arg11[%189, %c0_95, %c0_96] : memref<8x8x512xf32, #tpu.memory_space<vmem>>, vector<1x8x512xf32>
    %191 = vector.shape_cast %190 : vector<1x8x512xf32> to vector<8x512xf32>
    %c0_97 = arith.constant 0 : index
    %c0_98 = arith.constant 0 : index
    %192 = vector.load %arg5[%c0_97, %c0_98] : memref<128x512xf32, #tpu.memory_space<vmem>>, vector<128x512xf32>
    %cst_99 = arith.constant dense<0.000000e+00> : vector<8x512xf32>
    %193 = tpu.matmul %187, %192, %cst_99 {dimension_numbers = #tpu.dot_dimension_numbers<[1], [0], [0], [1], [0, 0, 1, 1], [], []>} : vector<8x128xf32>, vector<128x512xf32>, vector<8x512xf32> -> vector<8x512xf32>
    %194 = arith.addf %191, %193 : vector<8x512xf32>
    %195 = vector.extract_strided_slice %194 {offsets = [0, 0], sizes = [8, 128], strides = [1, 1]} : vector<8x512xf32> to vector<8x128xf32>
    %196 = arith.negf %195 : vector<8x128xf32>
    %197 = math.exp %196 : vector<8x128xf32>
    %cst_100 = arith.constant 1.000000e+00 : f32
    %198 = vector.broadcast %cst_100 : f32 to vector<8x128xf32>
    %199 = arith.addf %198, %197 : vector<8x128xf32>
    %200 = arith.divf %198, %199 : vector<8x128xf32>
    %201 = vector.extract_strided_slice %194 {offsets = [0, 128], sizes = [8, 128], strides = [1, 1]} : vector<8x512xf32> to vector<8x128xf32>
    %202 = arith.negf %201 : vector<8x128xf32>
    %203 = math.exp %202 : vector<8x128xf32>
    %cst_101 = arith.constant 1.000000e+00 : f32
    %204 = vector.broadcast %cst_101 : f32 to vector<8x128xf32>
    %205 = arith.addf %204, %203 : vector<8x128xf32>
    %206 = arith.divf %204, %205 : vector<8x128xf32>
    %207 = vector.extract_strided_slice %194 {offsets = [0, 256], sizes = [8, 128], strides = [1, 1]} : vector<8x512xf32> to vector<8x128xf32>
    %208 = math.tanh %207 : vector<8x128xf32>
    %209 = vector.extract_strided_slice %194 {offsets = [0, 384], sizes = [8, 128], strides = [1, 1]} : vector<8x512xf32> to vector<8x128xf32>
    %210 = arith.negf %209 : vector<8x128xf32>
    %211 = math.exp %210 : vector<8x128xf32>
    %cst_102 = arith.constant 1.000000e+00 : f32
    %212 = vector.broadcast %cst_102 : f32 to vector<8x128xf32>
    %213 = arith.addf %212, %211 : vector<8x128xf32>
    %214 = arith.divf %212, %213 : vector<8x128xf32>
    %215 = arith.mulf %188, %206 : vector<8x128xf32>
    %216 = arith.mulf %200, %208 : vector<8x128xf32>
    %217 = arith.addf %215, %216 : vector<8x128xf32>
    %218 = math.tanh %217 : vector<8x128xf32>
    %219 = arith.mulf %214, %218 : vector<8x128xf32>
    %c0_103 = arith.constant 0 : index
    %c0_104 = arith.constant 0 : index
    %220 = vector.load %arg10[%c0_103, %c0_104] : memref<8x128xf32, #tpu.memory_space<vmem>>, vector<8x128xf32>
    tpu.vector_store %arg10[%c0_103, %c0_104], %217 {strides = array<i32>} : memref<8x128xf32, #tpu.memory_space<vmem>>, vector<8x128xf32>,
    %c0_105 = arith.constant 0 : index
    %c0_106 = arith.constant 0 : index
    %221 = vector.load %arg9[%c0_105, %c0_106] : memref<8x128xf32, #tpu.memory_space<vmem>>, vector<8x128xf32>
    tpu.vector_store %arg9[%c0_105, %c0_106], %219 {strides = array<i32>} : memref<8x128xf32, #tpu.memory_space<vmem>>, vector<8x128xf32>,
    %c6_i32 = arith.constant 6 : i32
    %c0_107 = arith.constant 0 : index
    %c0_108 = arith.constant 0 : index
    %222 = vector.load %arg9[%c0_107, %c0_108] : memref<8x128xf32, #tpu.memory_space<vmem>>, vector<8x128xf32>
    %c0_109 = arith.constant 0 : index
    %c0_110 = arith.constant 0 : index
    %223 = vector.load %arg10[%c0_109, %c0_110] : memref<8x128xf32, #tpu.memory_space<vmem>>, vector<8x128xf32>
    %224 = arith.index_cast %c6_i32 : i32 to index
    %c0_111 = arith.constant 0 : index
    %c0_112 = arith.constant 0 : index
    %225 = vector.load %arg11[%224, %c0_111, %c0_112] : memref<8x8x512xf32, #tpu.memory_space<vmem>>, vector<1x8x512xf32>
    %226 = vector.shape_cast %225 : vector<1x8x512xf32> to vector<8x512xf32>
    %c0_113 = arith.constant 0 : index
    %c0_114 = arith.constant 0 : index
    %227 = vector.load %arg5[%c0_113, %c0_114] : memref<128x512xf32, #tpu.memory_space<vmem>>, vector<128x512xf32>
    %cst_115 = arith.constant dense<0.000000e+00> : vector<8x512xf32>
    %228 = tpu.matmul %222, %227, %cst_115 {dimension_numbers = #tpu.dot_dimension_numbers<[1], [0], [0], [1], [0, 0, 1, 1], [], []>} : vector<8x128xf32>, vector<128x512xf32>, vector<8x512xf32> -> vector<8x512xf32>
    %229 = arith.addf %226, %228 : vector<8x512xf32>
    %230 = vector.extract_strided_slice %229 {offsets = [0, 0], sizes = [8, 128], strides = [1, 1]} : vector<8x512xf32> to vector<8x128xf32>
    %231 = arith.negf %230 : vector<8x128xf32>
    %232 = math.exp %231 : vector<8x128xf32>
    %cst_116 = arith.constant 1.000000e+00 : f32
    %233 = vector.broadcast %cst_116 : f32 to vector<8x128xf32>
    %234 = arith.addf %233, %232 : vector<8x128xf32>
    %235 = arith.divf %233, %234 : vector<8x128xf32>
    %236 = vector.extract_strided_slice %229 {offsets = [0, 128], sizes = [8, 128], strides = [1, 1]} : vector<8x512xf32> to vector<8x128xf32>
    %237 = arith.negf %236 : vector<8x128xf32>
    %238 = math.exp %237 : vector<8x128xf32>
    %cst_117 = arith.constant 1.000000e+00 : f32
    %239 = vector.broadcast %cst_117 : f32 to vector<8x128xf32>
    %240 = arith.addf %239, %238 : vector<8x128xf32>
    %241 = arith.divf %239, %240 : vector<8x128xf32>
    %242 = vector.extract_strided_slice %229 {offsets = [0, 256], sizes = [8, 128], strides = [1, 1]} : vector<8x512xf32> to vector<8x128xf32>
    %243 = math.tanh %242 : vector<8x128xf32>
    %244 = vector.extract_strided_slice %229 {offsets = [0, 384], sizes = [8, 128], strides = [1, 1]} : vector<8x512xf32> to vector<8x128xf32>
    %245 = arith.negf %244 : vector<8x128xf32>
    %246 = math.exp %245 : vector<8x128xf32>
    %cst_118 = arith.constant 1.000000e+00 : f32
    %247 = vector.broadcast %cst_118 : f32 to vector<8x128xf32>
    %248 = arith.addf %247, %246 : vector<8x128xf32>
    %249 = arith.divf %247, %248 : vector<8x128xf32>
    %250 = arith.mulf %223, %241 : vector<8x128xf32>
    %251 = arith.mulf %235, %243 : vector<8x128xf32>
    %252 = arith.addf %250, %251 : vector<8x128xf32>
    %253 = math.tanh %252 : vector<8x128xf32>
    %254 = arith.mulf %249, %253 : vector<8x128xf32>
    %c0_119 = arith.constant 0 : index
    %c0_120 = arith.constant 0 : index
    %255 = vector.load %arg10[%c0_119, %c0_120] : memref<8x128xf32, #tpu.memory_space<vmem>>, vector<8x128xf32>
    tpu.vector_store %arg10[%c0_119, %c0_120], %252 {strides = array<i32>} : memref<8x128xf32, #tpu.memory_space<vmem>>, vector<8x128xf32>,
    %c0_121 = arith.constant 0 : index
    %c0_122 = arith.constant 0 : index
    %256 = vector.load %arg9[%c0_121, %c0_122] : memref<8x128xf32, #tpu.memory_space<vmem>>, vector<8x128xf32>
    tpu.vector_store %arg9[%c0_121, %c0_122], %254 {strides = array<i32>} : memref<8x128xf32, #tpu.memory_space<vmem>>, vector<8x128xf32>,
    %c7_i32 = arith.constant 7 : i32
    %c0_123 = arith.constant 0 : index
    %c0_124 = arith.constant 0 : index
    %257 = vector.load %arg9[%c0_123, %c0_124] : memref<8x128xf32, #tpu.memory_space<vmem>>, vector<8x128xf32>
    %c0_125 = arith.constant 0 : index
    %c0_126 = arith.constant 0 : index
    %258 = vector.load %arg10[%c0_125, %c0_126] : memref<8x128xf32, #tpu.memory_space<vmem>>, vector<8x128xf32>
    %259 = arith.index_cast %c7_i32 : i32 to index
    %c0_127 = arith.constant 0 : index
    %c0_128 = arith.constant 0 : index
    %260 = vector.load %arg11[%259, %c0_127, %c0_128] : memref<8x8x512xf32, #tpu.memory_space<vmem>>, vector<1x8x512xf32>
    %261 = vector.shape_cast %260 : vector<1x8x512xf32> to vector<8x512xf32>
    %c0_129 = arith.constant 0 : index
    %c0_130 = arith.constant 0 : index
    %262 = vector.load %arg5[%c0_129, %c0_130] : memref<128x512xf32, #tpu.memory_space<vmem>>, vector<128x512xf32>
    %cst_131 = arith.constant dense<0.000000e+00> : vector<8x512xf32>
    %263 = tpu.matmul %257, %262, %cst_131 {dimension_numbers = #tpu.dot_dimension_numbers<[1], [0], [0], [1], [0, 0, 1, 1], [], []>} : vector<8x128xf32>, vector<128x512xf32>, vector<8x512xf32> -> vector<8x512xf32>
    %264 = arith.addf %261, %263 : vector<8x512xf32>
    %265 = vector.extract_strided_slice %264 {offsets = [0, 0], sizes = [8, 128], strides = [1, 1]} : vector<8x512xf32> to vector<8x128xf32>
    %266 = arith.negf %265 : vector<8x128xf32>
    %267 = math.exp %266 : vector<8x128xf32>
    %cst_132 = arith.constant 1.000000e+00 : f32
    %268 = vector.broadcast %cst_132 : f32 to vector<8x128xf32>
    %269 = arith.addf %268, %267 : vector<8x128xf32>
    %270 = arith.divf %268, %269 : vector<8x128xf32>
    %271 = vector.extract_strided_slice %264 {offsets = [0, 128], sizes = [8, 128], strides = [1, 1]} : vector<8x512xf32> to vector<8x128xf32>
    %272 = arith.negf %271 : vector<8x128xf32>
    %273 = math.exp %272 : vector<8x128xf32>
    %cst_133 = arith.constant 1.000000e+00 : f32
    %274 = vector.broadcast %cst_133 : f32 to vector<8x128xf32>
    %275 = arith.addf %274, %273 : vector<8x128xf32>
    %276 = arith.divf %274, %275 : vector<8x128xf32>
    %277 = vector.extract_strided_slice %264 {offsets = [0, 256], sizes = [8, 128], strides = [1, 1]} : vector<8x512xf32> to vector<8x128xf32>
    %278 = math.tanh %277 : vector<8x128xf32>
    %279 = vector.extract_strided_slice %264 {offsets = [0, 384], sizes = [8, 128], strides = [1, 1]} : vector<8x512xf32> to vector<8x128xf32>
    %280 = arith.negf %279 : vector<8x128xf32>
    %281 = math.exp %280 : vector<8x128xf32>
    %cst_134 = arith.constant 1.000000e+00 : f32
    %282 = vector.broadcast %cst_134 : f32 to vector<8x128xf32>
    %283 = arith.addf %282, %281 : vector<8x128xf32>
    %284 = arith.divf %282, %283 : vector<8x128xf32>
    %285 = arith.mulf %258, %276 : vector<8x128xf32>
    %286 = arith.mulf %270, %278 : vector<8x128xf32>
    %287 = arith.addf %285, %286 : vector<8x128xf32>
    %288 = math.tanh %287 : vector<8x128xf32>
    %289 = arith.mulf %284, %288 : vector<8x128xf32>
    %c0_135 = arith.constant 0 : index
    %c0_136 = arith.constant 0 : index
    %290 = vector.load %arg10[%c0_135, %c0_136] : memref<8x128xf32, #tpu.memory_space<vmem>>, vector<8x128xf32>
    tpu.vector_store %arg10[%c0_135, %c0_136], %287 {strides = array<i32>} : memref<8x128xf32, #tpu.memory_space<vmem>>, vector<8x128xf32>,
    %c0_137 = arith.constant 0 : index
    %c0_138 = arith.constant 0 : index
    %291 = vector.load %arg9[%c0_137, %c0_138] : memref<8x128xf32, #tpu.memory_space<vmem>>, vector<8x128xf32>
    tpu.vector_store %arg9[%c0_137, %c0_138], %289 {strides = array<i32>} : memref<8x128xf32, #tpu.memory_space<vmem>>, vector<8x128xf32>,
    %c8_i32 = arith.constant 8 : i32
    %c0_i32_139 = arith.constant 0 : i32
    %292 = arith.cmpi eq, %arg1, %c0_i32_139 : i32
    %293 = arith.extui %292 : i1 to i32
    %c0_i32_140 = arith.constant 0 : i32
    %294 = arith.cmpi ne, %293, %c0_i32_140 : i32
    scf.if %294 {
      %c0_141 = arith.constant 0 : index
      %c0_142 = arith.constant 0 : index
      %295 = vector.load %arg9[%c0_141, %c0_142] : memref<8x128xf32, #tpu.memory_space<vmem>>, vector<8x128xf32>
      %c0_143 = arith.constant 0 : index
      %c0_144 = arith.constant 0 : index
      %296 = vector.load %arg6[%c0_143, %c0_144] : memref<128x128xf32, #tpu.memory_space<vmem>>, vector<128x128xf32>
      %cst_145 = arith.constant dense<0.000000e+00> : vector<8x128xf32>
      %297 = tpu.matmul %295, %296, %cst_145 {dimension_numbers = #tpu.dot_dimension_numbers<[1], [0], [0], [1], [0, 0, 1, 1], [], []>} : vector<8x128xf32>, vector<128x128xf32>, vector<8x128xf32> -> vector<8x128xf32>
      %c0_146 = arith.constant 0 : index
      %c0_147 = arith.constant 0 : index
      %298 = vector.load %arg7[%c0_146, %c0_147] : memref<1x128xf32, #tpu.memory_space<vmem>>, vector<1x128xf32>
      %299 = vector.broadcast %298 : vector<1x128xf32> to vector<8x128xf32>
      %300 = arith.addf %297, %299 : vector<8x128xf32>
      %c0_148 = arith.constant 0 : index
      %c0_149 = arith.constant 0 : index
      %301 = vector.load %arg8[%c0_148, %c0_149] : memref<8x128xf32, #tpu.memory_space<vmem>>, vector<8x128xf32>
      tpu.vector_store %arg8[%c0_148, %c0_149], %300 {strides = array<i32>} : memref<8x128xf32, #tpu.memory_space<vmem>>, vector<8x128xf32>,
    } else {
    }
    return
  }
  func.func @transform_0(%arg0: i32, %arg1: i32) -> (i32, i32, i32) {
    %c0_i32 = arith.constant 0 : i32
    %c0_i32_0 = arith.constant 0 : i32
    return %arg1, %arg0, %c0_i32 : i32, i32, i32
  }
  func.func @transform_1(%arg0: i32, %arg1: i32) -> (i32, i32) {
    %c0_i32 = arith.constant 0 : i32
    %c0_i32_0 = arith.constant 0 : i32
    %c0_i32_1 = arith.constant 0 : i32
    return %c0_i32, %c0_i32_0 : i32, i32
  }
  func.func @transform_2(%arg0: i32, %arg1: i32) -> (i32, i32) {
    %c0_i32 = arith.constant 0 : i32
    %c0_i32_0 = arith.constant 0 : i32
    %c0_i32_1 = arith.constant 0 : i32
    return %c0_i32, %c0_i32_0 : i32, i32
  }
  func.func @transform_3(%arg0: i32, %arg1: i32) -> (i32, i32) {
    %c0_i32 = arith.constant 0 : i32
    %c0_i32_0 = arith.constant 0 : i32
    %c0_i32_1 = arith.constant 0 : i32
    return %c0_i32, %c0_i32_0 : i32, i32
  }
  func.func @transform_4(%arg0: i32, %arg1: i32) -> (i32, i32) {
    %c0_i32 = arith.constant 0 : i32
    %c0_i32_0 = arith.constant 0 : i32
    %c0_i32_1 = arith.constant 0 : i32
    return %c0_i32, %c0_i32_0 : i32, i32
  }
  func.func @transform_5(%arg0: i32, %arg1: i32) -> (i32, i32) {
    %c0_i32 = arith.constant 0 : i32
    %c0_i32_0 = arith.constant 0 : i32
    %c0_i32_1 = arith.constant 0 : i32
    return %c0_i32, %c0_i32_0 : i32, i32
  }
  func.func @transform_6(%arg0: i32, %arg1: i32) -> (i32, i32) {
    %c0_i32 = arith.constant 0 : i32
    %c0_i32_0 = arith.constant 0 : i32
    return %arg0, %c0_i32 : i32, i32
  }
}

</mosaic_0001>

<bundles_post_ra>
// kernel: tpu_custom_call.1
= control target key start
LH: loop header
LB: loop body
LE: loop exit
PB: predicated region body
PF: predicated region fallthrough
CT: control target
= control target key end

     0   :  { %11 = vsyncpa [#allocation6], 0  ;;  %s3735_s0 = inlined_call_operand.hbm [shape: f32[8,8,16], index: 0, kind: input, shape index: {}]   ;;  %s3736_s1 = inlined_call_operand.hbm [shape: f32[16,512], index: 1, kind: input, shape index: {}]   ;;  %s3737_s2 = inlined_call_operand.hbm [shape: f32[1,512], index: 2, kind: input, shape index: {}]   ;;  %s3738_s3 = inlined_call_operand.hbm [shape: f32[128,512], index: 3, kind: input, shape index: {}]   ;;  %s3739_s4 = inlined_call_operand.hbm [shape: f32[128,128], index: 4, kind: input, shape index: {}]   ;;  %s3740_s5 = inlined_call_operand.vmem [shape: f32[1,128], index: 5, kind: input, shape index: {}]   ;;  %s3741_s6 = inlined_call_operand.hbm [shape: f32[8,128], index: 6, kind: output, shape index: {}]  }
   0x1   :  { %12 = vsyncpa [#allocation9], 0 }
   0x2   :  { %13 = vsyncpa [#allocation12], 0  ;;  %s32_s23 = sshll.u32 %s3736_s1, 4  ;;  %s33_s23 = int_to_ptr.hbm [resolvable:$true] %s32_s23 }
   0x3   :  { %14 = vsyncpa [#allocation7], 0  ;;  %s2530_s24 = smov [#allocation8]   ;;  %s56_s28 = sshll.u32 %s3738_s3, 4  ;;  %s57_s28 = int_to_ptr.hbm [resolvable:$true] %s56_s28 }
   0x4   :  { %s34_s25 = sshll.u32 %s2530_s24, 4  ;;  %s2531_s29 = smov 512   ;;  %s35_s25 = int_to_ptr.vmem [resolvable:$true] %s34_s25 }
   0x5   :  { %s2532_s30 = smov 32   ;;  %s2533_s7 = smov [#allocation11]  }
   0x6   :  { %40 = dma.hbm_to_vmem [thread:$0]  %s33_s23, 1024, %s35_s25, [#allocation9], %s2531_s29, %s2531_s29, %s2532_s30  }
   0x7   :  { %s58_s8 = sshll.u32 %s2533_s7, 4  ;;  %s19_s11 = sshll.u32 %s3735_s0, 4  ;;  %s59_s8 = int_to_ptr.vmem [resolvable:$true] %s58_s8  ;;  %s20_s11 = int_to_ptr.hbm [resolvable:$true] %s19_s11 }
   0x8   :  { %64 = dma.hbm_to_vmem [thread:$0]  %s57_s28, 8192, %s59_s8, [#allocation12], %s2531_s29, %s2531_s29, %s2532_s30  }
   0x9   :  { %s2534_s1 = smov [#allocation5]   ;;  %s46_s3 = sshll.u32 %s3737_s2, 4  ;;  %s47_s3 = int_to_ptr.hbm [resolvable:$true] %s46_s3 }
   0xa   :  { %s21_s12 = sshll.u32 %s2534_s1, 4  ;;  %s2535_s15 = smov 128   ;;  %s22_s12 = int_to_ptr.vmem [resolvable:$true] %s21_s12 }
   0xb   :  { %s2536_s16 = smov 8   ;;  %s2537_s17 = smov [#allocation10]  }
   0xc   :  { %27 = dma.hbm_to_vmem [thread:$0]  %s20_s11, 1024, %s22_s12, [#allocation6], %s2535_s15, %s2535_s15, %s2536_s16  }
   0xd   :  { %s48_s18 = sshll.u32 %s2537_s17, 4  ;;  %s69_s0 = sshll.u32 %s3739_s4, 4  ;;  %s49_s18 = int_to_ptr.vmem [resolvable:$true] %s48_s18  ;;  %s70_s0 = int_to_ptr.hbm [resolvable:$true] %s69_s0 }
   0xe   :  { %51 = dma.hbm_to_vmem [thread:$0]  %s47_s3, 64, %s49_s18, [#allocation9]  }
   0xf   :  { %s2538_s21 = smov [#allocation13]  }
  0x10   :  { %s71_s22 = sshll.u32 %s2538_s21, 4  ;;  %s72_s22 = int_to_ptr.vmem [resolvable:$true] %s71_s22 }
  0x11   :  { %77 = dma.hbm_to_vmem [thread:$0]  %s70_s0, 2048, %s72_s22, [#allocation12], %s2535_s15, %s2535_s15, %s2536_s16  }
  0x12   :  { %2522 = dma.done.wait [#allocation6], 1024  }
  0x13   :  { %2523 = vsyncadd [#allocation6], 4294966272 }
  0x14   :  { %2524 = dma.done.wait [#allocation9], 1088  }
  0x15   :  { %2525 = vsyncadd [#allocation9], 4294966208 }
  0x16   :  { %2526 = dma.done.wait [#allocation12], 10240  }
  0x17   :  { %2527 = vsyncadd [#allocation12], 4294957056  ;;  %v118_v0 = vld [vmem:[#allocation8 + $0x20] sm:$0xff]  ;;  %vm132_vm0 = vcmask 130048   ;;  %v2591_v3 = vld [vmem:[#allocation5 + $0x28] sm:$0xff]  ;;  %s2540_s23 = smov [#allocation14]  }
  0x18   :  { %v114_v1 = vld [vmem:[#allocation8] sm:$0xff]  ;;  %171 = vmatpush.msra.mxu0 %v118_v0  ;;  %2232 = vmatpush.msra.mxu1 %v118_v0  ;;  %v2593_v4 = vld [vmem:[#allocation5 + $0x30] sm:$0xff]  ;;  %v2595_v5 = vld [vmem:[#allocation5 + $0x38] sm:$0xff]  ;;  %s2162_s24 = sshll.u32 %s2540_s23, 4  ;;  %s2164_s27 = sshll.u32 %s3741_s6, 4  ;;  %s2163_s24 = int_to_ptr.vmem [resolvable:$true] %s2162_s24  ;;  %s2165_s27 = int_to_ptr.hbm [resolvable:$true] %s2164_s27 }
  0x19   :  { %2233 = vmatpush.msra.mxu2 %v118_v0  ;;  %2234 = vmatpush.msra.mxu3 %v118_v0  ;;  %v106_v2 = vld [vmem:[#allocation5] sm:$0xff]  ;;  %v119_v6 = vld [vmem:[#allocation8 + $0x28] sm:$0xff]  ;;  %v120_v7 = vld [vmem:[#allocation8 + $0x30] sm:$0xff] }
  0x1a   :  { %172 = vmatpush.msra.mxu0 %v114_v1  ;;  %2235 = vmatpush.msra.mxu1 %v114_v1  ;;  %v121_v8 = vld [vmem:[#allocation8 + $0x38] sm:$0xff]  ;;  %v2600_v9 = vld [vmem:[#allocation11 + $0x1e0] sm:$0xff]  ;;  %v116_v11 = vld [vmem:[#allocation8 + $0x10] sm:$0xff] }
  0x1b   :  { %2236 = vmatpush.msra.mxu2 %v114_v1  ;;  %2237 = vmatpush.msra.mxu3 %v114_v1  ;;  %v115_v10 = vld [vmem:[#allocation8 + $0x8] sm:$0xff]  ;;  %v117_v12 = vld [vmem:[#allocation8 + $0x18] sm:$0xff]  ;;  %v108_v31 = vld [vmem:[#allocation5 + $0x10] sm:$0xff] }
  0x1c   :  { %2176 = vmatmul.msk.f32.vlgmr.msra.gmra.mxu0 %vm132_vm0, %v106_v2  ;;  %2181 = vmatmul.msk.f32.vlgmr.msra.gmra.mxu1 %vm132_vm0, %v2591_v3  ;;  %v2606_v13 = vld [vmem:[#allocation11 + $0x1e8] sm:$0xff]  ;;  %v2609_v14 = vld [vmem:[#allocation11 + $0x1c0] sm:$0xff]  ;;  %v2611_v15 = vld [vmem:[#allocation11 + $0x1f8] sm:$0xff] }
  0x1d   :  { %2182 = vmatmul.msk.f32.vlgmr.msra.gmra.mxu2 %vm132_vm0, %v2593_v4  ;;  %2183 = vmatmul.msk.f32.vlgmr.msra.gmra.mxu3 %vm132_vm0, %v2595_v5  ;;  %v2613_v16 = vld [vmem:[#allocation11 + $0x1c8] sm:$0xff]  ;;  %v2615_v17 = vld [vmem:[#allocation11 + $0x1f0] sm:$0xff]  ;;  %v2621_v19 = vld [vmem:[#allocation11 + $0x1a0] sm:$0xff] }
  0x1e   :  { %212 = vmatpush.msrb.mxu1 %v119_v6  ;;  %253 = vmatpush.msrb.mxu2 %v120_v7  ;;  %v107_v18 = vld [vmem:[#allocation5 + $0x8] sm:$0xff]  ;;  %v2628_v21 = vld [vmem:[#allocation11 + $0x1d8] sm:$0xff]  ;;  %v2630_v22 = vld [vmem:[#allocation11 + $0x1d0] sm:$0xff] }
  0x1f   :  { %294 = vmatpush.msrb.mxu3 %v121_v8  ;;  %423 = vmatpush.msrb.mxu0 %v2600_v9  ;;  %v2623_v20 = vld [vmem:[#allocation11 + $0x1a8] sm:$0xff]  ;;  %v2634_v23 = vld [vmem:[#allocation11 + $0x180] sm:$0xff]  ;;  %v2640_v25 = vld [vmem:[#allocation11 + $0x1b8] sm:$0xff] }
  0x20   :  { %213 = vmatpush.msrb.mxu1 %v115_v10  ;;  %254 = vmatpush.msrb.mxu2 %v116_v11  ;;  %v2636_v24 = vld [vmem:[#allocation11 + $0x188] sm:$0xff]  ;;  %v2642_v26 = vld [vmem:[#allocation11 + $0x1b0] sm:$0xff]  ;;  %v2644_v27 = vld [vmem:[#allocation11 + $0x160] sm:$0xff] }
  0x21   :  { %295 = vmatpush.msrb.mxu3 %v117_v12  ;;  %424 = vmatpush.msrb.mxu0 %v2609_v14  ;;  %v2647_v28 = vld [vmem:[#allocation11 + $0x168] sm:$0xff]  ;;  %v2652_v29 = vld [vmem:[#allocation11 + $0x198] sm:$0xff]  ;;  %v2654_v30 = vld [vmem:[#allocation11 + $0x190] sm:$0xff] }
  0x22   :  { %443 = vmatpush.msra.mxu1 %v2606_v13  ;;  %463 = vmatpush.msra.mxu2 %v2615_v17  ;;  %v2660_v32 = vld [vmem:[#allocation11 + $0x140] sm:$0xff]  ;;  %v2663_v33 = vld [vmem:[#allocation11 + $0x148] sm:$0xff]  ;;  %v2668_v34 = vld [vmem:[#allocation11 + $0x178] sm:$0xff] }
  0x23   :  { %483 = vmatpush.msra.mxu3 %v2611_v15  ;;  %425 = vmatpush.msrb.mxu0 %v2621_v19  ;;  %v2670_v35 = vld [vmem:[#allocation11 + $0x170] sm:$0xff]  ;;  %v2674_v36 = vld [vmem:[#allocation11 + $0x120] sm:$0xff]  ;;  %v2676_v37 = vld [vmem:[#allocation11 + $0x128] sm:$0xff] }
  0x24   :  { %444 = vmatpush.msra.mxu1 %v2613_v16  ;;  %2177 = vmatmul.msk.f32.gmra.mxu0 %vm132_vm0, %v107_v18  ;;  %v2680_v38 = vld [vmem:[#allocation11 + $0x158] sm:$0xff]  ;;  %v2682_v39 = vld [vmem:[#allocation11 + $0x150] sm:$0xff]  ;;  %v2684_v40 = vld [vmem:[#allocation11 + $0x100] sm:$0xff] }
  0x25   :  { %2184 = vmatmul.msk.f32.vlgmr.msrb.gmra.mxu1 %vm132_vm0, %v106_v2  ;;  %2192 = vmatmul.msk.f32.vlgmr.msrb.gmra.mxu2 %vm132_vm0, %v106_v2  ;;  %v2687_v41 = vld [vmem:[#allocation11 + $0x108] sm:$0xff]  ;;  %v2692_v42 = vld [vmem:[#allocation11 + $0x138] sm:$0xff]  ;;  %v2694_v43 = vld [vmem:[#allocation11 + $0x130] sm:$0xff] }
  0x26   :  { %2200 = vmatmul.msk.f32.vlgmr.msrb.gmra.mxu3 %vm132_vm0, %v106_v2  ;;  %445 = vmatpush.msra.mxu1 %v2623_v20  ;;  %v109_v44 = vld [vmem:[#allocation5 + $0x18] sm:$0xff]  ;;  %v2700_v45 = vld [vmem:[#allocation11 + $0xe0] sm:$0xff]  ;;  %v2703_v46 = vld [vmem:[#allocation11 + $0xe8] sm:$0xff] }
  0x27   :  { %484 = vmatpush.msra.mxu3 %v2628_v21  ;;  %464 = vmatpush.msra.mxu2 %v2630_v22  ;;  %v2708_v47 = vld [vmem:[#allocation11 + $0x118] sm:$0xff]  ;;  %v2710_v48 = vld [vmem:[#allocation11 + $0x110] sm:$0xff]  ;;  %v2714_v49 = vld [vmem:[#allocation11 + $0xc0] sm:$0xff] }
  0x28   :  { %426 = vmatpush.msrb.mxu0 %v2634_v23  ;;  %446 = vmatpush.msra.mxu1 %v2636_v24  ;;  %v2716_v50 = vld [vmem:[#allocation11 + $0xc8] sm:$0xff]  ;;  %v2720_v51 = vld [vmem:[#allocation11 + $0xf8] sm:$0xff]  ;;  %v2722_v52 = vld [vmem:[#allocation11 + $0xf0] sm:$0xff] }
  0x29   :  { %485 = vmatpush.msra.mxu3 %v2640_v25  ;;  %465 = vmatpush.msra.mxu2 %v2642_v26  ;;  %v2724_v53 = vld [vmem:[#allocation11 + $0xa0] sm:$0xff]  ;;  %v2727_v54 = vld [vmem:[#allocation11 + $0xa8] sm:$0xff]  ;;  %v2732_v55 = vld [vmem:[#allocation11 + $0xd8] sm:$0xff] }
  0x2a   :  { %427 = vmatpush.msrb.mxu0 %v2644_v27  ;;  %447 = vmatpush.msra.mxu1 %v2647_v28  ;;  %v2734_v56 = vld [vmem:[#allocation11 + $0xd0] sm:$0xff]  ;;  %v2736_v57 = vld [vmem:[#allocation11 + $0x80] sm:$0xff]  ;;  %v2748_v60 = vld [vmem:[#allocation11 + $0x88] sm:$0xff] }
  0x2b   :  { %486 = vmatpush.msra.mxu3 %v2652_v29  ;;  %466 = vmatpush.msra.mxu2 %v2654_v30  ;;  %v110_v58 = vld [vmem:[#allocation5 + $0x20] sm:$0xff]  ;;  %v2756_v63 = vld [vmem:[#allocation11 + $0xb0] sm:$0xff]  ;;  %v2760_v0 = vld [vmem:[#allocation11 + $0x68] sm:$0xff] }
  0x2c   :  { %2178 = vmatmul.msk.f32.gmra.mxu0 %vm132_vm0, %v108_v31  ;;  %448 = vmatpush.msra.mxu1 %v2663_v33  ;;  %v2742_v59 = vld [vmem:[#allocation11 + $0x60] sm:$0xff]  ;;  %v2750_v61 = vld [vmem:[#allocation11 + $0xb8] sm:$0xff]  ;;  %v2768_v6 = vld [vmem:[#allocation11 + $0x90] sm:$0xff] }
  0x2d   :  { %2185 = vmatmul.msk.f32.gmra.mxu1 %vm132_vm0, %v107_v18  ;;  %2193 = vmatmul.msk.f32.gmra.mxu2 %vm132_vm0, %v107_v18  ;;  %v2754_v62 = vld [vmem:[#allocation11 + $0x40] sm:$0xff]  ;;  %v2762_v1 = vld [vmem:[#allocation11 + $0x98] sm:$0xff]  ;;  %v2771_v7 = vld [vmem:[#allocation11 + $0x48] sm:$0xff] }
  0x2e   :  { %2201 = vmatmul.msk.f32.gmra.mxu3 %vm132_vm0, %v107_v18  ;;  %428 = vmatpush.msrb.mxu0 %v2660_v32  ;;  %v2764_v2 = vld [vmem:[#allocation11 + $0x20] sm:$0xff]  ;;  %3783 = vst [vmem:[#allocation20_spill] sm:$0xff] %v2771_v7  ;;  %v2774_v8 = vld [vmem:[#allocation11 + $0x78] sm:$0xff]  ;;  %v2784_v11 = vld [vmem:[#allocation11 + $0x28] sm:$0xff] }
  0x2f   :  { %487 = vmatpush.msra.mxu3 %v2668_v34  ;;  %467 = vmatpush.msra.mxu2 %v2670_v35  ;;  %3782 = vst [vmem:[#allocation19_spill] sm:$0xff] %v2764_v2  ;;  %v2776_v10 = vld [vmem:[#allocation11] sm:$0xff]  ;;  %v2788_v12 = vld [vmem:[#allocation11 + $0x70] sm:$0xff]  ;;  %v2790_v18 = vld [vmem:[#allocation11 + $0x58] sm:$0xff] }
  0x30   :  { %429 = vmatpush.msrb.mxu0 %v2674_v36  ;;  %449 = vmatpush.msra.mxu1 %v2676_v37  ;;  %3784 = vst [vmem:[#allocation21_spill] sm:$0xff] %v2774_v8 }
  0x31   :  { %488 = vmatpush.msra.mxu3 %v2680_v38  ;;  %468 = vmatpush.msra.mxu2 %v2682_v39  ;;  %3785 = vst [vmem:[#allocation22_spill] sm:$0xff] %v2776_v10 }
  0x32   :  { %430 = vmatpush.msrb.mxu0 %v2684_v40  ;;  %450 = vmatpush.msra.mxu1 %v2687_v41 }
  0x33   :  { %489 = vmatpush.msra.mxu3 %v2692_v42  ;;  %469 = vmatpush.msra.mxu2 %v2694_v43 }
  0x34   :  { %2179 = vmatmul.msk.f32.gmra.mxu0 %vm132_vm0, %v109_v44  ;;  %451 = vmatpush.msra.mxu1 %v2703_v46 }
  0x35   :  { %2186 = vmatmul.msk.f32.gmra.mxu1 %vm132_vm0, %v108_v31  ;;  %2194 = vmatmul.msk.f32.gmra.mxu2 %vm132_vm0, %v108_v31 }
  0x36   :  { %2202 = vmatmul.msk.f32.gmra.mxu3 %vm132_vm0, %v108_v31  ;;  %431 = vmatpush.msrb.mxu0 %v2700_v45  ;;  %v2539_v31 = vmov 0.0  }
  0x37   :  { %490 = vmatpush.msra.mxu3 %v2708_v47  ;;  %470 = vmatpush.msra.mxu2 %v2710_v48 }
  0x38   :  { %432 = vmatpush.msrb.mxu0 %v2714_v49  ;;  %452 = vmatpush.msra.mxu1 %v2716_v50 }
  0x39   :  { %491 = vmatpush.msra.mxu3 %v2720_v51  ;;  %471 = vmatpush.msra.mxu2 %v2722_v52 }
  0x3a   :  { %433 = vmatpush.msrb.mxu0 %v2724_v53  ;;  %453 = vmatpush.msra.mxu1 %v2727_v54 }
  0x3b   :  { %492 = vmatpush.msra.mxu3 %v2732_v55  ;;  %472 = vmatpush.msra.mxu2 %v2734_v56 }
  0x3c   :  { %434 = vmatpush.msrb.mxu0 %v2736_v57  ;;  %454 = vmatpush.msra.mxu1 %v2748_v60 }
  0x3d   :  { %2187 = vmatmul.msk.f32.gmra.mxu1 %vm132_vm0, %v109_v44  ;;  %2180 = vmatmul.msk.f32.gmra.mxu0 %vm132_vm0, %v110_v58 }
  0x3e   :  { %2195 = vmatmul.msk.f32.gmra.mxu2 %vm132_vm0, %v109_v44  ;;  %2203 = vmatmul.msk.f32.gmra.mxu3 %vm132_vm0, %v109_v44  ;;  %v2794_v44 = vld [vmem:[#allocation11 + $0x8] sm:$0xff] }
  0x3f   :  { %435 = vmatpush.msrb.mxu0 %v2742_v59  ;;  %493 = vmatpush.msra.mxu3 %v2750_v61 }
  0x40   :  { %473 = vmatpush.msra.mxu2 %v2756_v63  ;;  %455 = vmatpush.msra.mxu1 %v2760_v0 }
  0x41   :  { %436 = vmatpush.msrb.mxu0 %v2754_v62  ;;  %494 = vmatpush.msra.mxu3 %v2762_v1 }
  0x42   :  { %474 = vmatpush.msra.mxu2 %v2768_v6  ;;  %456 = vmatpush.msra.mxu1 %v2771_v7  ;;  %v2805_v7 = vld [vmem:[#allocation11 + $0x30] sm:$0xff] }
  0x43   :  { %437 = vmatpush.msrb.mxu0 %v2764_v2  ;;  %495 = vmatpush.msra.mxu3 %v2774_v8  ;;  %v2798_v2 = vld [vmem:[#allocation11 + $0x50] sm:$0xff]  ;;  %v2807_v8 = vld [vmem:[#allocation11 + $0x18] sm:$0xff] }
  0x44   :  { %457 = vmatpush.msra.mxu1 %v2784_v11  ;;  %475 = vmatpush.msra.mxu2 %v2788_v12 }
  0x45   :  { %438 = vmatpush.msrb.mxu0 %v2776_v10  ;;  %2188 = vmatmul.msk.f32.gmra.mxu1 %vm132_vm0, %v110_v58  ;;  %v2800_v10 = vld [vmem:[#allocation11 + $0x38] sm:$0xff] }
  0x46   :  { %2196 = vmatmul.msk.f32.gmra.mxu2 %vm132_vm0, %v110_v58  ;;  %439 = vmatmul.f32.vlgmr.msrb.gmra.mxu0 %v2539_v31 }
  0x47   :  { %2204 = vmatmul.msk.f32.gmra.mxu3 %vm132_vm0, %v110_v58  ;;  %458 = vmatpush.msra.mxu1 %v2794_v44  ;;  %v2815_v58 = vld [vmem:[#allocation11 + $0x10] sm:$0xff] }
  0x48   :  { %496 = vmatpush.msra.mxu3 %v2790_v18  ;;  %643 = vmatpush.msra.mxu0 %v2600_v9 }
  0x49   :  { %476 = vmatpush.msra.mxu2 %v2798_v2  ;;  %663 = vmatpush.msrb.mxu1 %v2606_v13 }
  0x4a   :  { %497 = vmatpush.msra.mxu3 %v2800_v10  ;;  %644 = vmatpush.msra.mxu0 %v2609_v14 }
  0x4b   :  { %477 = vmatpush.msra.mxu2 %v2805_v7  ;;  %664 = vmatpush.msrb.mxu1 %v2613_v16 }
  0x4c   :  { %498 = vmatpush.msra.mxu3 %v2807_v8  ;;  %645 = vmatpush.msra.mxu0 %v2621_v19 }
  0x4d   :  { %2189 = vmatmul.msk.f32.gmra.mxu1 %vm132_vm0, %v2591_v3  ;;  %478 = vmatpush.msra.mxu2 %v2815_v58 }
  0x4e   :  { %703 = vmatpush.msrb.mxu3 %v2611_v15  ;;  %2197 = vmatmul.msk.f32.gmra.mxu2 %vm132_vm0, %v2591_v3 }
  0x4f   :  { %2205 = vmatmul.msk.f32.gmra.mxu3 %vm132_vm0, %v2591_v3  ;;  %683 = vmatpush.msrb.mxu2 %v2615_v17  ;;  %v3786_v3 = vld [vmem:[#allocation21_spill] sm:$0xff] }
  0x50   :  { %704 = vmatpush.msrb.mxu3 %v2628_v21  ;;  %665 = vmatpush.msrb.mxu1 %v2623_v20 }
  0x51   :  { %684 = vmatpush.msrb.mxu2 %v2630_v22  ;;  %646 = vmatpush.msra.mxu0 %v2634_v23 }
  0x52   :  { %705 = vmatpush.msrb.mxu3 %v2640_v25  ;;  %666 = vmatpush.msrb.mxu1 %v2636_v24 }
  0x53   :  { %685 = vmatpush.msrb.mxu2 %v2642_v26  ;;  %647 = vmatpush.msra.mxu0 %v2644_v27 }
  0x54   :  { %706 = vmatpush.msrb.mxu3 %v2652_v29  ;;  %667 = vmatpush.msrb.mxu1 %v2647_v28 }
  0x55   :  { %2190 = vmatmul.msk.f32.gmra.mxu1 %vm132_vm0, %v2593_v4  ;;  %686 = vmatpush.msrb.mxu2 %v2654_v30 }
  0x56   :  { %2198 = vmatmul.msk.f32.gmra.mxu2 %vm132_vm0, %v2593_v4  ;;  %707 = vmatpush.msrb.mxu3 %v2668_v34 }
  0x57   :  { %2206 = vmatmul.msk.f32.gmra.mxu3 %vm132_vm0, %v2593_v4  ;;  %648 = vmatpush.msra.mxu0 %v2660_v32  ;;  %v3787_v4 = vld [vmem:[#allocation20_spill] sm:$0xff] }
  0x58   :  { %687 = vmatpush.msrb.mxu2 %v2670_v35  ;;  %668 = vmatpush.msrb.mxu1 %v2663_v33 }
  0x59   :  { %708 = vmatpush.msrb.mxu3 %v2680_v38  ;;  %649 = vmatpush.msra.mxu0 %v2674_v36 }
  0x5a   :  { %688 = vmatpush.msrb.mxu2 %v2682_v39  ;;  %669 = vmatpush.msrb.mxu1 %v2676_v37 }
  0x5b   :  { %709 = vmatpush.msrb.mxu3 %v2692_v42  ;;  %650 = vmatpush.msra.mxu0 %v2684_v40 }
  0x5c   :  { %689 = vmatpush.msrb.mxu2 %v2694_v43  ;;  %670 = vmatpush.msrb.mxu1 %v2687_v41 }
  0x5d   :  { %2191 = vmatmul.msk.f32.gmra.mxu1 %vm132_vm0, %v2595_v5  ;;  %710 = vmatpush.msrb.mxu3 %v2708_v47 }
  0x5e   :  { %2199 = vmatmul.msk.f32.gmra.mxu2 %vm132_vm0, %v2595_v5  ;;  %651 = vmatpush.msra.mxu0 %v2700_v45 }
  0x5f   :  { %2207 = vmatmul.msk.f32.gmra.mxu3 %vm132_vm0, %v2595_v5  ;;  %690 = vmatpush.msrb.mxu2 %v2710_v48  ;;  %v3788_v5 = vld [vmem:[#allocation19_spill] sm:$0xff] }
  0x60   :  { %671 = vmatpush.msrb.mxu1 %v2703_v46  ;;  %711 = vmatpush.msrb.mxu3 %v2720_v51 }
  0x61   :  { %691 = vmatpush.msrb.mxu2 %v2722_v52  ;;  %652 = vmatpush.msra.mxu0 %v2714_v49 }
  0x62   :  { %672 = vmatpush.msrb.mxu1 %v2716_v50  ;;  %712 = vmatpush.msrb.mxu3 %v2732_v55 }
  0x63   :  { %692 = vmatpush.msrb.mxu2 %v2734_v56  ;;  %653 = vmatpush.msra.mxu0 %v2724_v53 }
  0x64   :  { %673 = vmatpush.msrb.mxu1 %v2727_v54  ;;  %713 = vmatpush.msrb.mxu3 %v2750_v61 }
  0x65   :  { %459 = vmatmul.f32.vlgmr.msra.gmra.mxu1 %v2539_v31  ;;  %693 = vmatpush.msrb.mxu2 %v2756_v63 }
  0x66   :  { %479 = vmatmul.f32.vlgmr.msra.gmra.mxu2 %v2539_v31  ;;  %654 = vmatpush.msra.mxu0 %v2736_v57 }
  0x67   :  { %499 = vmatmul.f32.vlgmr.msra.gmra.mxu3 %v2539_v31  ;;  %674 = vmatpush.msrb.mxu1 %v2748_v60  ;;  %v3789_v31 = vld [vmem:[#allocation22_spill] sm:$0xff] }
  0x68   :  { %694 = vmatpush.msrb.mxu2 %v2768_v6  ;;  %655 = vmatpush.msra.mxu0 %v2742_v59 }
  0x69   :  { %714 = vmatpush.msrb.mxu3 %v2762_v1  ;;  %675 = vmatpush.msrb.mxu1 %v2760_v0 }
  0x6a   :  { %695 = vmatpush.msrb.mxu2 %v2788_v12  ;;  %656 = vmatpush.msra.mxu0 %v2754_v62 }
  0x6b   :  { %715 = vmatpush.msrb.mxu3 %v3786_v3  ;;  %676 = vmatpush.msrb.mxu1 %v3787_v4 }
  0x6c   :  { %696 = vmatpush.msrb.mxu2 %v2798_v2  ;;  %657 = vmatpush.msra.mxu0 %v3788_v5 }
  0x6d   :  { %716 = vmatpush.msrb.mxu3 %v2790_v18  ;;  %677 = vmatpush.msrb.mxu1 %v2784_v11 }
  0x6e   :  { %697 = vmatpush.msrb.mxu2 %v2805_v7  ;;  %658 = vmatpush.msra.mxu0 %v3789_v31 }
  0x6f   :  { %717 = vmatpush.msrb.mxu3 %v2800_v10  ;;  %678 = vmatpush.msrb.mxu1 %v2794_v44 }
  0x70   :  { %698 = vmatpush.msrb.mxu2 %v2815_v58  ;;  %863 = vmatpush.msrb.mxu0 %v2600_v9  ;;  %v122_v9 = vld [vmem:[#allocation10] sm:$0xf] }
  0x71   :  { %718 = vmatpush.msrb.mxu3 %v2807_v8  ;;  %883 = vmatpush.msra.mxu1 %v2606_v13  ;;  %v124_v13 = vperm.slane %v122_v9, 0 }
  0x72   :  { %903 = vmatpush.msra.mxu2 %v2615_v17  ;;  %864 = vmatpush.msrb.mxu0 %v2609_v14 }
  0x73   :  { %923 = vmatpush.msra.mxu3 %v2611_v15  ;;  %884 = vmatpush.msra.mxu1 %v2613_v16 }
  0x74   :  { %904 = vmatpush.msra.mxu2 %v2630_v22  ;;  %865 = vmatpush.msrb.mxu0 %v2621_v19 }
  0x75   :  { %924 = vmatpush.msra.mxu3 %v2628_v21  ;;  %885 = vmatpush.msra.mxu1 %v2623_v20 }
  0x76   :  { %905 = vmatpush.msra.mxu2 %v2642_v26  ;;  %866 = vmatpush.msrb.mxu0 %v2634_v23 }
  0x77   :  { %925 = vmatpush.msra.mxu3 %v2640_v25  ;;  %886 = vmatpush.msra.mxu1 %v2636_v24  ;;  %v125_v25 = vperm.slane %v122_v9, 1 }
  0x78   :  { %906 = vmatpush.msra.mxu2 %v2654_v30  ;;  %867 = vmatpush.msrb.mxu0 %v2644_v27 }
  0x79   :  { %926 = vmatpush.msra.mxu3 %v2652_v29  ;;  %887 = vmatpush.msra.mxu1 %v2647_v28 }
  0x7a   :  { %907 = vmatpush.msra.mxu2 %v2670_v35  ;;  %868 = vmatpush.msrb.mxu0 %v2660_v32 }
  0x7b   :  { %927 = vmatpush.msra.mxu3 %v2668_v34  ;;  %888 = vmatpush.msra.mxu1 %v2663_v33  ;;  %v2980_v33 = vperm.slane %v122_v9, 2  ;;  %v127_v34 = vperm.slane %v122_v9, 3 }
  0x7c   :  { %908 = vmatpush.msra.mxu2 %v2682_v39  ;;  %869 = vmatpush.msrb.mxu0 %v2674_v36 }
  0x7d   :  { %928 = vmatpush.msra.mxu3 %v2680_v38  ;;  %889 = vmatpush.msra.mxu1 %v2676_v37 }
  0x7e   :  { %909 = vmatpush.msra.mxu2 %v2694_v43  ;;  %870 = vmatpush.msrb.mxu0 %v2684_v40 }
  0x7f   :  { %929 = vmatpush.msra.mxu3 %v2692_v42  ;;  %890 = vmatpush.msra.mxu1 %v2687_v41 }
  0x80   :  { %910 = vmatpush.msra.mxu2 %v2710_v48  ;;  %871 = vmatpush.msrb.mxu0 %v2700_v45 }
  0x81   :  { %930 = vmatpush.msra.mxu3 %v2708_v47  ;;  %891 = vmatpush.msra.mxu1 %v2703_v46 }
  0x82   :  { %911 = vmatpush.msra.mxu2 %v2722_v52  ;;  %872 = vmatpush.msrb.mxu0 %v2714_v49 }
  0x83   :  { %931 = vmatpush.msra.mxu3 %v2720_v51  ;;  %892 = vmatpush.msra.mxu1 %v2716_v50 }
  0x84   :  { %912 = vmatpush.msra.mxu2 %v2734_v56  ;;  %873 = vmatpush.msrb.mxu0 %v2724_v53 }
  0x85   :  { %932 = vmatpush.msra.mxu3 %v2732_v55  ;;  %893 = vmatpush.msra.mxu1 %v2727_v54 }
  0x86   :  { %913 = vmatpush.msra.mxu2 %v2756_v63  ;;  %874 = vmatpush.msrb.mxu0 %v2736_v57 }
  0x87   :  { %933 = vmatpush.msra.mxu3 %v2750_v61  ;;  %894 = vmatpush.msra.mxu1 %v2748_v60 }
  0x88   :  { %914 = vmatpush.msra.mxu2 %v2768_v6  ;;  %875 = vmatpush.msrb.mxu0 %v2742_v59 }
  0x89   :  { %934 = vmatpush.msra.mxu3 %v2762_v1  ;;  %895 = vmatpush.msra.mxu1 %v2760_v0 }
  0x8a   :  { %915 = vmatpush.msra.mxu2 %v2788_v12  ;;  %876 = vmatpush.msrb.mxu0 %v2754_v62 }
  0x8b   :  { %935 = vmatpush.msra.mxu3 %v3786_v3  ;;  %896 = vmatpush.msra.mxu1 %v3787_v4 }
  0x8c   :  { %916 = vmatpush.msra.mxu2 %v2798_v2  ;;  %877 = vmatpush.msrb.mxu0 %v3788_v5 }
  0x8d   :  { %936 = vmatpush.msra.mxu3 %v2790_v18  ;;  %897 = vmatpush.msra.mxu1 %v2784_v11 }
  0x8e   :  { %917 = vmatpush.msra.mxu2 %v2805_v7 }
  0x8f   :  { %937 = vmatpush.msra.mxu3 %v2800_v10  ;;  %898 = vmatpush.msra.mxu1 %v2794_v44 }
  0x90   :  { %918 = vmatpush.msra.mxu2 %v2815_v58 }
  0x91   :  { %938 = vmatpush.msra.mxu3 %v2807_v8 }
  0x99   :  { %v174_v14 = vpop.f32.mrf.mxu0  ;;  %v189_v15 = vpop.f32.mrf.mxu1 }
  0x9a   :  { %v2964_v16 = vadd.f32 %v189_v15, %v124_v13  ;;  %v175_v2 = vadd.f32 %v174_v14, %v124_v13 }
  0x9c   :  { %3790 = vst [vmem:[#allocation21_spill] sm:$0xff] %v2964_v16  ;;  %v3192_v16 = vld [vmem:[#allocation11 + $0x98] sm:$0xff] }
  0xa0   :  { %v192_v17 = vpop.f32.mrf.mxu2  ;;  %v195_v19 = vpop.f32.mrf.mxu3 }
  0xa1   :  { %v2966_v20 = vadd.f32 %v192_v17, %v124_v13  ;;  %v2968_v21 = vadd.f32 %v195_v19, %v124_v13  ;;  %v177_v22 = vpop.f32.mrf.mxu0 }
  0xa2   :  { %v215_v23 = vpop.f32.mrf.mxu1  ;;  %v2970_v24 = vadd.f32 %v177_v22, %v124_v13 }
  0xa3   :  { %3791 = vst [vmem:[#allocation20_spill] sm:$0xff] %v2966_v20  ;;  %v216_v15 = vadd.f32 %v215_v23, %v125_v25  ;;  %v3174_v20 = vld [vmem:[#allocation11 + $0xa8] sm:$0xff] }
  0xa4   :  { %3792 = vst [vmem:[#allocation19_spill] sm:$0xff] %v2968_v21  ;;  %v3166_v21 = vld [vmem:[#allocation11 + $0xd8] sm:$0xff] }
  0xa8   :  { %v2972_v26 = vpop.f32.mrf.mxu2 }
  0xa9   :  { %v2974_v27 = vpop.f32.mrf.mxu3  ;;  %v180_v28 = vpop.f32.mrf.mxu0 }
  0xaa   :  { %v218_v29 = vpop.f32.mrf.mxu1  ;;  %v2976_v30 = vadd.f32 %v180_v28, %v124_v13 }
  0xab   :  { %v2978_v32 = vadd.f32 %v218_v29, %v125_v25 }
  0xb0   :  { %v259_v35 = vpop.f32.mrf.mxu2 }
  0xb1   :  { %v300_v36 = vpop.f32.mrf.mxu3  ;;  %v2983_v37 = vadd.f32 %v259_v35, %v2980_v33  ;;  %v183_v39 = vpop.f32.mrf.mxu0 }
  0xb2   :  { %v2985_v38 = vadd.f32 %v300_v36, %v127_v34  ;;  %v221_v40 = vpop.f32.mrf.mxu1  ;;  %v2987_v41 = vadd.f32 %v183_v39, %v124_v13  ;;  %v298_v39 = vadd.f32 %v2974_v27, %v127_v34 }
  0xb3   :  { %v2989_v42 = vadd.f32 %v221_v40, %v125_v25 }
  0xb4   :  { %3793 = vst [vmem:[#allocation22_spill] sm:$0xff] %v2987_v41 }
  0xb8   :  { %v262_v43 = vpop.f32.mrf.mxu2 }
  0xb9   :  { %v303_v45 = vpop.f32.mrf.mxu3  ;;  %v2992_v46 = vadd.f32 %v262_v43, %v2980_v33 }
  0xba   :  { %v2994_v47 = vadd.f32 %v303_v45, %v127_v34  ;;  %v224_v48 = vpop.f32.mrf.mxu1  ;;  %v186_v49 = vpop.f32.mrf.mxu0 }
  0xbb   :  { %v2996_v50 = vadd.f32 %v224_v48, %v125_v25  ;;  %v2998_v51 = vadd.f32 %v186_v49, %v124_v13 }
  0xbd   :  { %3794 = vst [vmem:[#allocation23_spill] sm:$0xff] %v2996_v50  ;;  %v3216_v50 = vld [vmem:[#allocation11 + $0x20] sm:$0xff] }
  0xbe   :  { %3795 = vst [vmem:[#allocation24_spill] sm:$0xff] %v2998_v51  ;;  %v3208_v51 = vld [vmem:[#allocation11 + $0x48] sm:$0xff] }
  0xbf   :  { %3828 = vst [vmem:[#allocation57_spill] sm:$0xff] %v3208_v51 }
  0xc1   :  { %v265_v52 = vpop.f32.mrf.mxu2  ;;  %v306_v54 = vpop.f32.mrf.mxu3 }
  0xc2   :  { %v3001_v53 = vadd.f32 %v265_v52, %v2980_v33  ;;  %v227_v55 = vpop.f32.mrf.mxu1  ;;  %v3003_v56 = vadd.f32 %v306_v54, %v127_v34  ;;  %v257_v54 = vadd.f32 %v2972_v26, %v2980_v33 }
  0xc3   :  { %v3005_v57 = vadd.f32 %v227_v55, %v125_v25  ;;  %v440_v1 = vpop.f32.mrf.mxu0 }
  0xc4   :  { %3796 = vst [vmem:[#allocation25_spill] sm:$0xff] %v3001_v53  ;;  %v503_v6 = vadd.f32 %v440_v1, %v175_v2 }
  0xc5   :  { %3797 = vst [vmem:[#allocation26_spill] sm:$0xff] %v3003_v56  ;;  %v3214_v56 = vld [vmem:[#allocation11 + $0x58] sm:$0xff] }
  0xc6   :  { %3798 = vst [vmem:[#allocation27_spill] sm:$0xff] %v3005_v57  ;;  %v2208_v12 = vmul.f32 -1.442695, %v503_v6  ;;  %v3206_v57 = vld [vmem:[#allocation11 + $0x40] sm:$0xff] }
  0xc7   :  { %3827 = vst [vmem:[#allocation56_spill] sm:$0xff] %v3206_v57 }
  0xc8   :  { %2250 = vpow2.f32 %v2208_v12 }
  0xc9   :  { %v268_v59 = vpop.f32.mrf.mxu2 }
  0xca   :  { %v3008_v60 = vadd.f32 %v268_v59, %v2980_v33  ;;  %v309_v61 = vpop.f32.mrf.mxu3  ;;  %v230_v62 = vpop.f32.mrf.mxu1 }
  0xcb   :  { %v3010_v63 = vadd.f32 %v309_v61, %v127_v34  ;;  %v3012_v0 = vadd.f32 %v230_v62, %v125_v25 }
  0xcc   :  { %3799 = vst [vmem:[#allocation28_spill] sm:$0xff] %v3008_v60  ;;  %v3194_v60 = vld [vmem:[#allocation11 + $0x60] sm:$0xff] }
  0xcd   :  { %3800 = vst [vmem:[#allocation29_spill] sm:$0xff] %v3010_v63  ;;  %v3202_v63 = vld [vmem:[#allocation11 + $0x78] sm:$0xff] }
  0xce   :  { %3801 = vst [vmem:[#allocation30_spill] sm:$0xff] %v3012_v0  ;;  %v2251_v13 = vpop.eup %2250 }
  0xcf   :  { %v510_v14 = vadd.f32 1.0, %v2251_v13  ;;  %3823 = vst [vmem:[#allocation52_spill] sm:$0xff] %v3194_v60 }
  0xd0   :  { %3826 = vst [vmem:[#allocation55_spill] sm:$0xff] %v3202_v63 }
  0xd1   :  { %v271_v7 = vpop.f32.mrf.mxu2  ;;  %2252 = vrcp.f32 %v510_v14  ;;  %vm516_vm2 = vweird.f32 %v510_v14  ;;  %v520_v12 = vand.u32 2147483647, %v510_v14 }
  0xd2   :  { %v3015_v8 = vadd.f32 %v271_v7, %v2980_v33  ;;  %v312_v10 = vpop.f32.mrf.mxu3  ;;  %v233_v11 = vpop.f32.mrf.mxu1 }
  0xd3   :  { %v3017_v18 = vadd.f32 %v312_v10, %v127_v34  ;;  %v3019_v44 = vadd.f32 %v233_v11, %v125_v25  ;;  %v522_v10 = vand.u32 2147483648, %v510_v14  ;;  %vm521_vm7 = vcmp.eq.f32.partialorder %v520_v12, 8.507059e+37 }
  0xd4   :  { %3802 = vst [vmem:[#allocation31_spill] sm:$0xff] %v3015_v8  ;;  %v3176_v8 = vld [vmem:[#allocation11 + $0xb0] sm:$0xff] }
  0xd5   :  { %3803 = vst [vmem:[#allocation32_spill] sm:$0xff] %v3017_v18  ;;  %v3180_v18 = vld [vmem:[#allocation11 + $0xb8] sm:$0xff] }
  0xd6   :  { %3804 = vst [vmem:[#allocation33_spill] sm:$0xff] %v3019_v44  ;;  %v3172_v44 = vld [vmem:[#allocation11 + $0xa0] sm:$0xff] }
  0xd7   :  { %v2253_v40 = vpop.eup %2252 }
  0xd8   :  { %v512_v49 = vmul.f32 %v2253_v40, %v510_v14  ;;  %vm517_vm1 = vweird.f32 %v2253_v40 }
  0xd9   :  { %v274_v58 = vpop.f32.mrf.mxu2  ;;  %vm518_vm4 = vmor %vm516_vm2, %vm517_vm1 }
  0xda   :  { %v3022_v3 = vadd.f32 %v274_v58, %v2980_v33  ;;  %v315_v4 = vpop.f32.mrf.mxu3  ;;  %v236_v5 = vpop.f32.mrf.mxu1  ;;  %v513_v55 = vsub.f32 1.0, %v512_v49 }
  0xdb   :  { %v3024_v31 = vadd.f32 %v315_v4, %v127_v34  ;;  %v3026_v9 = vadd.f32 %v236_v5, %v125_v25 }
  0xdc   :  { %3805 = vst [vmem:[#allocation34_spill] sm:$0xff] %v3022_v3  ;;  %v514_v62 = vmul.f32 %v2253_v40, %v513_v55 }
  0xdd   :  { %3806 = vst [vmem:[#allocation35_spill] sm:$0xff] %v3024_v31 }
  0xde   :  { %3807 = vst [vmem:[#allocation36_spill] sm:$0xff] %v3026_v9  ;;  %v515_v6 = vadd.f32 %v2253_v40, %v514_v62 }
  0xe1   :  { %v277_v17 = vpop.f32.mrf.mxu2 }
  0xe2   :  { %v3029_v19 = vadd.f32 %v277_v17, %v2980_v33  ;;  %v318_v22 = vpop.f32.mrf.mxu3  ;;  %v460_v28 = vpop.f32.mrf.mxu1  ;;  %v519_v33 = vsel %vm518_vm4, %v2253_v40, %v515_v6 }
  0xe3   :  { %v3031_v29 = vadd.f32 %v318_v22, %v127_v34  ;;  %v504_v35 = vadd.f32 %v460_v28, %v216_v15  ;;  %v523_v15 = vor.u32 1.1754944e-38, %v522_v10 }
  0xe4   :  { %3808 = vst [vmem:[#allocation37_spill] sm:$0xff] %v3029_v19  ;;  %v3162_v19 = vld [vmem:[#allocation11 + $0xd0] sm:$0xff] }
  0xe5   :  { %3809 = vst [vmem:[#allocation38_spill] sm:$0xff] %v3031_v29  ;;  %v2209_v36 = vmul.f32 -1.442695, %v504_v35  ;;  %v524_v28 = vsel %vm521_vm7, %v523_v15, %v519_v33 }
  0xe7   :  { %2254 = vpow2.f32 %v2209_v36 }
  0xe9   :  { %v480_v52 = vpop.f32.mrf.mxu2 }
  0xea   :  { %v500_v43 = vpop.f32.mrf.mxu3  ;;  %v505_v59 = vadd.f32 %v480_v52, %v257_v54 }
  0xeb   :  { %v506_v45 = vadd.f32 %v500_v43, %v298_v39 }
  0xed   :  { %v2255_v48 = vpop.eup %2254  ;;  %v2210_v23 = vmul.f32 -1.442695, %v506_v45 }
  0xee   :  { %v529_v25 = vadd.f32 1.0, %v2255_v48 }
  0xef   :  { %2256 = vpow2.f32 %v2210_v23 }
  0xf0   :  { %2258 = vrcp.f32 %v529_v25  ;;  %v541_v7 = vand.u32 2147483648, %v529_v25  ;;  %v539_v58 = vand.u32 2147483647, %v529_v25  ;;  %vm535_vm5 = vweird.f32 %v529_v25 }
  0xf1   :  { %2260 = vtanh.f32 %v505_v59 }
  0xf2   :  { %v542_v13 = vor.u32 1.1754944e-38, %v541_v7  ;;  %vm540_vm8 = vcmp.eq.f32.partialorder %v539_v58, 8.507059e+37 }
  0xf5   :  { %v2257_v61 = vpop.eup %2256 }
  0xf6   :  { %v2259_v1 = vpop.eup %2258  ;;  %v549_v2 = vadd.f32 1.0, %v2257_v61 }
  0xf7   :  { %v531_v27 = vmul.f32 %v2259_v1, %v529_v25  ;;  %vm536_vm3 = vweird.f32 %v2259_v1  ;;  %v2261_v26 = vpop.eup %2260 }
  0xf8   :  { %2262 = vrcp.f32 %v549_v2  ;;  %vm537_vm6 = vmor %vm535_vm5, %vm536_vm3  ;;  %v566_v39 = vmul.f32 %v2261_v26, %v524_v28  ;;  %v561_v48 = vand.u32 2147483648, %v549_v2  ;;  %vm555_vm10 = vweird.f32 %v549_v2 }
  0xf9   :  { %v532_v34 = vsub.f32 1.0, %v531_v27  ;;  %v559_v49 = vand.u32 2147483647, %v549_v2 }
  0xfa   :  { %v562_v25 = vor.u32 1.1754944e-38, %v561_v48 }
  0xfb   :  { %v533_v11 = vmul.f32 %v2259_v1, %v532_v34  ;;  %vm560_vm12 = vcmp.eq.f32.partialorder %v559_v49, 8.507059e+37 }
  0xfd   :  { %v534_v4 = vadd.f32 %v2259_v1, %v533_v11 }
  0xfe   :  { %v2263_v5 = vpop.eup %2262 }
  0xff   :  { %v538_v17 = vsel %vm537_vm6, %v2259_v1, %v534_v4  ;;  %v551_v22 = vmul.f32 %v2263_v5, %v549_v2  ;;  %vm556_vm9 = vweird.f32 %v2263_v5  ;;  %v3041_v2 = vld [vmem:[#allocation11] sm:$0xff] }
 0x100   :  { %v543_v35 = vsel %vm540_vm8, %v542_v13, %v538_v17  ;;  %vm557_vm11 = vmor %vm555_vm10, %vm556_vm9  ;;  %878 = vmatpush.msrb.mxu0 %v3041_v2 }
 0x101   :  { %v565_v36 = vmul.f32 0.0, %v543_v35  ;;  %v552_v14 = vsub.f32 1.0, %v551_v22 }
 0x103   :  { %v3036_v43 = vadd.f32 %v566_v39, %v565_v36  ;;  %v553_v45 = vmul.f32 %v2263_v5, %v552_v14 }
 0x105   :  { %2264 = vtanh.f32 %v3036_v43  ;;  %v554_v40 = vadd.f32 %v2263_v5, %v553_v45 }
 0x107   :  { %v558_v23 = vsel %vm557_vm11, %v2263_v5, %v554_v40 }
 0x108   :  { %v563_v54 = vsel %vm560_vm12, %v562_v25, %v558_v23 }
 0x10b   :  { %v2265_v52 = vpop.eup %2264 }
 0x10c   :  { %v569_v55 = vmul.f32 %v2265_v52, %v563_v54 }
 0x10e   :  { %659 = vmatmul.f32.vlgmr.msra.gmra.mxu0 %v569_v55  ;;  %679 = vmatmul.f32.vlgmr.msrb.gmra.mxu1 %v569_v55 }
 0x10f   :  { %699 = vmatmul.f32.vlgmr.msrb.gmra.mxu2 %v569_v55  ;;  %719 = vmatmul.f32.vlgmr.msrb.gmra.mxu3 %v569_v55 }
 0x18b   :  { %v660_v59 = vpop.f32.mrf.mxu0  ;;  %v680_v61 = vpop.f32.mrf.mxu1 }
 0x18c   :  { %v723_v62 = vadd.f32 %v660_v59, %v2970_v24  ;;  %v724_v1 = vadd.f32 %v680_v61, %v2978_v32 }
 0x18e   :  { %v2211_v27 = vmul.f32 -1.442695, %v723_v62  ;;  %v2212_v34 = vmul.f32 -1.442695, %v724_v1 }
 0x190   :  { %2266 = vpow2.f32 %v2211_v27 }
 0x191   :  { %2268 = vpow2.f32 %v2212_v34 }
 0x192   :  { %v720_v6 = vpop.f32.mrf.mxu3  ;;  %v700_v24 = vpop.f32.mrf.mxu2 }
 0x193   :  { %v726_v7 = vadd.f32 %v720_v6, %v2985_v38  ;;  %v725_v5 = vadd.f32 %v700_v24, %v2983_v37 }
 0x195   :  { %v2213_v10 = vmul.f32 -1.442695, %v726_v7 }
 0x196   :  { %v2267_v11 = vpop.eup %2266 }
 0x197   :  { %v2269_v12 = vpop.eup %2268  ;;  %v730_v58 = vadd.f32 1.0, %v2267_v11  ;;  %2270 = vpow2.f32 %v2213_v10 }
 0x198   :  { %v749_v26 = vadd.f32 1.0, %v2269_v12 }
 0x199   :  { %2272 = vrcp.f32 %v730_v58  ;;  %v742_v28 = vand.u32 2147483648, %v730_v58  ;;  %v740_v39 = vand.u32 2147483647, %v730_v58  ;;  %vm736_vm15 = vweird.f32 %v730_v58 }
 0x19a   :  { %2274 = vrcp.f32 %v749_v26  ;;  %v761_v35 = vand.u32 2147483648, %v749_v26  ;;  %v759_v45 = vand.u32 2147483647, %v749_v26  ;;  %vm755_vm0 = vweird.f32 %v749_v26 }
 0x19b   :  { %v743_v37 = vor.u32 1.1754944e-38, %v742_v28  ;;  %vm741_vm3 = vcmp.eq.f32.partialorder %v740_v39, 8.507059e+37  ;;  %v3076_v28 = vld [vmem:[#allocation11 + $0x1a8] sm:$0xff]  ;;  %v3086_v39 = vld [vmem:[#allocation11 + $0x180] sm:$0xff] }
 0x19c   :  { %v762_v25 = vor.u32 1.1754944e-38, %v761_v35  ;;  %vm760_vm4 = vcmp.eq.f32.partialorder %v759_v45, 8.507059e+37  ;;  %v3078_v35 = vld [vmem:[#allocation11 + $0x1b0] sm:$0xff] }
 0x19d   :  { %v2271_v32 = vpop.eup %2270  ;;  %v3090_v45 = vld [vmem:[#allocation11 + $0x190] sm:$0xff] }
 0x19e   :  { %v769_v33 = vadd.f32 1.0, %v2271_v32  ;;  %3815 = vst [vmem:[#allocation44_spill] sm:$0xff] %v3090_v45 }
 0x19f   :  { %v2273_v4 = vpop.eup %2272 }
 0x1a0   :  { %v2275_v13 = vpop.eup %2274  ;;  %v732_v15 = vmul.f32 %v2273_v4, %v730_v58  ;;  %2276 = vrcp.f32 %v769_v33  ;;  %vm737_vm13 = vweird.f32 %v2273_v4  ;;  %v781_v10 = vand.u32 2147483648, %v769_v33 }
 0x1a1   :  { %v751_v17 = vmul.f32 %v2275_v13, %v749_v26  ;;  %2278 = vtanh.f32 %v725_v5  ;;  %vm756_vm14 = vweird.f32 %v2275_v13  ;;  %vm738_vm1 = vmor %vm736_vm15, %vm737_vm13  ;;  %vm775_vm6 = vweird.f32 %v769_v33  ;;  %v3054_v5 = vld [vmem:[#allocation11 + $0x1f0] sm:$0xff] }
 0x1a2   :  { %v733_v22 = vsub.f32 1.0, %v732_v15  ;;  %vm757_vm2 = vmor %vm755_vm0, %vm756_vm14  ;;  %v779_v11 = vand.u32 2147483647, %v769_v33  ;;  %v782_v58 = vor.u32 1.1754944e-38, %v781_v10  ;;  %1123 = vmatpush.msrb.mxu2 %v3054_v5  ;;  %v3064_v15 = vld [vmem:[#allocation11 + $0x1c8] sm:$0xff]  ;;  %v3142_v10 = vld [vmem:[#allocation11 + $0x118] sm:$0xff] }
 0x1a3   :  { %v752_v38 = vsub.f32 1.0, %v751_v17  ;;  %v3066_v17 = vld [vmem:[#allocation11 + $0x1d0] sm:$0xff] }
 0x1a4   :  { %v734_v36 = vmul.f32 %v2273_v4, %v733_v22  ;;  %vm780_vm8 = vcmp.eq.f32.partialorder %v779_v11, 8.507059e+37  ;;  %3812 = vst [vmem:[#allocation41_spill] sm:$0xff] %v3066_v17  ;;  %v3070_v22 = vld [vmem:[#allocation11 + $0x1d8] sm:$0xff]  ;;  %1124 = vmatpush.msrb.mxu2 %v3066_v17  ;;  %v3146_v11 = vld [vmem:[#allocation11 + $0xe0] sm:$0xff] }
 0x1a5   :  { %v753_v14 = vmul.f32 %v2275_v13, %v752_v38  ;;  %3813 = vst [vmem:[#allocation42_spill] sm:$0xff] %v3070_v22  ;;  %v3074_v38 = vld [vmem:[#allocation11 + $0x1a0] sm:$0xff] }
 0x1a6   :  { %v2277_v40 = vpop.eup %2276  ;;  %v735_v48 = vadd.f32 %v2273_v4, %v734_v36  ;;  %v3082_v36 = vld [vmem:[#allocation11 + $0x1b8] sm:$0xff]  ;;  %1125 = vmatpush.msrb.mxu2 %v3078_v35 }
 0x1a7   :  { %v754_v49 = vadd.f32 %v2275_v13, %v753_v14  ;;  %v771_v23 = vmul.f32 %v2277_v40, %v769_v33  ;;  %v2279_v54 = vpop.eup %2278  ;;  %vm776_vm5 = vweird.f32 %v2277_v40  ;;  %v3058_v33 = vld [vmem:[#allocation11 + $0x1f8] sm:$0xff]  ;;  %v3088_v14 = vld [vmem:[#allocation11 + $0x188] sm:$0xff] }
 0x1a8   :  { %v739_v52 = vsel %vm738_vm1, %v2273_v4, %v735_v48  ;;  %vm777_vm7 = vmor %vm775_vm6, %vm776_vm5  ;;  %v3052_v4 = vld [vmem:[#allocation11 + $0x1e8] sm:$0xff]  ;;  %3810 = vst [vmem:[#allocation39_spill] sm:$0xff] %v3058_v33  ;;  %1143 = vmatpush.msrb.mxu3 %v3058_v33  ;;  %1126 = vmatpush.msrb.mxu2 %v3090_v45  ;;  %v3098_v48 = vld [vmem:[#allocation11 + $0x160] sm:$0xff] }
 0x1a9   :  { %v744_v55 = vsel %vm741_vm3, %v743_v37, %v739_v52  ;;  %v758_v59 = vsel %vm757_vm2, %v2275_v13, %v754_v49  ;;  %v772_v61 = vsub.f32 1.0, %v771_v23  ;;  %1103 = vmatpush.msrb.mxu1 %v3052_v4  ;;  %v3062_v13 = vld [vmem:[#allocation11 + $0x1c0] sm:$0xff]  ;;  %3814 = vst [vmem:[#allocation43_spill] sm:$0xff] %v3088_v14  ;;  %v3100_v37 = vld [vmem:[#allocation11 + $0x168] sm:$0xff]  ;;  %v3102_v49 = vld [vmem:[#allocation11 + $0x170] sm:$0xff] }
 0x1aa   :  { %v763_v62 = vsel %vm760_vm4, %v762_v25, %v758_v59  ;;  %v786_v1 = vmul.f32 %v2279_v54, %v744_v55  ;;  %3811 = vst [vmem:[#allocation40_spill] sm:$0xff] %v3062_v13  ;;  %1144 = vmatpush.msrb.mxu3 %v3070_v22  ;;  %v3106_v23 = vld [vmem:[#allocation11 + $0x178] sm:$0xff]  ;;  %1127 = vmatpush.msrb.mxu2 %v3102_v49  ;;  %v3110_v25 = vld [vmem:[#allocation11 + $0x140] sm:$0xff]  ;;  %v3112_v52 = vld [vmem:[#allocation11 + $0x148] sm:$0xff] }
 0x1ab   :  { %v785_v27 = vmul.f32 %v763_v62, %v3036_v43  ;;  %v773_v34 = vmul.f32 %v2277_v40, %v772_v61  ;;  %v3050_v43 = vld [vmem:[#allocation11 + $0x1e0] sm:$0xff]  ;;  %1104 = vmatpush.msrb.mxu1 %v3064_v15  ;;  %3817 = vst [vmem:[#allocation46_spill] sm:$0xff] %v3098_v48  ;;  %v3114_v54 = vld [vmem:[#allocation11 + $0x150] sm:$0xff]  ;;  %v3118_v55 = vld [vmem:[#allocation11 + $0x158] sm:$0xff] }
 0x1ac   :  { %1083 = vmatpush.msra.mxu0 %v3050_v43  ;;  %1145 = vmatpush.msrb.mxu3 %v3082_v36  ;;  %3818 = vst [vmem:[#allocation47_spill] sm:$0xff] %v3112_v52  ;;  %v3122_v59 = vld [vmem:[#allocation11 + $0x120] sm:$0xff]  ;;  %v3124_v61 = vld [vmem:[#allocation11 + $0x128] sm:$0xff]  ;;  %v3126_v62 = vld [vmem:[#allocation11 + $0x130] sm:$0xff] }
 0x1ad   :  { %v3047_v6 = vadd.f32 %v786_v1, %v785_v27  ;;  %v774_v7 = vadd.f32 %v2277_v40, %v773_v34  ;;  %1105 = vmatpush.msrb.mxu1 %v3076_v28  ;;  %1128 = vmatpush.msrb.mxu2 %v3114_v54  ;;  %3819 = vst [vmem:[#allocation48_spill] sm:$0xff] %v3122_v59  ;;  %v3130_v1 = vld [vmem:[#allocation11 + $0x138] sm:$0xff]  ;;  %v3134_v27 = vld [vmem:[#allocation11 + $0x100] sm:$0xff]  ;;  %v3136_v34 = vld [vmem:[#allocation11 + $0x108] sm:$0xff] }
 0x1ae   :  { %1084 = vmatpush.msra.mxu0 %v3062_v13  ;;  %3820 = vst [vmem:[#allocation49_spill] sm:$0xff] %v3130_v1 }
 0x1af   :  { %2280 = vtanh.f32 %v3047_v6  ;;  %v778_v12 = vsel %vm777_vm7, %v2277_v40, %v774_v7  ;;  %1106 = vmatpush.msrb.mxu1 %v3088_v14  ;;  %v3094_v40 = vld [vmem:[#allocation11 + $0x198] sm:$0xff]  ;;  %1129 = vmatpush.msrb.mxu2 %v3126_v62  ;;  %3821 = vst [vmem:[#allocation50_spill] sm:$0xff] %v3134_v27  ;;  %v3138_v7 = vld [vmem:[#allocation11 + $0x110] sm:$0xff] }
 0x1b0   :  { %v783_v24 = vsel %vm780_vm8, %v782_v58, %v778_v12  ;;  %1085 = vmatpush.msra.mxu0 %v3074_v38  ;;  %3816 = vst [vmem:[#allocation45_spill] sm:$0xff] %v3094_v40  ;;  %1146 = vmatpush.msrb.mxu3 %v3094_v40  ;;  %v3148_v12 = vld [vmem:[#allocation11 + $0xe8] sm:$0xff]  ;;  %v3150_v58 = vld [vmem:[#allocation11 + $0xf0] sm:$0xff] }
 0x1b1   :  { %1107 = vmatpush.msrb.mxu1 %v3100_v37  ;;  %3822 = vst [vmem:[#allocation51_spill] sm:$0xff] %v3136_v34  ;;  %1130 = vmatpush.msrb.mxu2 %v3138_v7 }
 0x1b2   :  { %1086 = vmatpush.msra.mxu0 %v3086_v39  ;;  %1147 = vmatpush.msrb.mxu3 %v3106_v23 }
 0x1b3   :  { %1108 = vmatpush.msrb.mxu1 %v3112_v52  ;;  %1131 = vmatpush.msrb.mxu2 %v3150_v58 }
 0x1b4   :  { %1087 = vmatpush.msra.mxu0 %v3098_v48  ;;  %1148 = vmatpush.msrb.mxu3 %v3118_v55 }
 0x1b5   :  { %v2281_v26 = vpop.eup %2280  ;;  %1109 = vmatpush.msrb.mxu1 %v3124_v61  ;;  %1132 = vmatpush.msrb.mxu2 %v3162_v19 }
 0x1b6   :  { %v789_v32 = vmul.f32 %v2281_v26, %v783_v24  ;;  %1088 = vmatpush.msra.mxu0 %v3110_v25  ;;  %1149 = vmatpush.msrb.mxu3 %v3130_v1  ;;  %v3154_v26 = vld [vmem:[#allocation11 + $0xf8] sm:$0xff]  ;;  %v3158_v24 = vld [vmem:[#allocation11 + $0xc0] sm:$0xff] }
 0x1b7   :  { %1110 = vmatpush.msrb.mxu1 %v3136_v34  ;;  %1133 = vmatpush.msrb.mxu2 %v3176_v8 }
 0x1b8   :  { %879 = vmatmul.f32.vlgmr.msrb.gmra.mxu0 %v789_v32  ;;  %899 = vmatmul.f32.vlgmr.msra.gmra.mxu1 %v789_v32 }
 0x1b9   :  { %919 = vmatmul.f32.vlgmr.msra.gmra.mxu2 %v789_v32  ;;  %939 = vmatmul.f32.vlgmr.msra.gmra.mxu3 %v789_v32  ;;  %v3160_v32 = vld [vmem:[#allocation11 + $0xc8] sm:$0xff] }
 0x1ba   :  { %1089 = vmatpush.msra.mxu0 %v3122_v59  ;;  %1150 = vmatpush.msrb.mxu3 %v3142_v10 }
 0x1bb   :  { %1111 = vmatpush.msrb.mxu1 %v3148_v12 }
 0x1bc   :  { %1090 = vmatpush.msra.mxu0 %v3134_v27  ;;  %1151 = vmatpush.msrb.mxu3 %v3154_v26 }
 0x1bd   :  { %1112 = vmatpush.msrb.mxu1 %v3160_v32 }
 0x1be   :  { %1091 = vmatpush.msra.mxu0 %v3146_v11  ;;  %1152 = vmatpush.msrb.mxu3 %v3166_v21 }
 0x1bf   :  { %1113 = vmatpush.msrb.mxu1 %v3174_v20 }
 0x1c0   :  { %1092 = vmatpush.msra.mxu0 %v3158_v24  ;;  %1153 = vmatpush.msrb.mxu3 %v3180_v18 }
 0x1c2   :  { %1093 = vmatpush.msra.mxu0 %v3172_v44  ;;  %1154 = vmatpush.msrb.mxu3 %v3192_v16 }
 0x1c4   :  { %1155 = vmatpush.msrb.mxu3 %v3202_v63  ;;  %v3229_v63 = vld [vmem:[#allocation11 + $0x8] sm:$0xff] }
 0x1c6   :  { %1156 = vmatpush.msrb.mxu3 %v3214_v56 }
 0x235   :  { %v880_v29 = vpop.f32.mrf.mxu0  ;;  %v900_v9 = vpop.f32.mrf.mxu1 }
 0x236   :  { %v943_v3 = vadd.f32 %v880_v29, %v2976_v30  ;;  %v944_v31 = vadd.f32 %v900_v9, %v2989_v42  ;;  %v3184_v42 = vld [vmem:[#allocation11 + $0x80] sm:$0xff]  ;;  %v3186_v9 = vld [vmem:[#allocation11 + $0x88] sm:$0xff]  ;;  %v3190_v29 = vld [vmem:[#allocation11 + $0x90] sm:$0xff] }
 0x237   :  { %1094 = vmatpush.msra.mxu0 %v3184_v42  ;;  %1114 = vmatpush.msrb.mxu1 %v3186_v9 }
 0x238   :  { %v2214_v0 = vmul.f32 -1.442695, %v943_v3  ;;  %v2215_v30 = vmul.f32 -1.442695, %v944_v31  ;;  %1134 = vmatpush.msrb.mxu2 %v3190_v29  ;;  %v3198_v3 = vld [vmem:[#allocation11 + $0x68] sm:$0xff]  ;;  %v3200_v31 = vld [vmem:[#allocation11 + $0x70] sm:$0xff] }
 0x239   :  { %3824 = vst [vmem:[#allocation53_spill] sm:$0xff] %v3198_v3  ;;  %1095 = vmatpush.msra.mxu0 %v3194_v60  ;;  %1115 = vmatpush.msrb.mxu1 %v3198_v3  ;;  %v3223_v3 = vld [vmem:[#allocation11 + $0x30] sm:$0xff]  ;;  %v3225_v60 = vld [vmem:[#allocation11 + $0x38] sm:$0xff] }
 0x23a   :  { %2282 = vpow2.f32 %v2214_v0  ;;  %3825 = vst [vmem:[#allocation54_spill] sm:$0xff] %v3200_v31  ;;  %v3210_v0 = vld [vmem:[#allocation11 + $0x50] sm:$0xff]  ;;  %1135 = vmatpush.msrb.mxu2 %v3200_v31  ;;  %1157 = vmatpush.msrb.mxu3 %v3225_v60 }
 0x23b   :  { %2284 = vpow2.f32 %v2215_v30  ;;  %3829 = vst [vmem:[#allocation58_spill] sm:$0xff] %v3210_v0  ;;  %v3218_v30 = vld [vmem:[#allocation11 + $0x28] sm:$0xff]  ;;  %1096 = vmatpush.msra.mxu0 %v3206_v57  ;;  %1116 = vmatpush.msrb.mxu1 %v3208_v51 }
 0x23c   :  { %v940_v53 = vpop.f32.mrf.mxu3  ;;  %1136 = vmatpush.msrb.mxu2 %v3210_v0 }
 0x23d   :  { %v946_v41 = vadd.f32 %v940_v53, %v2994_v47  ;;  %1097 = vmatpush.msra.mxu0 %v3216_v50  ;;  %1117 = vmatpush.msrb.mxu1 %v3218_v30  ;;  %v3233_v47 = vld [vmem:[#allocation11 + $0x10] sm:$0xff]  ;;  %v3235_v53 = vld [vmem:[#allocation11 + $0x18] sm:$0xff] }
 0x23e   :  { %1137 = vmatpush.msrb.mxu2 %v3223_v3  ;;  %1158 = vmatpush.msrb.mxu3 %v3235_v53 }
 0x23f   :  { %v2216_v31 = vmul.f32 -1.442695, %v946_v41  ;;  %1098 = vmatpush.msra.mxu0 %v3041_v2  ;;  %1118 = vmatpush.msrb.mxu1 %v3229_v63 }
 0x240   :  { %v2283_v51 = vpop.eup %2282  ;;  %1138 = vmatpush.msrb.mxu2 %v3233_v47  ;;  %1363 = vmatpush.msra.mxu3 %v3058_v33 }
 0x241   :  { %v2285_v57 = vpop.eup %2284  ;;  %v3239_v0 = vadd.f32 1.0, %v2283_v51  ;;  %2286 = vpow2.f32 %v2216_v31  ;;  %1303 = vmatpush.msrb.mxu0 %v3050_v43  ;;  %1323 = vmatpush.msra.mxu1 %v3052_v4  ;;  %v920_v51 = vpop.f32.mrf.mxu2 }
 0x242   :  { %v3243_v41 = vadd.f32 1.0, %v2285_v57  ;;  %1343 = vmatpush.msra.mxu2 %v3054_v5  ;;  %1364 = vmatpush.msra.mxu3 %v3070_v22 }
 0x243   :  { %2288 = vrcp.f32 %v3239_v0  ;;  %1304 = vmatpush.msrb.mxu0 %v3062_v13  ;;  %1324 = vmatpush.msra.mxu1 %v3064_v15  ;;  %v945_v13 = vadd.f32 %v920_v51, %v2992_v46  ;;  %vm956_vm11 = vweird.f32 %v3239_v0 }
 0x244   :  { %2290 = vrcp.f32 %v3243_v41  ;;  %1344 = vmatpush.msra.mxu2 %v3066_v17  ;;  %1365 = vmatpush.msra.mxu3 %v3082_v36  ;;  %vm975_vm12 = vweird.f32 %v3243_v41 }
 0x245   :  { %1305 = vmatpush.msrb.mxu0 %v3074_v38  ;;  %1325 = vmatpush.msra.mxu1 %v3076_v28 }
 0x246   :  { %1345 = vmatpush.msra.mxu2 %v3078_v35  ;;  %1366 = vmatpush.msra.mxu3 %v3094_v40  ;;  %v981_v40 = vand.u32 2147483648, %v3243_v41 }
 0x247   :  { %v2287_v57 = vpop.eup %2286  ;;  %1306 = vmatpush.msrb.mxu0 %v3086_v39  ;;  %1326 = vmatpush.msra.mxu1 %v3088_v14  ;;  %v962_v14 = vand.u32 2147483648, %v3239_v0 }
 0x248   :  { %v3259_v31 = vadd.f32 1.0, %v2287_v57  ;;  %1346 = vmatpush.msra.mxu2 %v3090_v45  ;;  %1367 = vmatpush.msra.mxu3 %v3106_v23 }
 0x249   :  { %v2289_v33 = vpop.eup %2288  ;;  %1307 = vmatpush.msrb.mxu0 %v3098_v48  ;;  %1327 = vmatpush.msra.mxu1 %v3100_v37  ;;  %v960_v48 = vand.u32 2147483647, %v3239_v0 }
 0x24a   :  { %v2291_v17 = vpop.eup %2290  ;;  %v952_v22 = vmul.f32 %v2289_v33, %v3239_v0  ;;  %2292 = vrcp.f32 %v3259_v31  ;;  %1347 = vmatpush.msra.mxu2 %v3102_v49  ;;  %vm957_vm9 = vweird.f32 %v2289_v33  ;;  %1368 = vmatpush.msra.mxu3 %v3118_v55  ;;  %vm995_vm2 = vweird.f32 %v3259_v31 }
 0x24b   :  { %v971_v57 = vmul.f32 %v2291_v17, %v3243_v41  ;;  %2294 = vtanh.f32 %v945_v13  ;;  %1308 = vmatpush.msrb.mxu0 %v3110_v25  ;;  %1328 = vmatpush.msra.mxu1 %v3112_v52  ;;  %vm976_vm10 = vweird.f32 %v2291_v17  ;;  %vm958_vm13 = vmor %vm956_vm11, %vm957_vm9  ;;  %vm961_vm15 = vcmp.eq.f32.partialorder %v960_v48, 8.507059e+37 }
 0x24c   :  { %v953_v46 = vsub.f32 1.0, %v952_v22  ;;  %1348 = vmatpush.msra.mxu2 %v3114_v54  ;;  %1369 = vmatpush.msra.mxu3 %v3130_v1  ;;  %vm977_vm14 = vmor %vm975_vm12, %vm976_vm10 }
 0x24d   :  { %v972_v51 = vsub.f32 1.0, %v971_v57  ;;  %v979_v57 = vand.u32 2147483647, %v3243_v41  ;;  %1309 = vmatpush.msrb.mxu0 %v3122_v59  ;;  %1329 = vmatpush.msra.mxu1 %v3124_v61 }
 0x24e   :  { %v954_v45 = vmul.f32 %v2289_v33, %v953_v46  ;;  %1349 = vmatpush.msra.mxu2 %v3126_v62  ;;  %v963_v46 = vor.u32 1.1754944e-38, %v962_v14  ;;  %1370 = vmatpush.msra.mxu3 %v3142_v10 }
 0x24f   :  { %v973_v22 = vmul.f32 %v2291_v17, %v972_v51  ;;  %1310 = vmatpush.msrb.mxu0 %v3134_v27  ;;  %1330 = vmatpush.msra.mxu1 %v3136_v34  ;;  %vm980_vm0 = vcmp.eq.f32.partialorder %v979_v57, 8.507059e+37  ;;  %v3833_v57 = vld [vmem:[#allocation55_spill] sm:$0xff] }
 0x250   :  { %v3285_v13 = vpop.eup %2292  ;;  %v955_v52 = vadd.f32 %v2289_v33, %v954_v45  ;;  %v982_v45 = vor.u32 1.1754944e-38, %v981_v40  ;;  %1350 = vmatpush.msra.mxu2 %v3138_v7  ;;  %1371 = vmatpush.msra.mxu3 %v3154_v26 }
 0x251   :  { %v974_v51 = vadd.f32 %v2291_v17, %v973_v22  ;;  %v991_v59 = vmul.f32 %v3285_v13, %v3259_v31  ;;  %v2295_v41 = vpop.eup %2294  ;;  %1311 = vmatpush.msrb.mxu0 %v3146_v11  ;;  %1331 = vmatpush.msra.mxu1 %v3148_v12  ;;  %vm996_vm1 = vweird.f32 %v3285_v13 }
 0x252   :  { %v959_v0 = vsel %vm958_vm13, %v2289_v33, %v955_v52  ;;  %1351 = vmatpush.msra.mxu2 %v3150_v58  ;;  %1372 = vmatpush.msra.mxu3 %v3166_v21  ;;  %v999_v52 = vand.u32 2147483647, %v3259_v31  ;;  %vm997_vm3 = vmor %vm995_vm2, %vm996_vm1 }
 0x253   :  { %v964_v1 = vsel %vm961_vm15, %v963_v46, %v959_v0  ;;  %v978_v14 = vsel %vm977_vm14, %v2291_v17, %v974_v51  ;;  %v992_v22 = vsub.f32 1.0, %v991_v59  ;;  %1312 = vmatpush.msrb.mxu0 %v3158_v24  ;;  %1332 = vmatpush.msra.mxu1 %v3160_v32  ;;  %v3830_v59 = vld [vmem:[#allocation52_spill] sm:$0xff] }
 0x254   :  { %v983_v27 = vsel %vm980_vm0, %v982_v45, %v978_v14  ;;  %v1006_v34 = vmul.f32 %v2295_v41, %v964_v1  ;;  %1352 = vmatpush.msra.mxu2 %v3162_v19  ;;  %1373 = vmatpush.msra.mxu3 %v3180_v18  ;;  %v3831_v1 = vld [vmem:[#allocation53_spill] sm:$0xff]  ;;  %v3834_v51 = vld [vmem:[#allocation56_spill] sm:$0xff]  ;;  %vm1000_vm4 = vcmp.eq.f32.partialorder %v999_v52, 8.507059e+37  ;;  %v3837_v14 = vld [vmem:[#allocation39_spill] sm:$0xff] }
 0x255   :  { %v1005_v33 = vmul.f32 %v983_v27, %v3047_v6  ;;  %v993_v40 = vmul.f32 %v3285_v13, %v992_v22  ;;  %1313 = vmatpush.msrb.mxu0 %v3172_v44  ;;  %1333 = vmatpush.msra.mxu1 %v3174_v20  ;;  %v1001_v6 = vand.u32 2147483648, %v3259_v31  ;;  %v3835_v45 = vld [vmem:[#allocation57_spill] sm:$0xff]  ;;  %v3836_v31 = vld [vmem:[#allocation58_spill] sm:$0xff]  ;;  %v3838_v22 = vld [vmem:[#allocation40_spill] sm:$0xff] }
 0x256   :  { %1353 = vmatpush.msra.mxu2 %v3176_v8  ;;  %1374 = vmatpush.msra.mxu3 %v3192_v16 }
 0x257   :  { %v3309_v17 = vadd.f32 %v1006_v34, %v1005_v33  ;;  %v994_v48 = vadd.f32 %v3285_v13, %v993_v40  ;;  %1314 = vmatpush.msrb.mxu0 %v3184_v42  ;;  %1334 = vmatpush.msra.mxu1 %v3186_v9  ;;  %v3832_v34 = vld [vmem:[#allocation54_spill] sm:$0xff]  ;;  %v1002_v46 = vor.u32 1.1754944e-38, %v1001_v6 }
 0x258   :  { %1354 = vmatpush.msra.mxu2 %v3190_v29  ;;  %1375 = vmatpush.msra.mxu3 %v3833_v57  ;;  %v3840_v33 = vld [vmem:[#allocation42_spill] sm:$0xff] }
 0x259   :  { %2296 = vtanh.f32 %v3309_v17  ;;  %1315 = vmatpush.msrb.mxu0 %v3830_v59  ;;  %1335 = vmatpush.msra.mxu1 %v3831_v1  ;;  %v998_v27 = vsel %vm997_vm3, %v3285_v13, %v994_v48 }
 0x25a   :  { %1355 = vmatpush.msra.mxu2 %v3832_v34  ;;  %1376 = vmatpush.msra.mxu3 %v3214_v56  ;;  %v1003_v41 = vsel %vm1000_vm4, %v1002_v46, %v998_v27 }
 0x25b   :  { %1316 = vmatpush.msrb.mxu0 %v3834_v51  ;;  %1336 = vmatpush.msra.mxu1 %v3835_v45 }
 0x25c   :  { %1356 = vmatpush.msra.mxu2 %v3836_v31  ;;  %1377 = vmatpush.msra.mxu3 %v3225_v60 }
 0x25d   :  { %1317 = vmatpush.msrb.mxu0 %v3216_v50  ;;  %1337 = vmatpush.msra.mxu1 %v3218_v30 }
 0x25e   :  { %1357 = vmatpush.msra.mxu2 %v3223_v3  ;;  %1378 = vmatpush.msra.mxu3 %v3235_v53 }
 0x25f   :  { %v2297_v0 = vpop.eup %2296  ;;  %1318 = vmatpush.msrb.mxu0 %v3041_v2  ;;  %1338 = vmatpush.msra.mxu1 %v3229_v63  ;;  %v3839_v2 = vld [vmem:[#allocation41_spill] sm:$0xff] }
 0x260   :  { %v1009_v13 = vmul.f32 %v2297_v0, %v1003_v41  ;;  %1358 = vmatpush.msra.mxu2 %v3233_v47 }
 0x262   :  { %1099 = vmatmul.f32.vlgmr.msra.gmra.mxu0 %v1009_v13  ;;  %1119 = vmatmul.f32.vlgmr.msrb.gmra.mxu1 %v1009_v13 }
 0x263   :  { %1139 = vmatmul.f32.vlgmr.msrb.gmra.mxu2 %v1009_v13  ;;  %1159 = vmatmul.f32.vlgmr.msrb.gmra.mxu3 %v1009_v13 }
 0x264   :  { %1523 = vmatpush.msra.mxu0 %v3050_v43  ;;  %1543 = vmatpush.msrb.mxu1 %v3052_v4  ;;  %v3841_v43 = vld [vmem:[#allocation43_spill] sm:$0xff]  ;;  %v3842_v4 = vld [vmem:[#allocation44_spill] sm:$0xff] }
 0x265   :  { %1563 = vmatpush.msrb.mxu2 %v3054_v5  ;;  %1583 = vmatpush.msrb.mxu3 %v3837_v14  ;;  %v3843_v5 = vld [vmem:[#allocation45_spill] sm:$0xff] }
 0x266   :  { %1524 = vmatpush.msra.mxu0 %v3838_v22  ;;  %1544 = vmatpush.msrb.mxu1 %v3064_v15  ;;  %v3844_v15 = vld [vmem:[#allocation46_spill] sm:$0xff] }
 0x267   :  { %1564 = vmatpush.msrb.mxu2 %v3839_v2  ;;  %1584 = vmatpush.msrb.mxu3 %v3840_v33 }
 0x268   :  { %1525 = vmatpush.msra.mxu0 %v3074_v38  ;;  %1545 = vmatpush.msrb.mxu1 %v3076_v28  ;;  %v3845_v38 = vld [vmem:[#allocation47_spill] sm:$0xff]  ;;  %v3846_v28 = vld [vmem:[#allocation48_spill] sm:$0xff] }
 0x269   :  { %1565 = vmatpush.msrb.mxu2 %v3078_v35  ;;  %1585 = vmatpush.msrb.mxu3 %v3082_v36  ;;  %v3847_v35 = vld [vmem:[#allocation49_spill] sm:$0xff]  ;;  %v3848_v36 = vld [vmem:[#allocation50_spill] sm:$0xff] }
 0x26a   :  { %1526 = vmatpush.msra.mxu0 %v3086_v39  ;;  %1546 = vmatpush.msrb.mxu1 %v3841_v43  ;;  %v3849_v39 = vld [vmem:[#allocation51_spill] sm:$0xff] }
 0x26b   :  { %1566 = vmatpush.msrb.mxu2 %v3842_v4  ;;  %1586 = vmatpush.msrb.mxu3 %v3843_v5 }
 0x26c   :  { %1527 = vmatpush.msra.mxu0 %v3844_v15  ;;  %1547 = vmatpush.msrb.mxu1 %v3100_v37  ;;  %v3852_v37 = vld [vmem:[#allocation26_spill] sm:$0xff] }
 0x26d   :  { %1567 = vmatpush.msrb.mxu2 %v3102_v49  ;;  %1587 = vmatpush.msrb.mxu3 %v3106_v23 }
 0x26e   :  { %1528 = vmatpush.msra.mxu0 %v3110_v25  ;;  %1548 = vmatpush.msrb.mxu1 %v3845_v38  ;;  %v3854_v38 = vld [vmem:[#allocation24_spill] sm:$0xff] }
 0x26f   :  { %1568 = vmatpush.msrb.mxu2 %v3114_v54  ;;  %1588 = vmatpush.msrb.mxu3 %v3118_v55 }
 0x270   :  { %1529 = vmatpush.msra.mxu0 %v3846_v28  ;;  %1549 = vmatpush.msrb.mxu1 %v3124_v61 }
 0x271   :  { %1569 = vmatpush.msrb.mxu2 %v3126_v62  ;;  %1589 = vmatpush.msrb.mxu3 %v3847_v35  ;;  %v3855_v35 = vld [vmem:[#allocation27_spill] sm:$0xff] }
 0x272   :  { %1530 = vmatpush.msra.mxu0 %v3848_v36  ;;  %1550 = vmatpush.msrb.mxu1 %v3849_v39 }
 0x273   :  { %1570 = vmatpush.msrb.mxu2 %v3138_v7  ;;  %1590 = vmatpush.msrb.mxu3 %v3142_v10  ;;  %v3853_v10 = vld [vmem:[#allocation25_spill] sm:$0xff] }
 0x274   :  { %1531 = vmatpush.msra.mxu0 %v3146_v11  ;;  %1551 = vmatpush.msrb.mxu1 %v3148_v12 }
 0x275   :  { %1571 = vmatpush.msrb.mxu2 %v3150_v58  ;;  %1591 = vmatpush.msrb.mxu3 %v3154_v26 }
 0x276   :  { %1532 = vmatpush.msra.mxu0 %v3158_v24  ;;  %1552 = vmatpush.msrb.mxu1 %v3160_v32 }
 0x277   :  { %1572 = vmatpush.msrb.mxu2 %v3162_v19  ;;  %1592 = vmatpush.msrb.mxu3 %v3166_v21  ;;  %v3850_v21 = vld [vmem:[#allocation22_spill] sm:$0xff] }
 0x278   :  { %1533 = vmatpush.msra.mxu0 %v3172_v44  ;;  %1553 = vmatpush.msrb.mxu1 %v3174_v20 }
 0x279   :  { %1573 = vmatpush.msrb.mxu2 %v3176_v8  ;;  %1593 = vmatpush.msrb.mxu3 %v3180_v18  ;;  %v3851_v18 = vld [vmem:[#allocation23_spill] sm:$0xff] }
 0x27a   :  { %1534 = vmatpush.msra.mxu0 %v3184_v42  ;;  %1554 = vmatpush.msrb.mxu1 %v3186_v9 }
 0x27b   :  { %1574 = vmatpush.msrb.mxu2 %v3190_v29  ;;  %1594 = vmatpush.msrb.mxu3 %v3192_v16 }
 0x27c   :  { %1535 = vmatpush.msra.mxu0 %v3830_v59  ;;  %1555 = vmatpush.msrb.mxu1 %v3831_v1 }
 0x27d   :  { %1575 = vmatpush.msrb.mxu2 %v3832_v34  ;;  %1595 = vmatpush.msrb.mxu3 %v3833_v57 }
 0x27e   :  { %1536 = vmatpush.msra.mxu0 %v3834_v51  ;;  %1556 = vmatpush.msrb.mxu1 %v3835_v45 }
 0x27f   :  { %1576 = vmatpush.msrb.mxu2 %v3836_v31  ;;  %1596 = vmatpush.msrb.mxu3 %v3214_v56 }
 0x280   :  { %1537 = vmatpush.msra.mxu0 %v3216_v50  ;;  %1557 = vmatpush.msrb.mxu1 %v3218_v30 }
 0x281   :  { %1577 = vmatpush.msrb.mxu2 %v3223_v3  ;;  %1597 = vmatpush.msrb.mxu3 %v3225_v60 }
 0x282   :  { %1558 = vmatpush.msrb.mxu1 %v3229_v63 }
 0x283   :  { %1578 = vmatpush.msrb.mxu2 %v3233_v47  ;;  %1598 = vmatpush.msrb.mxu3 %v3235_v53 }
 0x2df   :  { %v1100_v16 = vpop.f32.mrf.mxu0  ;;  %v1120_v20 = vpop.f32.mrf.mxu1 }
 0x2e0   :  { %v1163_v8 = vadd.f32 %v1100_v16, %v3850_v21  ;;  %v1164_v56 = vadd.f32 %v1120_v20, %v3851_v18  ;;  %v3415_v20 = vld [vmem:[#allocation11] sm:$0xff] }
 0x2e1   :  { %1538 = vmatpush.msra.mxu0 %v3415_v20 }
 0x2e2   :  { %v2217_v44 = vmul.f32 -1.442695, %v1163_v8  ;;  %v2218_v50 = vmul.f32 -1.442695, %v1164_v56  ;;  %v3856_v8 = vld [vmem:[#allocation29_spill] sm:$0xff] }
 0x2e4   :  { %2298 = vpow2.f32 %v2217_v44 }
 0x2e5   :  { %2300 = vpow2.f32 %v2218_v50 }
 0x2e6   :  { %v1160_v19 = vpop.f32.mrf.mxu3  ;;  %v1140_v55 = vpop.f32.mrf.mxu2 }
 0x2e7   :  { %v1166_v49 = vadd.f32 %v1160_v19, %v3852_v37  ;;  %v1165_v11 = vadd.f32 %v1140_v55, %v3853_v10 }
 0x2e9   :  { %v2219_v60 = vmul.f32 -1.442695, %v1166_v49 }
 0x2ea   :  { %v2299_v23 = vpop.eup %2298 }
 0x2eb   :  { %v2301_v63 = vpop.eup %2300  ;;  %v1170_v25 = vadd.f32 1.0, %v2299_v23  ;;  %2302 = vpow2.f32 %v2219_v60 }
 0x2ec   :  { %v1189_v54 = vadd.f32 1.0, %v2301_v63 }
 0x2ed   :  { %2304 = vrcp.f32 %v1170_v25  ;;  %v1182_v42 = vand.u32 2147483648, %v1170_v25  ;;  %v1180_v3 = vand.u32 2147483647, %v1170_v25  ;;  %vm1176_vm7 = vweird.f32 %v1170_v25 }
 0x2ee   :  { %2306 = vrcp.f32 %v1189_v54  ;;  %v1201_v9 = vand.u32 2147483648, %v1189_v54  ;;  %v1199_v47 = vand.u32 2147483647, %v1189_v54  ;;  %vm1195_vm8 = vweird.f32 %v1189_v54 }
 0x2ef   :  { %v1183_v48 = vor.u32 1.1754944e-38, %v1182_v42  ;;  %vm1181_vm11 = vcmp.eq.f32.partialorder %v1180_v3, 8.507059e+37 }
 0x2f0   :  { %v1202_v59 = vor.u32 1.1754944e-38, %v1201_v9  ;;  %vm1200_vm12 = vcmp.eq.f32.partialorder %v1199_v47, 8.507059e+37 }
 0x2f1   :  { %v2303_v61 = vpop.eup %2302 }
 0x2f2   :  { %v1209_v62 = vadd.f32 1.0, %v2303_v61 }
 0x2f3   :  { %v2305_v7 = vpop.eup %2304 }
 0x2f4   :  { %v2307_v12 = vpop.eup %2306  ;;  %v1172_v58 = vmul.f32 %v2305_v7, %v1170_v25  ;;  %2308 = vrcp.f32 %v1209_v62  ;;  %vm1177_vm5 = vweird.f32 %v2305_v7  ;;  %v1221_v14 = vand.u32 2147483648, %v1209_v62  ;;  %v3857_v25 = vld [vmem:[#allocation28_spill] sm:$0xff] }
 0x2f5   :  { %v1191_v26 = vmul.f32 %v2307_v12, %v1189_v54  ;;  %2310 = vtanh.f32 %v1165_v11  ;;  %vm1196_vm6 = vweird.f32 %v2307_v12  ;;  %vm1178_vm9 = vmor %vm1176_vm7, %vm1177_vm5  ;;  %vm1215_vm14 = vweird.f32 %v1209_v62 }
 0x2f6   :  { %v1173_v24 = vsub.f32 1.0, %v1172_v58  ;;  %vm1197_vm10 = vmor %vm1195_vm8, %vm1196_vm6  ;;  %v1219_v22 = vand.u32 2147483647, %v1209_v62  ;;  %v1222_v33 = vor.u32 1.1754944e-38, %v1221_v14 }
 0x2f7   :  { %v1192_v32 = vsub.f32 1.0, %v1191_v26 }
 0x2f8   :  { %v1174_v29 = vmul.f32 %v2305_v7, %v1173_v24  ;;  %vm1220_vm0 = vcmp.eq.f32.partialorder %v1219_v22, 8.507059e+37 }
 0x2f9   :  { %v1193_v30 = vmul.f32 %v2307_v12, %v1192_v32 }
 0x2fa   :  { %v2309_v53 = vpop.eup %2308  ;;  %v1175_v40 = vadd.f32 %v2305_v7, %v1174_v29 }
 0x2fb   :  { %v1194_v6 = vadd.f32 %v2307_v12, %v1193_v30  ;;  %v1211_v52 = vmul.f32 %v2309_v53, %v1209_v62  ;;  %v2311_v27 = vpop.eup %2310  ;;  %vm1216_vm13 = vweird.f32 %v2309_v53 }
 0x2fc   :  { %v1179_v1 = vsel %vm1178_vm9, %v2305_v7, %v1175_v40  ;;  %vm1217_vm15 = vmor %vm1215_vm14, %vm1216_vm13 }
 0x2fd   :  { %v1184_v34 = vsel %vm1181_vm11, %v1183_v48, %v1179_v1  ;;  %v1198_v57 = vsel %vm1197_vm10, %v2307_v12, %v1194_v6  ;;  %v1212_v46 = vsub.f32 1.0, %v1211_v52 }
 0x2fe   :  { %v1203_v51 = vsel %vm1200_vm12, %v1202_v59, %v1198_v57  ;;  %v1226_v45 = vmul.f32 %v2311_v27, %v1184_v34 }
 0x2ff   :  { %v1225_v31 = vmul.f32 %v1203_v51, %v3309_v17  ;;  %v1213_v0 = vmul.f32 %v2309_v53, %v1212_v46 }
 0x301   :  { %v3410_v41 = vadd.f32 %v1226_v45, %v1225_v31  ;;  %v1214_v13 = vadd.f32 %v2309_v53, %v1213_v0 }
 0x303   :  { %2312 = vtanh.f32 %v3410_v41  ;;  %v1218_v2 = vsel %vm1217_vm15, %v2309_v53, %v1214_v13 }
 0x304   :  { %v1223_v4 = vsel %vm1220_vm0, %v1222_v33, %v1218_v2  ;;  %v3426_v2 = vld [vmem:[#allocation11 + $0x1e8] sm:$0xff]  ;;  %v3428_v33 = vld [vmem:[#allocation11 + $0x1f0] sm:$0xff] }
 0x309   :  { %v2313_v43 = vpop.eup %2312 }
 0x30a   :  { %v1229_v5 = vmul.f32 %v2313_v43, %v1223_v4  ;;  %v3432_v43 = vld [vmem:[#allocation11 + $0x1f8] sm:$0xff]  ;;  %v3436_v4 = vld [vmem:[#allocation11 + $0x1c0] sm:$0xff] }
 0x30c   :  { %1319 = vmatmul.f32.vlgmr.msrb.gmra.mxu0 %v1229_v5  ;;  %1339 = vmatmul.f32.vlgmr.msra.gmra.mxu1 %v1229_v5 }
 0x30d   :  { %1359 = vmatmul.f32.vlgmr.msra.gmra.mxu2 %v1229_v5  ;;  %1379 = vmatmul.f32.vlgmr.msra.gmra.mxu3 %v1229_v5  ;;  %v3438_v5 = vld [vmem:[#allocation11 + $0x1c8] sm:$0xff] }
 0x30e   :  { %1763 = vmatpush.msra.mxu1 %v3426_v2  ;;  %1783 = vmatpush.msra.mxu2 %v3428_v33 }
 0x30f   :  { %1803 = vmatpush.msra.mxu3 %v3432_v43 }
 0x310   :  { %1764 = vmatpush.msra.mxu1 %v3438_v5 }
 0x389   :  { %v1320_v17 = vpop.f32.mrf.mxu0  ;;  %v1340_v15 = vpop.f32.mrf.mxu1 }
 0x38a   :  { %v1383_v28 = vadd.f32 %v1320_v17, %v3854_v38  ;;  %v1384_v36 = vadd.f32 %v1340_v15, %v3855_v35  ;;  %v3440_v17 = vld [vmem:[#allocation11 + $0x1d0] sm:$0xff]  ;;  %v3444_v15 = vld [vmem:[#allocation11 + $0x1d8] sm:$0xff]  ;;  %v3448_v38 = vld [vmem:[#allocation11 + $0x1a0] sm:$0xff] }
 0x38b   :  { %1784 = vmatpush.msra.mxu2 %v3440_v17  ;;  %1804 = vmatpush.msra.mxu3 %v3444_v15  ;;  %v3452_v35 = vld [vmem:[#allocation11 + $0x1b0] sm:$0xff] }
 0x38c   :  { %v2220_v39 = vmul.f32 -1.442695, %v1383_v28  ;;  %v2221_v16 = vmul.f32 -1.442695, %v1384_v36  ;;  %v3450_v28 = vld [vmem:[#allocation11 + $0x1a8] sm:$0xff]  ;;  %v3456_v36 = vld [vmem:[#allocation11 + $0x1b8] sm:$0xff] }
 0x38d   :  { %1765 = vmatpush.msra.mxu1 %v3450_v28  ;;  %1785 = vmatpush.msra.mxu2 %v3452_v35 }
 0x38e   :  { %2314 = vpow2.f32 %v2220_v39  ;;  %1805 = vmatpush.msra.mxu3 %v3456_v36  ;;  %v3460_v39 = vld [vmem:[#allocation11 + $0x180] sm:$0xff] }
 0x38f   :  { %2316 = vpow2.f32 %v2221_v16  ;;  %v3462_v16 = vld [vmem:[#allocation11 + $0x188] sm:$0xff] }
 0x390   :  { %v1380_v21 = vpop.f32.mrf.mxu3  ;;  %v1360_v49 = vpop.f32.mrf.mxu2  ;;  %1766 = vmatpush.msra.mxu1 %v3462_v16 }
 0x391   :  { %v1386_v18 = vadd.f32 %v1380_v21, %v3856_v8  ;;  %v1385_v54 = vadd.f32 %v1360_v49, %v3857_v25  ;;  %v3464_v21 = vld [vmem:[#allocation11 + $0x190] sm:$0xff]  ;;  %v3468_v8 = vld [vmem:[#allocation11 + $0x198] sm:$0xff] }
 0x392   :  { %1786 = vmatpush.msra.mxu2 %v3464_v21  ;;  %1806 = vmatpush.msra.mxu3 %v3468_v8  ;;  %v3488_v49 = vld [vmem:[#allocation11 + $0x150] sm:$0xff] }
 0x393   :  { %v2222_v56 = vmul.f32 -1.442695, %v1386_v18  ;;  %v3472_v18 = vld [vmem:[#allocation11 + $0x160] sm:$0xff]  ;;  %v3500_v25 = vld [vmem:[#allocation11 + $0x130] sm:$0xff] }
 0x394   :  { %v2315_v44 = vpop.eup %2314 }
 0x395   :  { %v2317_v50 = vpop.eup %2316  ;;  %v1390_v19 = vadd.f32 1.0, %v2315_v44  ;;  %2318 = vpow2.f32 %v2222_v56  ;;  %v3474_v56 = vld [vmem:[#allocation11 + $0x168] sm:$0xff]  ;;  %v3476_v44 = vld [vmem:[#allocation11 + $0x170] sm:$0xff] }
 0x396   :  { %v1409_v37 = vadd.f32 1.0, %v2317_v50  ;;  %1767 = vmatpush.msra.mxu1 %v3474_v56  ;;  %v3480_v50 = vld [vmem:[#allocation11 + $0x178] sm:$0xff]  ;;  %1787 = vmatpush.msra.mxu2 %v3476_v44 }
 0x397   :  { %2320 = vrcp.f32 %v1390_v19  ;;  %v1402_v11 = vand.u32 2147483648, %v1390_v19  ;;  %v1400_v26 = vand.u32 2147483647, %v1390_v19  ;;  %vm1396_vm3 = vweird.f32 %v1390_v19  ;;  %1807 = vmatpush.msra.mxu3 %v3480_v50 }
 0x398   :  { %2322 = vrcp.f32 %v1409_v37  ;;  %v1421_v12 = vand.u32 2147483648, %v1409_v37  ;;  %v1419_v32 = vand.u32 2147483647, %v1409_v37  ;;  %vm1415_vm4 = vweird.f32 %v1409_v37  ;;  %1788 = vmatpush.msra.mxu2 %v3488_v49 }
 0x399   :  { %v1403_v29 = vor.u32 1.1754944e-38, %v1402_v11  ;;  %vm1401_vm7 = vcmp.eq.f32.partialorder %v1400_v26, 8.507059e+37  ;;  %v3522_v11 = vld [vmem:[#allocation11 + $0xe8] sm:$0xff]  ;;  %v3532_v26 = vld [vmem:[#allocation11 + $0xc0] sm:$0xff] }
 0x39a   :  { %v1422_v47 = vor.u32 1.1754944e-38, %v1421_v12  ;;  %vm1420_vm8 = vcmp.eq.f32.partialorder %v1419_v32, 8.507059e+37  ;;  %1789 = vmatpush.msra.mxu2 %v3500_v25  ;;  %v3524_v12 = vld [vmem:[#allocation11 + $0xf0] sm:$0xff] }
 0x39b   :  { %v2319_v60 = vpop.eup %2318  ;;  %v3536_v32 = vld [vmem:[#allocation11 + $0xd0] sm:$0xff] }
 0x39c   :  { %v1429_v23 = vadd.f32 1.0, %v2319_v60  ;;  %v3492_v60 = vld [vmem:[#allocation11 + $0x158] sm:$0xff] }
 0x39d   :  { %v2321_v63 = vpop.eup %2320  ;;  %1808 = vmatpush.msra.mxu3 %v3492_v60 }
 0x39e   :  { %v2323_v55 = vpop.eup %2322  ;;  %v1392_v61 = vmul.f32 %v2321_v63, %v1390_v19  ;;  %2324 = vrcp.f32 %v1429_v23  ;;  %vm1397_vm1 = vweird.f32 %v2321_v63  ;;  %v1441_v51 = vand.u32 2147483648, %v1429_v23  ;;  %v3484_v19 = vld [vmem:[#allocation11 + $0x140] sm:$0xff] }
 0x39f   :  { %v1411_v62 = vmul.f32 %v2323_v55, %v1409_v37  ;;  %2326 = vtanh.f32 %v1385_v54  ;;  %vm1416_vm2 = vweird.f32 %v2323_v55  ;;  %vm1398_vm5 = vmor %vm1396_vm3, %vm1397_vm1  ;;  %vm1435_vm10 = vweird.f32 %v1429_v23  ;;  %v3486_v37 = vld [vmem:[#allocation11 + $0x148] sm:$0xff]  ;;  %v3504_v54 = vld [vmem:[#allocation11 + $0x138] sm:$0xff] }
 0x3a0   :  { %v1393_v7 = vsub.f32 1.0, %v1392_v61  ;;  %vm1417_vm6 = vmor %vm1415_vm4, %vm1416_vm2  ;;  %v1439_v45 = vand.u32 2147483647, %v1429_v23  ;;  %v1442_v0 = vor.u32 1.1754944e-38, %v1441_v51  ;;  %1768 = vmatpush.msra.mxu1 %v3486_v37  ;;  %1809 = vmatpush.msra.mxu3 %v3504_v54  ;;  %v3510_v61 = vld [vmem:[#allocation11 + $0x108] sm:$0xff]  ;;  %v3566_v51 = vld [vmem:[#allocation11 + $0x98] sm:$0xff] }
 0x3a1   :  { %v1412_v10 = vsub.f32 1.0, %v1411_v62  ;;  %v3512_v62 = vld [vmem:[#allocation11 + $0x110] sm:$0xff] }
 0x3a2   :  { %v1394_v58 = vmul.f32 %v2321_v63, %v1393_v7  ;;  %vm1440_vm12 = vcmp.eq.f32.partialorder %v1439_v45, 8.507059e+37  ;;  %v3516_v7 = vld [vmem:[#allocation11 + $0x118] sm:$0xff]  ;;  %1790 = vmatpush.msra.mxu2 %v3512_v62  ;;  %v3568_v45 = vld [vmem:[#allocation11 + $0x60] sm:$0xff] }
 0x3a3   :  { %v1413_v24 = vmul.f32 %v2323_v55, %v1412_v10  ;;  %1810 = vmatpush.msra.mxu3 %v3516_v7  ;;  %v3520_v10 = vld [vmem:[#allocation11 + $0xe0] sm:$0xff] }
 0x3a4   :  { %v2325_v42 = vpop.eup %2324  ;;  %v1395_v9 = vadd.f32 %v2321_v63, %v1394_v58  ;;  %v3528_v58 = vld [vmem:[#allocation11 + $0xf8] sm:$0xff]  ;;  %1791 = vmatpush.msra.mxu2 %v3524_v12 }
 0x3a5   :  { %v1414_v3 = vadd.f32 %v2323_v55, %v1413_v24  ;;  %v1431_v30 = vmul.f32 %v2325_v42, %v1429_v23  ;;  %v2327_v40 = vpop.eup %2326  ;;  %vm1436_vm9 = vweird.f32 %v2325_v42  ;;  %v3496_v23 = vld [vmem:[#allocation11 + $0x120] sm:$0xff]  ;;  %1811 = vmatpush.msra.mxu3 %v3528_v58  ;;  %v3534_v24 = vld [vmem:[#allocation11 + $0xc8] sm:$0xff] }
 0x3a6   :  { %v1399_v53 = vsel %vm1398_vm5, %v2321_v63, %v1395_v9  ;;  %vm1437_vm11 = vmor %vm1435_vm10, %vm1436_vm9  ;;  %v3498_v63 = vld [vmem:[#allocation11 + $0x128] sm:$0xff]  ;;  %1792 = vmatpush.msra.mxu2 %v3536_v32 }
 0x3a7   :  { %v1404_v48 = vsel %vm1401_vm7, %v1403_v29, %v1399_v53  ;;  %v1418_v6 = vsel %vm1417_vm6, %v2323_v55, %v1414_v3  ;;  %v1432_v52 = vsub.f32 1.0, %v1431_v30  ;;  %1769 = vmatpush.msra.mxu1 %v3498_v63  ;;  %v3508_v55 = vld [vmem:[#allocation11 + $0x100] sm:$0xff]  ;;  %v3540_v29 = vld [vmem:[#allocation11 + $0xd8] sm:$0xff] }
 0x3a8   :  { %v1423_v59 = vsel %vm1420_vm8, %v1422_v47, %v1418_v6  ;;  %v1446_v1 = vmul.f32 %v2327_v40, %v1404_v48  ;;  %v3858_v3 = vld [vmem:[#allocation21_spill] sm:$0xff]  ;;  %v3859_v47 = vld [vmem:[#allocation30_spill] sm:$0xff]  ;;  %1812 = vmatpush.msra.mxu3 %v3540_v29  ;;  %v3548_v48 = vld [vmem:[#allocation11 + $0xa8] sm:$0xff] }
 0x3a9   :  { %v1445_v27 = vmul.f32 %v1423_v59, %v3410_v41  ;;  %v1433_v34 = vmul.f32 %v2325_v42, %v1432_v52  ;;  %v3424_v41 = vld [vmem:[#allocation11 + $0x1e0] sm:$0xff]  ;;  %1770 = vmatpush.msra.mxu1 %v3510_v61  ;;  %v3550_v6 = vld [vmem:[#allocation11 + $0xb0] sm:$0xff]  ;;  %v3554_v52 = vld [vmem:[#allocation11 + $0xb8] sm:$0xff] }
 0x3aa   :  { %1743 = vmatpush.msrb.mxu0 %v3424_v41  ;;  %v3546_v40 = vld [vmem:[#allocation11 + $0xa0] sm:$0xff]  ;;  %1793 = vmatpush.msra.mxu2 %v3550_v6 }
 0x3ab   :  { %v3421_v57 = vadd.f32 %v1446_v1, %v1445_v27  ;;  %v1434_v46 = vadd.f32 %v2325_v42, %v1433_v34  ;;  %1771 = vmatpush.msra.mxu1 %v3522_v11  ;;  %1813 = vmatpush.msra.mxu3 %v3554_v52  ;;  %v3558_v27 = vld [vmem:[#allocation11 + $0x80] sm:$0xff]  ;;  %v3560_v34 = vld [vmem:[#allocation11 + $0x88] sm:$0xff] }
 0x3ac   :  { %1744 = vmatpush.msrb.mxu0 %v3436_v4 }
 0x3ad   :  { %2328 = vtanh.f32 %v3421_v57  ;;  %v1438_v31 = vsel %vm1437_vm11, %v2325_v42, %v1434_v46  ;;  %1772 = vmatpush.msra.mxu1 %v3534_v24  ;;  %v3564_v46 = vld [vmem:[#allocation11 + $0x90] sm:$0xff]  ;;  %1814 = vmatpush.msra.mxu3 %v3566_v51 }
 0x3ae   :  { %v1443_v14 = vsel %vm1440_vm12, %v1442_v0, %v1438_v31  ;;  %1745 = vmatpush.msrb.mxu0 %v3448_v38  ;;  %1794 = vmatpush.msra.mxu2 %v3564_v46  ;;  %v3572_v31 = vld [vmem:[#allocation11 + $0x68] sm:$0xff]  ;;  %v3574_v0 = vld [vmem:[#allocation11 + $0x70] sm:$0xff] }
 0x3af   :  { %1773 = vmatpush.msra.mxu1 %v3548_v48  ;;  %3860 = vst [vmem:[#allocation52_spill] sm:$0xff] %v3572_v31 }
 0x3b0   :  { %1746 = vmatpush.msrb.mxu0 %v3460_v39  ;;  %3861 = vst [vmem:[#allocation53_spill] sm:$0xff] %v3574_v0  ;;  %1795 = vmatpush.msra.mxu2 %v3574_v0 }
 0x3b1   :  { %1774 = vmatpush.msra.mxu1 %v3560_v34 }
 0x3b2   :  { %1747 = vmatpush.msrb.mxu0 %v3472_v18 }
 0x3b3   :  { %v2329_v13 = vpop.eup %2328  ;;  %1775 = vmatpush.msra.mxu1 %v3572_v31  ;;  %v3599_v31 = vld [vmem:[#allocation11 + $0x38] sm:$0xff] }
 0x3b4   :  { %v1449_v22 = vmul.f32 %v2329_v13, %v1443_v14  ;;  %1748 = vmatpush.msrb.mxu0 %v3484_v19  ;;  %v3576_v13 = vld [vmem:[#allocation11 + $0x78] sm:$0xff]  ;;  %v3580_v14 = vld [vmem:[#allocation11 + $0x40] sm:$0xff] }
 0x3b5   :  { %3862 = vst [vmem:[#allocation54_spill] sm:$0xff] %v3576_v13  ;;  %1815 = vmatpush.msra.mxu3 %v3576_v13  ;;  %v3603_v13 = vld [vmem:[#allocation11 + $0x8] sm:$0xff] }
 0x3b6   :  { %1539 = vmatmul.f32.vlgmr.msra.gmra.mxu0 %v1449_v22  ;;  %1559 = vmatmul.f32.vlgmr.msrb.gmra.mxu1 %v1449_v22  ;;  %3863 = vst [vmem:[#allocation55_spill] sm:$0xff] %v3580_v14 }
 0x3b7   :  { %1579 = vmatmul.f32.vlgmr.msrb.gmra.mxu2 %v1449_v22  ;;  %1599 = vmatmul.f32.vlgmr.msrb.gmra.mxu3 %v1449_v22  ;;  %v3582_v22 = vld [vmem:[#allocation11 + $0x48] sm:$0xff] }
 0x3b8   :  { %1749 = vmatpush.msrb.mxu0 %v3496_v23  ;;  %3864 = vst [vmem:[#allocation56_spill] sm:$0xff] %v3582_v22  ;;  %1776 = vmatpush.msra.mxu1 %v3582_v22 }
 0x3ba   :  { %1750 = vmatpush.msrb.mxu0 %v3508_v55 }
 0x3bc   :  { %1751 = vmatpush.msrb.mxu0 %v3520_v10 }
 0x3be   :  { %1752 = vmatpush.msrb.mxu0 %v3532_v26 }
 0x3c0   :  { %1753 = vmatpush.msrb.mxu0 %v3546_v40 }
 0x3c2   :  { %1754 = vmatpush.msrb.mxu0 %v3558_v27 }
 0x3c4   :  { %1755 = vmatpush.msrb.mxu0 %v3568_v45 }
 0x3c6   :  { %1756 = vmatpush.msrb.mxu0 %v3580_v14 }
 0x433   :  { %v1540_v42 = vpop.f32.mrf.mxu0  ;;  %v1560_v9 = vpop.f32.mrf.mxu1 }
 0x434   :  { %v1603_v30 = vadd.f32 %v1540_v42, %v3858_v3  ;;  %v1604_v53 = vadd.f32 %v1560_v9, %v3859_v47  ;;  %v3584_v42 = vld [vmem:[#allocation11 + $0x50] sm:$0xff]  ;;  %v3588_v3 = vld [vmem:[#allocation11 + $0x58] sm:$0xff]  ;;  %v3592_v47 = vld [vmem:[#allocation11 + $0x28] sm:$0xff] }
 0x435   :  { %3865 = vst [vmem:[#allocation57_spill] sm:$0xff] %v3584_v42  ;;  %1796 = vmatpush.msra.mxu2 %v3584_v42  ;;  %1816 = vmatpush.msra.mxu3 %v3588_v3 }
 0x436   :  { %v2223_v59 = vmul.f32 -1.442695, %v1603_v30  ;;  %v2224_v1 = vmul.f32 -1.442695, %v1604_v53  ;;  %v3590_v30 = vld [vmem:[#allocation11 + $0x20] sm:$0xff]  ;;  %v3866_v53 = vld [vmem:[#allocation32_spill] sm:$0xff]  ;;  %1777 = vmatpush.msra.mxu1 %v3592_v47 }
 0x437   :  { %1757 = vmatpush.msrb.mxu0 %v3590_v30  ;;  %1817 = vmatpush.msra.mxu3 %v3599_v31 }
 0x438   :  { %2330 = vpow2.f32 %v2223_v59  ;;  %1778 = vmatpush.msra.mxu1 %v3603_v13 }
 0x439   :  { %2332 = vpow2.f32 %v2224_v1  ;;  %v3597_v1 = vld [vmem:[#allocation11 + $0x30] sm:$0xff]  ;;  %1758 = vmatpush.msrb.mxu0 %v3415_v20 }
 0x43a   :  { %v1600_v9 = vpop.f32.mrf.mxu3  ;;  %1797 = vmatpush.msra.mxu2 %v3597_v1  ;;  %1983 = vmatpush.msrb.mxu1 %v3426_v2 }
 0x43b   :  { %v1606_v59 = vadd.f32 %v1600_v9, %v3866_v53  ;;  %v3607_v9 = vld [vmem:[#allocation11 + $0x10] sm:$0xff]  ;;  %v3609_v53 = vld [vmem:[#allocation11 + $0x18] sm:$0xff]  ;;  %1963 = vmatpush.msra.mxu0 %v3424_v41 }
 0x43c   :  { %1798 = vmatpush.msra.mxu2 %v3607_v9  ;;  %1818 = vmatpush.msra.mxu3 %v3609_v53 }
 0x43d   :  { %v2225_v0 = vmul.f32 -1.442695, %v1606_v59  ;;  %1964 = vmatpush.msra.mxu0 %v3436_v4  ;;  %1984 = vmatpush.msrb.mxu1 %v3438_v5 }
 0x43e   :  { %v2331_v22 = vpop.eup %2330  ;;  %2003 = vmatpush.msrb.mxu2 %v3428_v33  ;;  %2023 = vmatpush.msrb.mxu3 %v3432_v43  ;;  %v3867_v33 = vld [vmem:[#allocation31_spill] sm:$0xff] }
 0x43f   :  { %v2333_v14 = vpop.eup %2332  ;;  %v3613_v42 = vadd.f32 1.0, %v2331_v22  ;;  %2334 = vpow2.f32 %v2225_v0  ;;  %v1580_v0 = vpop.f32.mrf.mxu2  ;;  %1965 = vmatpush.msra.mxu0 %v3448_v38  ;;  %1985 = vmatpush.msrb.mxu1 %v3450_v28 }
 0x440   :  { %v3617_v59 = vadd.f32 1.0, %v2333_v14  ;;  %2004 = vmatpush.msrb.mxu2 %v3440_v17  ;;  %2024 = vmatpush.msrb.mxu3 %v3444_v15  ;;  %v1605_v43 = vadd.f32 %v1580_v0, %v3867_v33 }
 0x441   :  { %2336 = vrcp.f32 %v3613_v42  ;;  %1966 = vmatpush.msra.mxu0 %v3460_v39  ;;  %1986 = vmatpush.msrb.mxu1 %v3462_v16  ;;  %v1622_v28 = vand.u32 2147483648, %v3613_v42  ;;  %v1620_v39 = vand.u32 2147483647, %v3613_v42  ;;  %vm1616_vm15 = vweird.f32 %v3613_v42 }
 0x442   :  { %2338 = vrcp.f32 %v3617_v59  ;;  %2005 = vmatpush.msrb.mxu2 %v3452_v35  ;;  %2025 = vmatpush.msrb.mxu3 %v3456_v36  ;;  %v1641_v35 = vand.u32 2147483648, %v3617_v59  ;;  %vm1635_vm0 = vweird.f32 %v3617_v59 }
 0x443   :  { %1967 = vmatpush.msra.mxu0 %v3472_v18  ;;  %1987 = vmatpush.msrb.mxu1 %v3474_v56  ;;  %v1623_v56 = vor.u32 1.1754944e-38, %v1622_v28  ;;  %vm1621_vm3 = vcmp.eq.f32.partialorder %v1620_v39, 8.507059e+37 }
 0x444   :  { %2006 = vmatpush.msrb.mxu2 %v3464_v21  ;;  %2026 = vmatpush.msrb.mxu3 %v3468_v8  ;;  %v1639_v21 = vand.u32 2147483647, %v3617_v59 }
 0x445   :  { %v2335_v14 = vpop.eup %2334  ;;  %1968 = vmatpush.msra.mxu0 %v3484_v19  ;;  %1988 = vmatpush.msrb.mxu1 %v3486_v37  ;;  %v1642_v19 = vor.u32 1.1754944e-38, %v1641_v35 }
 0x446   :  { %v3633_v41 = vadd.f32 1.0, %v2335_v14  ;;  %2007 = vmatpush.msrb.mxu2 %v3476_v44  ;;  %2027 = vmatpush.msrb.mxu3 %v3480_v50  ;;  %vm1640_vm4 = vcmp.eq.f32.partialorder %v1639_v21, 8.507059e+37 }
 0x447   :  { %v2337_v2 = vpop.eup %2336  ;;  %1969 = vmatpush.msra.mxu0 %v3496_v23  ;;  %1989 = vmatpush.msrb.mxu1 %v3498_v63 }
 0x448   :  { %v2339_v4 = vpop.eup %2338  ;;  %v1612_v5 = vmul.f32 %v2337_v2, %v3613_v42  ;;  %2340 = vrcp.f32 %v3633_v41  ;;  %vm1617_vm13 = vweird.f32 %v2337_v2  ;;  %2008 = vmatpush.msrb.mxu2 %v3488_v49  ;;  %2028 = vmatpush.msrb.mxu3 %v3492_v60  ;;  %vm1655_vm6 = vweird.f32 %v3633_v41 }
 0x449   :  { %v1631_v17 = vmul.f32 %v2339_v4, %v3617_v59  ;;  %2342 = vtanh.f32 %v1605_v43  ;;  %vm1636_vm14 = vweird.f32 %v2339_v4  ;;  %vm1618_vm1 = vmor %vm1616_vm15, %vm1617_vm13  ;;  %1970 = vmatpush.msra.mxu0 %v3508_v55  ;;  %1990 = vmatpush.msrb.mxu1 %v3510_v61 }
 0x44a   :  { %v1613_v15 = vsub.f32 1.0, %v1612_v5  ;;  %2009 = vmatpush.msrb.mxu2 %v3500_v25  ;;  %2029 = vmatpush.msrb.mxu3 %v3504_v54  ;;  %vm1637_vm2 = vmor %vm1635_vm0, %vm1636_vm14 }
 0x44b   :  { %v1632_v38 = vsub.f32 1.0, %v1631_v17  ;;  %1971 = vmatpush.msra.mxu0 %v3520_v10  ;;  %1991 = vmatpush.msrb.mxu1 %v3522_v11  ;;  %v1659_v10 = vand.u32 2147483647, %v3633_v41  ;;  %v3868_v11 = vld [vmem:[#allocation52_spill] sm:$0xff] }
 0x44c   :  { %v1614_v36 = vmul.f32 %v2337_v2, %v1613_v15  ;;  %2010 = vmatpush.msrb.mxu2 %v3512_v62  ;;  %2030 = vmatpush.msrb.mxu3 %v3516_v7 }
 0x44d   :  { %v1633_v16 = vmul.f32 %v2339_v4, %v1632_v38  ;;  %1972 = vmatpush.msra.mxu0 %v3532_v26  ;;  %1992 = vmatpush.msrb.mxu1 %v3534_v24  ;;  %v3870_v26 = vld [vmem:[#allocation54_spill] sm:$0xff]  ;;  %vm1660_vm8 = vcmp.eq.f32.partialorder %v1659_v10, 8.507059e+37 }
 0x44e   :  { %v3659_v8 = vpop.eup %2340  ;;  %v1615_v18 = vadd.f32 %v2337_v2, %v1614_v36  ;;  %2011 = vmatpush.msrb.mxu2 %v3524_v12  ;;  %2031 = vmatpush.msrb.mxu3 %v3528_v58  ;;  %v3869_v58 = vld [vmem:[#allocation53_spill] sm:$0xff] }
 0x44f   :  { %v1634_v44 = vadd.f32 %v2339_v4, %v1633_v16  ;;  %v1651_v50 = vmul.f32 %v3659_v8, %v3633_v41  ;;  %v2343_v49 = vpop.eup %2342  ;;  %1973 = vmatpush.msra.mxu0 %v3546_v40  ;;  %1993 = vmatpush.msrb.mxu1 %v3548_v48  ;;  %vm1656_vm5 = vweird.f32 %v3659_v8  ;;  %v3873_v40 = vld [vmem:[#allocation57_spill] sm:$0xff] }
 0x450   :  { %v1619_v37 = vsel %vm1618_vm1, %v2337_v2, %v1615_v18  ;;  %2012 = vmatpush.msrb.mxu2 %v3536_v32  ;;  %2032 = vmatpush.msrb.mxu3 %v3540_v29  ;;  %vm1657_vm7 = vmor %vm1655_vm6, %vm1656_vm5  ;;  %v3871_v32 = vld [vmem:[#allocation55_spill] sm:$0xff]  ;;  %v3872_v29 = vld [vmem:[#allocation56_spill] sm:$0xff] }
 0x451   :  { %v1624_v60 = vsel %vm1621_vm3, %v1623_v56, %v1619_v37  ;;  %v1638_v23 = vsel %vm1637_vm2, %v2339_v4, %v1634_v44  ;;  %v1652_v63 = vsub.f32 1.0, %v1651_v50  ;;  %1974 = vmatpush.msra.mxu0 %v3558_v27  ;;  %1994 = vmatpush.msrb.mxu1 %v3560_v34  ;;  %v3877_v2 = vld [vmem:[#allocation34_spill] sm:$0xff] }
 0x452   :  { %v1643_v25 = vsel %vm1640_vm4, %v1642_v19, %v1638_v23  ;;  %v1666_v54 = vmul.f32 %v2343_v49, %v1624_v60  ;;  %2013 = vmatpush.msrb.mxu2 %v3550_v6  ;;  %2033 = vmatpush.msrb.mxu3 %v3554_v52 }
 0x453   :  { %v1665_v55 = vmul.f32 %v1643_v25, %v3421_v57  ;;  %v1653_v61 = vmul.f32 %v3659_v8, %v1652_v63  ;;  %v1661_v57 = vand.u32 2147483648, %v3633_v41  ;;  %1975 = vmatpush.msra.mxu0 %v3568_v45  ;;  %1995 = vmatpush.msrb.mxu1 %v3868_v11  ;;  %v3875_v45 = vld [vmem:[#allocation33_spill] sm:$0xff] }
 0x454   :  { %2014 = vmatpush.msrb.mxu2 %v3564_v46  ;;  %2034 = vmatpush.msrb.mxu3 %v3566_v51  ;;  %v3874_v46 = vld [vmem:[#allocation20_spill] sm:$0xff] }
 0x455   :  { %v3683_v62 = vadd.f32 %v1666_v54, %v1665_v55  ;;  %v1654_v7 = vadd.f32 %v3659_v8, %v1653_v61  ;;  %v1662_v24 = vor.u32 1.1754944e-38, %v1661_v57  ;;  %1976 = vmatpush.msra.mxu0 %v3871_v32  ;;  %1996 = vmatpush.msrb.mxu1 %v3872_v29  ;;  %v2130_v32 = vld [vmem:[#allocation13 + $0x70] sm:$0xff]  ;;  %v2129_v29 = vld [vmem:[#allocation13 + $0x68] sm:$0xff] }
 0x456   :  { %2015 = vmatpush.msrb.mxu2 %v3869_v58  ;;  %2035 = vmatpush.msrb.mxu3 %v3870_v26 }
 0x457   :  { %2344 = vtanh.f32 %v3683_v62  ;;  %v1658_v12 = vsel %vm1657_vm7, %v3659_v8, %v1654_v7  ;;  %1977 = vmatpush.msra.mxu0 %v3590_v30  ;;  %1997 = vmatpush.msrb.mxu1 %v3592_v47 }
 0x458   :  { %2016 = vmatpush.msrb.mxu2 %v3873_v40  ;;  %2036 = vmatpush.msrb.mxu3 %v3588_v3  ;;  %v1663_v6 = vsel %vm1660_vm8, %v1662_v24, %v1658_v12  ;;  %v2128_v40 = vld [vmem:[#allocation13 + $0x60] sm:$0xff] }
 0x459   :  { %1978 = vmatpush.msra.mxu0 %v3415_v20  ;;  %1998 = vmatpush.msrb.mxu1 %v3603_v13  ;;  %v3876_v13 = vld [vmem:[#allocation35_spill] sm:$0xff] }
 0x45a   :  { %2017 = vmatpush.msrb.mxu2 %v3597_v1  ;;  %2037 = vmatpush.msrb.mxu3 %v3599_v31 }
 0x45c   :  { %2018 = vmatpush.msrb.mxu2 %v3607_v9  ;;  %2038 = vmatpush.msrb.mxu3 %v3609_v53 }
 0x45d   :  { %v2345_v48 = vpop.eup %2344 }
 0x45e   :  { %v1669_v52 = vmul.f32 %v2345_v48, %v1663_v6  ;;  %v2127_v48 = vld [vmem:[#allocation13 + $0x58] sm:$0xff]  ;;  %v2126_v6 = vld [vmem:[#allocation13 + $0x50] sm:$0xff] }
 0x460   :  { %1759 = vmatmul.f32.vlgmr.msrb.gmra.mxu0 %v1669_v52  ;;  %1779 = vmatmul.f32.vlgmr.msra.gmra.mxu1 %v1669_v52 }
 0x461   :  { %1799 = vmatmul.f32.vlgmr.msra.gmra.mxu2 %v1669_v52  ;;  %1819 = vmatmul.f32.vlgmr.msra.gmra.mxu3 %v1669_v52  ;;  %v2125_v52 = vld [vmem:[#allocation13 + $0x48] sm:$0xff] }
 0x4dd   :  { %v1760_v27 = vpop.f32.mrf.mxu0  ;;  %v1780_v34 = vpop.f32.mrf.mxu1 }
 0x4de   :  { %v1823_v51 = vadd.f32 %v1760_v27, %v3874_v46  ;;  %v1824_v22 = vadd.f32 %v1780_v34, %v3875_v45  ;;  %v2124_v27 = vld [vmem:[#allocation13 + $0x40] sm:$0xff]  ;;  %v2123_v34 = vld [vmem:[#allocation13 + $0x38] sm:$0xff]  ;;  %v2122_v46 = vld [vmem:[#allocation13 + $0x30] sm:$0xff] }
 0x4e0   :  { %v2226_v42 = vmul.f32 -1.442695, %v1823_v51  ;;  %v2227_v31 = vmul.f32 -1.442695, %v1824_v22  ;;  %v3878_v22 = vld [vmem:[#allocation19_spill] sm:$0xff] }
 0x4e2   :  { %2346 = vpow2.f32 %v2226_v42 }
 0x4e3   :  { %2348 = vpow2.f32 %v2227_v31  ;;  %v3879_v31 = vld [vmem:[#allocation36_spill] sm:$0xff] }
 0x4e4   :  { %v1820_v20 = vpop.f32.mrf.mxu3  ;;  %v1800_v53 = vpop.f32.mrf.mxu2 }
 0x4e5   :  { %v1826_v3 = vadd.f32 %v1820_v20, %v3876_v13  ;;  %v1825_v33 = vadd.f32 %v1800_v53, %v3877_v2  ;;  %v2121_v13 = vld [vmem:[#allocation13 + $0x28] sm:$0xff] }
 0x4e6   :  { %v2117_v53 = vld [vmem:[#allocation13 + $0x8] sm:$0xff] }
 0x4e7   :  { %v2228_v30 = vmul.f32 -1.442695, %v1826_v3 }
 0x4e8   :  { %v2347_v47 = vpop.eup %2346 }
 0x4e9   :  { %v2349_v1 = vpop.eup %2348  ;;  %v1830_v59 = vadd.f32 1.0, %v2347_v47  ;;  %2350 = vpow2.f32 %v2228_v30  ;;  %v2120_v47 = vld [vmem:[#allocation13 + $0x20] sm:$0xff] }
 0x4ea   :  { %v1849_v9 = vadd.f32 1.0, %v2349_v1  ;;  %v2119_v1 = vld [vmem:[#allocation13 + $0x18] sm:$0xff] }
 0x4eb   :  { %2352 = vrcp.f32 %v1830_v59  ;;  %v1842_v38 = vand.u32 2147483648, %v1830_v59  ;;  %v1840_v36 = vand.u32 2147483647, %v1830_v59  ;;  %vm1836_vm11 = vweird.f32 %v1830_v59 }
 0x4ec   :  { %2354 = vrcp.f32 %v1849_v9  ;;  %v1861_v28 = vand.u32 2147483648, %v1849_v9  ;;  %v1859_v16 = vand.u32 2147483647, %v1849_v9  ;;  %vm1855_vm12 = vweird.f32 %v1849_v9 }
 0x4ed   :  { %v1843_v18 = vor.u32 1.1754944e-38, %v1842_v38  ;;  %vm1841_vm15 = vcmp.eq.f32.partialorder %v1840_v36, 8.507059e+37 }
 0x4ee   :  { %v1862_v50 = vor.u32 1.1754944e-38, %v1861_v28  ;;  %vm1860_vm0 = vcmp.eq.f32.partialorder %v1859_v16, 8.507059e+37 }
 0x4ef   :  { %v2351_v0 = vpop.eup %2350 }
 0x4f0   :  { %v1869_v14 = vadd.f32 1.0, %v2351_v0  ;;  %v3880_v0 = vld [vmem:[#allocation38_spill] sm:$0xff] }
 0x4f1   :  { %v2353_v41 = vpop.eup %2352 }
 0x4f2   :  { %v2355_v43 = vpop.eup %2354  ;;  %v1832_v4 = vmul.f32 %v2353_v41, %v1830_v59  ;;  %2356 = vrcp.f32 %v1869_v14  ;;  %vm1837_vm9 = vweird.f32 %v2353_v41  ;;  %v1881_v57 = vand.u32 2147483648, %v1869_v14  ;;  %v2118_v59 = vld [vmem:[#allocation13 + $0x10] sm:$0xff] }
 0x4f3   :  { %v1851_v5 = vmul.f32 %v2355_v43, %v1849_v9  ;;  %2358 = vtanh.f32 %v1825_v33  ;;  %vm1856_vm10 = vweird.f32 %v2355_v43  ;;  %vm1838_vm13 = vmor %vm1836_vm11, %vm1837_vm9  ;;  %vm1875_vm2 = vweird.f32 %v1869_v14 }
 0x4f4   :  { %v1833_v17 = vsub.f32 1.0, %v1832_v4  ;;  %vm1857_vm14 = vmor %vm1855_vm12, %vm1856_vm10  ;;  %v1879_v10 = vand.u32 2147483647, %v1869_v14  ;;  %v1882_v12 = vor.u32 1.1754944e-38, %v1881_v57 }
 0x4f5   :  { %v1852_v15 = vsub.f32 1.0, %v1851_v5 }
 0x4f6   :  { %v1834_v35 = vmul.f32 %v2353_v41, %v1833_v17  ;;  %vm1880_vm4 = vcmp.eq.f32.partialorder %v1879_v10, 8.507059e+37 }
 0x4f7   :  { %v1853_v39 = vmul.f32 %v2355_v43, %v1852_v15 }
 0x4f8   :  { %v2357_v21 = vpop.eup %2356  ;;  %v1835_v8 = vadd.f32 %v2353_v41, %v1834_v35  ;;  %v3881_v35 = vld [vmem:[#allocation37_spill] sm:$0xff] }
 0x4f9   :  { %v1854_v56 = vadd.f32 %v2355_v43, %v1853_v39  ;;  %v1871_v44 = vmul.f32 %v2357_v21, %v1869_v14  ;;  %v2359_v37 = vpop.eup %2358  ;;  %vm1876_vm1 = vweird.f32 %v2357_v21 }
 0x4fa   :  { %v1839_v19 = vsel %vm1838_vm13, %v2353_v41, %v1835_v8  ;;  %vm1877_vm3 = vmor %vm1875_vm2, %vm1876_vm1  ;;  %v2116_v41 = vld [vmem:[#allocation13] sm:$0xff] }
 0x4fb   :  { %v1844_v49 = vsel %vm1841_vm15, %v1843_v18, %v1839_v19  ;;  %v1858_v60 = vsel %vm1857_vm14, %v2355_v43, %v1854_v56  ;;  %v1872_v23 = vsub.f32 1.0, %v1871_v44 }
 0x4fc   :  { %v1863_v63 = vsel %vm1860_vm0, %v1862_v50, %v1858_v60  ;;  %v1886_v25 = vmul.f32 %v2359_v37, %v1844_v49 }
 0x4fd   :  { %v1885_v54 = vmul.f32 %v1863_v63, %v3683_v62  ;;  %v1873_v55 = vmul.f32 %v2357_v21, %v1872_v23  ;;  %v2131_v62 = vld [vmem:[#allocation13 + $0x78] sm:$0xff] }
 0x4fe   :  { %2136 = vmatpush.msrb.mxu0 %v2131_v62 }
 0x4ff   :  { %v3721_v61 = vadd.f32 %v1886_v25, %v1885_v54  ;;  %v1874_v7 = vadd.f32 %v2357_v21, %v1873_v55 }
 0x500   :  { %2137 = vmatpush.msrb.mxu0 %v2130_v32 }
 0x501   :  { %2360 = vtanh.f32 %v3721_v61  ;;  %v1878_v11 = vsel %vm1877_vm3, %v2357_v21, %v1874_v7 }
 0x502   :  { %v1883_v26 = vsel %vm1880_vm4, %v1882_v12, %v1878_v11  ;;  %2138 = vmatpush.msrb.mxu0 %v2129_v29 }
 0x504   :  { %2139 = vmatpush.msrb.mxu0 %v2128_v40 }
 0x506   :  { %2140 = vmatpush.msrb.mxu0 %v2127_v48 }
 0x507   :  { %v2361_v58 = vpop.eup %2360 }
 0x508   :  { %v1889_v24 = vmul.f32 %v2361_v58, %v1883_v26  ;;  %2141 = vmatpush.msrb.mxu0 %v2126_v6 }
 0x50a   :  { %1979 = vmatmul.f32.vlgmr.msra.gmra.mxu0 %v1889_v24  ;;  %1999 = vmatmul.f32.vlgmr.msrb.gmra.mxu1 %v1889_v24 }
 0x50b   :  { %2019 = vmatmul.f32.vlgmr.msrb.gmra.mxu2 %v1889_v24  ;;  %2039 = vmatmul.f32.vlgmr.msrb.gmra.mxu3 %v1889_v24 }
 0x50c   :  { %2142 = vmatpush.msrb.mxu0 %v2125_v52 }
 0x50e   :  { %2143 = vmatpush.msrb.mxu0 %v2124_v27 }
 0x510   :  { %2144 = vmatpush.msrb.mxu0 %v2123_v34 }
 0x512   :  { %2145 = vmatpush.msrb.mxu0 %v2122_v46 }
 0x514   :  { %2146 = vmatpush.msrb.mxu0 %v2121_v13 }
 0x516   :  { %2147 = vmatpush.msrb.mxu0 %v2120_v47 }
 0x518   :  { %2148 = vmatpush.msrb.mxu0 %v2119_v1 }
 0x51a   :  { %2149 = vmatpush.msrb.mxu0 %v2118_v59 }
 0x51c   :  { %2150 = vmatpush.msrb.mxu0 %v2117_v53 }
 0x51e   :  { %2151 = vmatpush.msrb.mxu0 %v2116_v41 }
 0x587   :  { %v1980_v51 = vpop.f32.mrf.mxu0  ;;  %v2000_v45 = vpop.f32.mrf.mxu1 }
 0x588   :  { %v2043_v42 = vadd.f32 %v1980_v51, %v3878_v22  ;;  %v2044_v20 = vadd.f32 %v2000_v45, %v3879_v31 }
 0x58a   :  { %v2229_v3 = vmul.f32 -1.442695, %v2043_v42  ;;  %v2230_v30 = vmul.f32 -1.442695, %v2044_v20 }
 0x58c   :  { %2362 = vpow2.f32 %v2229_v3 }
 0x58d   :  { %2364 = vpow2.f32 %v2230_v30 }
 0x58e   :  { %v2040_v9 = vpop.f32.mrf.mxu3  ;;  %v2020_v17 = vpop.f32.mrf.mxu2 }
 0x58f   :  { %v2046_v14 = vadd.f32 %v2040_v9, %v3880_v0  ;;  %v2045_v36 = vadd.f32 %v2020_v17, %v3881_v35 }
 0x591   :  { %v2231_v2 = vmul.f32 -1.442695, %v2046_v14 }
 0x592   :  { %v2363_v33 = vpop.eup %2362 }
 0x593   :  { %v2365_v43 = vpop.eup %2364  ;;  %v2050_v4 = vadd.f32 1.0, %v2363_v33  ;;  %2366 = vpow2.f32 %v2231_v2 }
 0x594   :  { %v2069_v5 = vadd.f32 1.0, %v2365_v43 }
 0x595   :  { %2368 = vrcp.f32 %v2050_v4  ;;  %v2062_v56 = vand.u32 2147483648, %v2050_v4  ;;  %v2060_v19 = vand.u32 2147483647, %v2050_v4  ;;  %vm2056_vm7 = vweird.f32 %v2050_v4 }
 0x596   :  { %2370 = vrcp.f32 %v2069_v5  ;;  %v2081_v44 = vand.u32 2147483648, %v2069_v5  ;;  %v2079_v49 = vand.u32 2147483647, %v2069_v5  ;;  %vm2075_vm8 = vweird.f32 %v2069_v5 }
 0x597   :  { %v2063_v63 = vor.u32 1.1754944e-38, %v2062_v56  ;;  %vm2061_vm11 = vcmp.eq.f32.partialorder %v2060_v19, 8.507059e+37 }
 0x598   :  { %v2082_v55 = vor.u32 1.1754944e-38, %v2081_v44  ;;  %vm2080_vm12 = vcmp.eq.f32.partialorder %v2079_v49, 8.507059e+37 }
 0x599   :  { %v2367_v15 = vpop.eup %2366 }
 0x59a   :  { %v2089_v38 = vadd.f32 1.0, %v2367_v15 }
 0x59b   :  { %v2369_v28 = vpop.eup %2368 }
 0x59c   :  { %v2371_v39 = vpop.eup %2370  ;;  %v2052_v16 = vmul.f32 %v2369_v28, %v2050_v4  ;;  %2372 = vrcp.f32 %v2089_v38  ;;  %vm2057_vm5 = vweird.f32 %v2369_v28  ;;  %v2101_v40 = vand.u32 2147483648, %v2089_v38 }
 0x59d   :  { %v2071_v21 = vmul.f32 %v2371_v39, %v2069_v5  ;;  %2374 = vtanh.f32 %v2045_v36  ;;  %vm2076_vm6 = vweird.f32 %v2371_v39  ;;  %vm2058_vm9 = vmor %vm2056_vm7, %vm2057_vm5  ;;  %vm2095_vm14 = vweird.f32 %v2089_v38 }
 0x59e   :  { %v2053_v8 = vsub.f32 1.0, %v2052_v16  ;;  %vm2077_vm10 = vmor %vm2075_vm8, %vm2076_vm6  ;;  %v2099_v48 = vand.u32 2147483647, %v2089_v38  ;;  %v2102_v52 = vor.u32 1.1754944e-38, %v2101_v40 }
 0x59f   :  { %v2072_v18 = vsub.f32 1.0, %v2071_v21 }
 0x5a0   :  { %v2054_v50 = vmul.f32 %v2369_v28, %v2053_v8  ;;  %vm2100_vm0 = vcmp.eq.f32.partialorder %v2099_v48, 8.507059e+37 }
 0x5a1   :  { %v2073_v37 = vmul.f32 %v2371_v39, %v2072_v18 }
 0x5a2   :  { %v2373_v60 = vpop.eup %2372  ;;  %v2055_v23 = vadd.f32 %v2369_v28, %v2054_v50 }
 0x5a3   :  { %v2074_v25 = vadd.f32 %v2371_v39, %v2073_v37  ;;  %v2091_v54 = vmul.f32 %v2373_v60, %v2089_v38  ;;  %v2375_v57 = vpop.eup %2374  ;;  %vm2096_vm13 = vweird.f32 %v2373_v60 }
 0x5a4   :  { %v2059_v7 = vsel %vm2058_vm9, %v2369_v28, %v2055_v23  ;;  %vm2097_vm15 = vmor %vm2095_vm14, %vm2096_vm13 }
 0x5a5   :  { %v2064_v10 = vsel %vm2061_vm11, %v2063_v63, %v2059_v7  ;;  %v2078_v11 = vsel %vm2077_vm10, %v2371_v39, %v2074_v25  ;;  %v2092_v12 = vsub.f32 1.0, %v2091_v54 }
 0x5a6   :  { %v2083_v58 = vsel %vm2080_vm12, %v2082_v55, %v2078_v11  ;;  %v2106_v26 = vmul.f32 %v2375_v57, %v2064_v10 }
 0x5a7   :  { %v2105_v24 = vmul.f32 %v2083_v58, %v3721_v61  ;;  %v2093_v62 = vmul.f32 %v2373_v60, %v2092_v12  ;;  %v2249_v61 = vld [vmem:[%s3740_s5] ss:$0 sm:$0xff] }
 0x5a9   :  { %v2107_v32 = vadd.f32 %v2106_v26, %v2105_v24  ;;  %v2094_v29 = vadd.f32 %v2373_v60, %v2093_v62 }
 0x5ab   :  { %2376 = vtanh.f32 %v2107_v32  ;;  %v2098_v6 = vsel %vm2097_vm15, %v2373_v60, %v2094_v29 }
 0x5ac   :  { %v2103_v34 = vsel %vm2100_vm0, %v2102_v52, %v2098_v6 }
 0x5b1   :  { %v2377_v27 = vpop.eup %2376 }
 0x5b2   :  { %v2109_v46 = vmul.f32 %v2377_v27, %v2103_v34 }
 0x5b4   :  { %2152 = vmatmul.f32.vlgmr.msrb.gmra.mxu0 %v2109_v46 }
 0x631   :  { %v2153_v51 = vpop.f32.mrf.mxu0 }
 0x632   :  { %v2154_v45 = vadd.f32 %v2249_v61, %v2153_v51 }
 0x634   :  { %2156 = vst [vmem:[#allocation14] sm:$0xff] %v2154_v45 }
 0x635   :  { %2167 = dma.vmem_to_hbm [thread:$0]  %s2163_s24, 128, %s2165_s27, [#allocation7]  }
 0x636   :  { %2528 = dma.done.wait [#allocation7], 128  }
 0x637   :  { %2529 = vsyncadd [#allocation7], 4294967168 }
 0x638   :  { %2172 = vsyncpa [#allocation6], 1 }
 0x639   :  { %2173 = vsyncpa [#allocation9], 1 }
 0x63a   :  { %2174 = vsyncpa [#allocation12], 1 }
 0x63b   :  { %2175 = vsyncpa [#allocation7], 1 }

</bundles_post_ra>
